<compile_context>
chip_gen: v6e
topology: v6e:2x2x1
jax: 0.10.0
libtpu: 0.0.40
codegen_flags: <defaults>
</compile_context>

<pallas_src>
import functools
import math

import jax
import jax.numpy as jnp
import numpy as np
from jax import lax
from jax.experimental import pallas as pl
from jax.experimental.pallas import tpu as pltpu

VMEM_SPEC = pl.BlockSpec(memory_space=pltpu.MemorySpace.VMEM)


def _round_up(x, m):
    return (x + m - 1) // m * m


# --------------------------------------------------------------------------
# Kernel 1: plain matmul + bias (1x1 conv head), row-tiled "parallel" grid
# --------------------------------------------------------------------------
def _matmul_bias_kernel(x_ref, w_ref, b_ref, o_ref):
    o_ref[...] = (jnp.dot(x_ref[...], w_ref[...],
                          preferred_element_type=jnp.float32) + b_ref[...])


def matmul_bias(x, w, b, *, tm=64):
    """x: (R, K) bf16, w: (K, C) bf16, b: (1, C) f32 -> (R, C) f32."""
    R, K = x.shape
    C = w.shape[1]
    tm = min(tm, R)
    return pl.pallas_call(
        _matmul_bias_kernel,
        out_shape=jax.ShapeDtypeStruct((R, C), jnp.float32),
        grid=(pl.cdiv(R, tm),),
        in_specs=[pl.BlockSpec((tm, K), lambda i: (i, 0)),
                  pl.BlockSpec((K, C), lambda i: (0, 0)),
                  pl.BlockSpec((1, C), lambda i: (0, 0))],
        out_specs=pl.BlockSpec((tm, C), lambda i: (i, 0)),
        compiler_params=pltpu.CompilerParams(
            dimension_semantics=("parallel",)),
        cost_estimate=pl.CostEstimate(
            flops=2 * R * K * C, transcendentals=0,
            bytes_accessed=x.size * 2 + w.size * 2 + b.size * 4 + R * C * 4),
    )(x, w, b)


# --------------------------------------------------------------------------
# Kernel 2: fused stand-in backbone, row-tiled "parallel" grid
#   feat = patches @ patch_w + patch_b + pos        (f32 resident)
#   4x:   feat = feat + tanh(feat @ blk_w[i] + blk_b[i]);  store bf16(feat)
# --------------------------------------------------------------------------
def _backbone_kernel(px_ref, pw_ref, pb_ref, pos_ref, w_ref, b_ref, o_ref):
    feat = (jnp.dot(px_ref[...], pw_ref[...],
                    preferred_element_type=jnp.float32)
            + pb_ref[...] + pos_ref[...])                   # f32 residual chain
    for i in range(o_ref.shape[0]):                         # NB blocks, unrolled
        h = (jnp.dot(feat.astype(w_ref.dtype), w_ref[i],
                     preferred_element_type=jnp.float32) + b_ref[i])
        feat = feat + jnp.tanh(h)                           # EUP tanh in-kernel
        o_ref[i] = feat.astype(o_ref.dtype)                 # bf16 writeback


def backbone_fused(patches, patch_w, patch_b, pos, blk_w, blk_b, *, tm=64):
    """patches: (R, K) bf16, patch_w: (K, D) bf16, patch_b/pos: f32,
       blk_w: (NB, D, D) bf16, blk_b: (NB, 1, D) f32 -> (NB, R, D) bf16."""
    R, K = patches.shape
    D = patch_w.shape[1]
    NB = blk_w.shape[0]
    tm = min(tm, R)
    flops = 2 * R * K * D + 2 * NB * R * D * D
    bytes_accessed = (patches.size * 2 + patch_w.size * 2 + patch_b.size * 4
                      + pos.size * 4 + blk_w.size * 2 + blk_b.size * 4
                      + NB * R * D * 2)
    return pl.pallas_call(
        _backbone_kernel,
        out_shape=jax.ShapeDtypeStruct((NB, R, D), jnp.bfloat16),
        grid=(pl.cdiv(R, tm),),
        in_specs=[pl.BlockSpec((tm, K), lambda i: (i, 0)),
                  pl.BlockSpec((K, D), lambda i: (0, 0)),
                  pl.BlockSpec((1, D), lambda i: (0, 0)),
                  pl.BlockSpec((tm, D), lambda i: (i, 0)),
                  pl.BlockSpec((NB, D, D), lambda i: (0, 0, 0)),
                  pl.BlockSpec((NB, 1, D), lambda i: (0, 0, 0))],
        out_specs=pl.BlockSpec((NB, tm, D), lambda i: (0, i, 0)),
        compiler_params=pltpu.CompilerParams(
            dimension_semantics=("parallel",)),
        cost_estimate=pl.CostEstimate(flops=flops, transcendentals=NB * R * D,
                                      bytes_accessed=bytes_accessed),
    )(patches, patch_w, patch_b, pos, blk_w, blk_b)


# --------------------------------------------------------------------------
# Kernel 3: 3x3 / stride-2 / pad-1 conv  +  MaxPool2d(2), via mod-4 phase
# decomposition.  For pool group (dp,dq) and tap (kh,kw) the needed input is a
# *contiguous* shifted slice of one flattened phase image.
#   * (kh,kw) outer / (dp,dq) inner: each tap weight pushed to the MXU once
#     and reused for the 4 pool-group matmuls.
#   * the 25 distinct shifted slices are materialized exactly once (dedup).
# --------------------------------------------------------------------------
def _conv3x3s2_maxpool2_kernel(xph_ref, w_ref, b_ref, o_ref, *, wp1):
    R = o_ref.shape[0]                      # halo rows: B*(Hp+1)*(Wp+1)
    # Dedup: only 25 distinct (mh, mw) slices among the 36 (group x tap) uses;
    # each unaligned (non-multiple-of-8 start) slice materializes once.
    sl = {}
    for mh in range(5):
        for mw in range(5):
            s = (mh // 4) * wp1 + (mw // 4)              # static shift
            sl[(mh, mw)] = xph_ref[mh % 4, mw % 4, s:s + R, :]
    groups = [(0, 0), (0, 1), (1, 0), (1, 1)]
    accs = [None] * 4                                     # one f32 acc / group
    for kh in range(3):
        for kw in range(3):
            w_tap = w_ref[kh, kw]                         # staged to MXU once
            for g, (dp, dq) in enumerate(groups):
                yk = jnp.dot(sl[(2 * dp + kh, 2 * dq + kw)], w_tap,
                             preferred_element_type=jnp.float32)
                accs[g] = yk if accs[g] is None else accs[g] + yk
    out = jnp.maximum(jnp.maximum(accs[0], accs[1]),
                      jnp.maximum(accs[2], accs[3]))
    o_ref[...] = out + b_ref[...]          # per-channel bias commutes with max


def conv3x3_s2_maxpool2(xph, w, b, *, batch, hp, wp):
    """xph: (4, 4, Rpad, Cin) bf16 phase images, w: (3, 3, Cin, C) bf16,
       b: (1, C) f32 -> (R, C) f32 with R = batch*(hp+1)*(wp+1) halo rows.

       IMPORTANT: rows with i == hp or j == wp are halo rows that absorb
       cross-row / cross-batch contamination of the shifted flat slices; the
       caller MUST crop to [:, :hp, :wp, :] before any use (dpt_head does)."""
    R = batch * (hp + 1) * (wp + 1)
    Cin = xph.shape[-1]
    C = w.shape[-1]
    kernel = functools.partial(_conv3x3s2_maxpool2_kernel, wp1=wp + 1)
    # TODO(synk): at production feature-map sizes this call would get a
    # row-tiled grid + vmem_limit_bytes and the phase decomposition would be
    # folded into the index_map; at these sizes whole-array VMEM is fastest.
    return pl.pallas_call(
        kernel,
        out_shape=jax.ShapeDtypeStruct((R, C), jnp.float32),
        in_specs=[VMEM_SPEC, VMEM_SPEC, VMEM_SPEC],
        out_specs=VMEM_SPEC,
        cost_estimate=pl.CostEstimate(
            flops=2 * 4 * 9 * R * Cin * C, transcendentals=0,
            bytes_accessed=xph.size * 2 + w.size * 2 + b.size * 4 + R * C * 4),
    )(xph, w, b)


# --------------------------------------------------------------------------
# JAX glue: mod-4 phase decomposition of the conv input (1x HBM traffic)
#   xph[r, c, b*S + i*(Wp+1) + j, :] = x_padded[b, 4*i + r, 4*j + c, :]
# --------------------------------------------------------------------------
def phase_decompose_3x3s2_pool2(x_nhwc):
    B, H, W, D = x_nhwc.shape
    Ho, Wo = (H + 1) // 2, (W + 1) // 2          # conv out (k=3, p=1, s=2)
    Hp, Wp = Ho // 2, Wo // 2                    # MaxPool2d(2) out (floor)
    Ht, Wt = 4 * (Hp + 1), 4 * (Wp + 1)          # >= H+2 / W+2 always
    xp = jnp.pad(x_nhwc, ((0, 0), (1, Ht - H - 1), (1, Wt - W - 1), (0, 0)))
    x6 = xp.reshape(B, Hp + 1, 4, Wp + 1, 4, D)
    xph = x6.transpose(2, 4, 0, 1, 3, 5).reshape(4, 4, B * (Hp + 1) * (Wp + 1), D)
    xph = jnp.pad(xph, ((0, 0), (0, 0), (0, Wp + 2), (0, 0)))   # room for max shift
    return xph, (Hp, Wp)


# --------------------------------------------------------------------------
# Parameters (deterministic synthetic init — shapes follow the module)
# --------------------------------------------------------------------------
def init_params(key, embed_dim, out_ch, patch_size=14, in_ch=3,
                num_patches=64, num_blocks=4):
    ks = jax.random.split(key, 20)
    s = 0.02
    K = patch_size * patch_size * in_ch
    K_pad = _round_up(K, 128)                    # 588 -> 640: clean MXU passes
    p = {}
    pw = s * jax.random.normal(ks[0], (K, embed_dim), jnp.float32)
    p["patch_w"] = jnp.pad(pw, ((0, K_pad - K), (0, 0)))
    p["patch_b"] = s * jax.random.normal(ks[1], (1, embed_dim), jnp.float32)
    p["pos"] = s * jax.random.normal(ks[2], (1, num_patches, embed_dim), jnp.float32)
    p["blk_w"] = [s * jax.random.normal(ks[3 + i], (embed_dim, embed_dim), jnp.float32)
                  for i in range(num_blocks)]
    p["blk_b"] = [s * jax.random.normal(ks[7 + i], (1, embed_dim), jnp.float32)
                  for i in range(num_blocks)]
    # DPT head (the module's own parameters): conv1 1x1, conv2/3/4 3x3 s2 p1
    p["conv1_w"] = s * jax.random.normal(ks[11], (embed_dim, out_ch), jnp.float32)
    p["conv1_b"] = s * jax.random.normal(ks[12], (1, out_ch), jnp.float32)
    p["conv_w"] = [s * jax.random.normal(ks[13 + i], (3, 3, embed_dim, out_ch), jnp.float32)
                   for i in range(3)]
    p["conv_b"] = [s * jax.random.normal(ks[16 + i], (1, out_ch), jnp.float32)
                   for i in range(3)]
    return p


# --------------------------------------------------------------------------
# Stand-in for self.pretrained.get_intermediate_layers(x, n=4)
# --------------------------------------------------------------------------
def backbone_features(x_nchw, p, patch_size=14):
    # TODO(synk): the real pretrained DINOv2 ViT (torch.hub load) has no
    # in-script equivalent; this deterministic stand-in (patch-embed + pos +
    # 4 residual tanh blocks, all fused into one Pallas kernel) produces the
    # 4 intermediate features of shape (B, N, D) the head consumes.
    B, Cimg, Himg, Wimg = x_nchw.shape
    gh, gw = Himg // patch_size, Wimg // patch_size
    N = gh * gw
    D = p["patch_w"].shape[1]
    K_pad = p["patch_w"].shape[0]
    x = jnp.transpose(x_nchw, (0, 2, 3, 1))                       # NHWC
    xp = x.reshape(B, gh, patch_size, gw, patch_size, Cimg)
    xp = xp.transpose(0, 1, 3, 2, 4, 5).reshape(B * N, patch_size * patch_size * Cimg)
    xp = jnp.pad(xp, ((0, 0), (0, K_pad - xp.shape[1])))          # K -> K_pad
    pos = jnp.broadcast_to(p["pos"], (B, N, D)).reshape(B * N, D)
    blk_w = jnp.stack(p["blk_w"]).astype(jnp.bfloat16)            # (NB, D, D)
    blk_b = jnp.stack(p["blk_b"])                                 # (NB, 1, D)
    feats = backbone_fused(xp.astype(jnp.bfloat16),
                           p["patch_w"].astype(jnp.bfloat16),
                           p["patch_b"], pos, blk_w, blk_b)       # (NB, B*N, D) bf16
    return [feats[i].reshape(B, N, D) for i in range(feats.shape[0])]


# --------------------------------------------------------------------------
# DPT head: conv1 (1x1) + Identity, conv2/3/4 (3x3, s2, p1) + MaxPool2d(2)
# --------------------------------------------------------------------------
def dpt_head(features, p):
    outputs = []
    for i, feature in enumerate(features):
        B, N, D = feature.shape
        ph = pw = int(math.sqrt(N))
        if i == 0:
            y = matmul_bias(feature.reshape(B * N, D).astype(jnp.bfloat16),
                            p["conv1_w"].astype(jnp.bfloat16), p["conv1_b"])
            y = y.reshape(B, ph, pw, -1)
        else:
            x = feature.reshape(B, ph, pw, D).astype(jnp.bfloat16)
            xph, (Hp, Wp) = phase_decompose_3x3s2_pool2(x)
            y = conv3x3_s2_maxpool2(xph, p["conv_w"][i - 1].astype(jnp.bfloat16),
                                    p["conv_b"][i - 1], batch=B, hp=Hp, wp=Wp)
            # mandatory halo crop (see conv3x3_s2_maxpool2 docstring)
            y = y.reshape(B, Hp + 1, Wp + 1, -1)[:, :Hp, :Wp, :]
        outputs.append(jnp.transpose(y, (0, 3, 1, 2)))            # back to NCHW
    return outputs


def forward(x_nchw, p, patch_size=14):
    return dpt_head(backbone_features(x_nchw, p, patch_size), p)


# --------------------------------------------------------------------------
# Pure-JAX reference (same math & same bf16-in / f32-accumulate precision)
# --------------------------------------------------------------------------
def reference_forward(x_nchw, p, patch_size=14):
    B, Cimg, Himg, Wimg = x_nchw.shape
    x = jnp.transpose(x_nchw, (0, 2, 3, 1))
    gh, gw = Himg // patch_size, Wimg // patch_size
    K_pad = p["patch_w"].shape[0]
    xp = x.reshape(B, gh, patch_size, gw, patch_size, Cimg)
    xp = xp.transpose(0, 1, 3, 2, 4, 5).reshape(B, gh * gw, -1)
    xp = jnp.pad(xp, ((0, 0), (0, 0), (0, K_pad - xp.shape[2])))
    feat = (jnp.dot(xp.astype(jnp.bfloat16), p["patch_w"].astype(jnp.bfloat16),
                    preferred_element_type=jnp.float32)
            + p["patch_b"] + p["pos"])
    feats = []
    for wb, bb in zip(p["blk_w"], p["blk_b"]):
        h = jnp.dot(feat.astype(jnp.bfloat16), wb.astype(jnp.bfloat16),
                    preferred_element_type=jnp.float32) + bb
        feat = feat + jnp.tanh(h)
        feats.append(feat)
    outs = []
    for i, feature in enumerate(feats):
        ph = pw = int(math.sqrt(feature.shape[1]))
        D = feature.shape[-1]
        if i == 0:
            y = jnp.dot(feature.reshape(B * ph * pw, D).astype(jnp.bfloat16),
                        p["conv1_w"].astype(jnp.bfloat16),
                        preferred_element_type=jnp.float32) + p["conv1_b"]
            y = y.reshape(B, ph, pw, -1)
        else:
            xh = feature.reshape(B, ph, pw, D).astype(jnp.bfloat16)
            y = lax.conv_general_dilated(
                xh, p["conv_w"][i - 1].astype(jnp.bfloat16),
                window_strides=(2, 2), padding=[(1, 1), (1, 1)],
                dimension_numbers=("NHWC", "HWIO", "NHWC"),
                preferred_element_type=jnp.float32) + p["conv_b"][i - 1]
            Ho, Wo = y.shape[1], y.shape[2]
            y = y[:, :Ho // 2 * 2, :Wo // 2 * 2]
            y = y.reshape(B, Ho // 2, 2, Wo // 2, 2, -1).max(axis=(2, 4))
        outs.append(jnp.transpose(y, (0, 3, 1, 2)))
    return outs


if __name__ == "__main__":
    key = jax.random.PRNGKey(0)
    k_x, k_p = jax.random.split(key)

    # small shapes: 112x112 image, 14x14 patches -> 8x8 = 64 tokens,
    # embed_dim=128 (lane-dense stand-in), head output channels = 256
    B, Cimg, Himg, Wimg = 2, 3, 112, 112
    embed_dim, out_ch = 128, 256

    x = jax.random.normal(k_x, (B, Cimg, Himg, Wimg), jnp.float32)
    params = init_params(k_p, embed_dim=embed_dim, out_ch=out_ch)

    outs = jax.jit(forward)(x, params)
    outs = [jax.block_until_ready(o) for o in outs]

    refs = jax.jit(reference_forward)(x, params)
    refs = [jax.block_until_ready(r) for r in refs]

    expected = [(B, out_ch, 8, 8), (B, out_ch, 2, 2),
                (B, out_ch, 2, 2), (B, out_ch, 2, 2)]
    for o, r, es in zip(outs, refs, expected):
        assert o.shape == es, (o.shape, es)
        np.testing.assert_allclose(np.asarray(o), np.asarray(r),
                                   rtol=2e-3, atol=2e-3)
    print("KERNEL_OK")
</pallas_src>

<mosaic_0001>
module attributes {stable_mosaic.version = 11 : i64} {
  func.func @_backbone_kernel(%arg0: i32, %arg1: memref<64x640xbf16, #tpu.memory_space<vmem>>, %arg2: memref<640x128xbf16, #tpu.memory_space<vmem>>, %arg3: memref<1x128xf32, #tpu.memory_space<vmem>>, %arg4: memref<64x128xf32, #tpu.memory_space<vmem>>, %arg5: memref<4x128x128xbf16, #tpu.memory_space<vmem>>, %arg6: memref<4x1x128xf32, #tpu.memory_space<vmem>>, %arg7: memref<4x64x128xbf16, #tpu.memory_space<vmem>>) attributes {dimension_semantics = [#tpu.dimension_semantics<parallel>], iteration_bounds = array<i64: 2>, scalar_prefetch = 0 : i64, scratch_operands = 0 : i64, tpu.core_type = #tpu.core_type<tc>, window_params = [{transform_indices = @transform_0, window_bounds = array<i64: 64, 640>}, {pipeline_mode = #tpu.pipeline_mode<synchronous>, transform_indices = @transform_1, window_bounds = array<i64: 640, 128>}, {pipeline_mode = #tpu.pipeline_mode<synchronous>, transform_indices = @transform_2, window_bounds = array<i64: 1, 128>}, {transform_indices = @transform_3, window_bounds = array<i64: 64, 128>}, {pipeline_mode = #tpu.pipeline_mode<synchronous>, transform_indices = @transform_4, window_bounds = array<i64: 4, 128, 128>}, {pipeline_mode = #tpu.pipeline_mode<synchronous>, transform_indices = @transform_5, window_bounds = array<i64: 4, 1, 128>}, {transform_indices = @transform_6, window_bounds = array<i64: 4, 64, 128>}]} {
    %c0 = arith.constant 0 : index
    %c0_0 = arith.constant 0 : index
    %0 = vector.load %arg1[%c0, %c0_0] : memref<64x640xbf16, #tpu.memory_space<vmem>>, vector<64x640xbf16>
    %c0_1 = arith.constant 0 : index
    %c0_2 = arith.constant 0 : index
    %1 = vector.load %arg2[%c0_1, %c0_2] : memref<640x128xbf16, #tpu.memory_space<vmem>>, vector<640x128xbf16>
    %cst = arith.constant dense<0.000000e+00> : vector<64x128xf32>
    %2 = tpu.matmul %0, %1, %cst {dimension_numbers = #tpu.dot_dimension_numbers<[1], [0], [0], [1], [0, 0, 1, 1], [], []>} : vector<64x640xbf16>, vector<640x128xbf16>, vector<64x128xf32> -> vector<64x128xf32>
    %c0_3 = arith.constant 0 : index
    %c0_4 = arith.constant 0 : index
    %3 = vector.load %arg3[%c0_3, %c0_4] : memref<1x128xf32, #tpu.memory_space<vmem>>, vector<1x128xf32>
    %4 = vector.broadcast %3 : vector<1x128xf32> to vector<64x128xf32>
    %5 = arith.addf %2, %4 : vector<64x128xf32>
    %c0_5 = arith.constant 0 : index
    %c0_6 = arith.constant 0 : index
    %6 = vector.load %arg4[%c0_5, %c0_6] : memref<64x128xf32, #tpu.memory_space<vmem>>, vector<64x128xf32>
    %7 = arith.addf %5, %6 : vector<64x128xf32>
    %8 = arith.truncf %7 : vector<64x128xf32> to vector<64x128xbf16>
    %c0_7 = arith.constant 0 : index
    %c0_8 = arith.constant 0 : index
    %c0_9 = arith.constant 0 : index
    %9 = vector.load %arg5[%c0_7, %c0_8, %c0_9] : memref<4x128x128xbf16, #tpu.memory_space<vmem>>, vector<1x128x128xbf16>
    %10 = vector.shape_cast %9 : vector<1x128x128xbf16> to vector<128x128xbf16>
    %cst_10 = arith.constant dense<0.000000e+00> : vector<64x128xf32>
    %11 = tpu.matmul %8, %10, %cst_10 {dimension_numbers = #tpu.dot_dimension_numbers<[1], [0], [0], [1], [0, 0, 1, 1], [], []>} : vector<64x128xbf16>, vector<128x128xbf16>, vector<64x128xf32> -> vector<64x128xf32>
    %c0_11 = arith.constant 0 : index
    %c0_12 = arith.constant 0 : index
    %c0_13 = arith.constant 0 : index
    %12 = vector.load %arg6[%c0_11, %c0_12, %c0_13] : memref<4x1x128xf32, #tpu.memory_space<vmem>>, vector<1x1x128xf32>
    %13 = vector.shape_cast %12 : vector<1x1x128xf32> to vector<1x128xf32>
    %14 = vector.broadcast %13 : vector<1x128xf32> to vector<64x128xf32>
    %15 = arith.addf %11, %14 : vector<64x128xf32>
    %16 = math.tanh %15 : vector<64x128xf32>
    %17 = arith.addf %7, %16 : vector<64x128xf32>
    %18 = arith.truncf %17 : vector<64x128xf32> to vector<64x128xbf16>
    %c0_14 = arith.constant 0 : index
    %c0_15 = arith.constant 0 : index
    %c0_16 = arith.constant 0 : index
    %19 = vector.load %arg7[%c0_14, %c0_15, %c0_16] : memref<4x64x128xbf16, #tpu.memory_space<vmem>>, vector<1x64x128xbf16>
    %20 = vector.shape_cast %19 : vector<1x64x128xbf16> to vector<64x128xbf16>
    %21 = vector.shape_cast %18 : vector<64x128xbf16> to vector<1x64x128xbf16>
    tpu.vector_store %arg7[%c0_14, %c0_15, %c0_16], %21 {strides = array<i32>} : memref<4x64x128xbf16, #tpu.memory_space<vmem>>, vector<1x64x128xbf16>,
    %22 = arith.truncf %17 : vector<64x128xf32> to vector<64x128xbf16>
    %c1 = arith.constant 1 : index
    %c0_17 = arith.constant 0 : index
    %c0_18 = arith.constant 0 : index
    %23 = vector.load %arg5[%c1, %c0_17, %c0_18] : memref<4x128x128xbf16, #tpu.memory_space<vmem>>, vector<1x128x128xbf16>
    %24 = vector.shape_cast %23 : vector<1x128x128xbf16> to vector<128x128xbf16>
    %cst_19 = arith.constant dense<0.000000e+00> : vector<64x128xf32>
    %25 = tpu.matmul %22, %24, %cst_19 {dimension_numbers = #tpu.dot_dimension_numbers<[1], [0], [0], [1], [0, 0, 1, 1], [], []>} : vector<64x128xbf16>, vector<128x128xbf16>, vector<64x128xf32> -> vector<64x128xf32>
    %c1_20 = arith.constant 1 : index
    %c0_21 = arith.constant 0 : index
    %c0_22 = arith.constant 0 : index
    %26 = vector.load %arg6[%c1_20, %c0_21, %c0_22] : memref<4x1x128xf32, #tpu.memory_space<vmem>>, vector<1x1x128xf32>
    %27 = vector.shape_cast %26 : vector<1x1x128xf32> to vector<1x128xf32>
    %28 = vector.broadcast %27 : vector<1x128xf32> to vector<64x128xf32>
    %29 = arith.addf %25, %28 : vector<64x128xf32>
    %30 = math.tanh %29 : vector<64x128xf32>
    %31 = arith.addf %17, %30 : vector<64x128xf32>
    %32 = arith.truncf %31 : vector<64x128xf32> to vector<64x128xbf16>
    %c1_23 = arith.constant 1 : index
    %c0_24 = arith.constant 0 : index
    %c0_25 = arith.constant 0 : index
    %33 = vector.load %arg7[%c1_23, %c0_24, %c0_25] : memref<4x64x128xbf16, #tpu.memory_space<vmem>>, vector<1x64x128xbf16>
    %34 = vector.shape_cast %33 : vector<1x64x128xbf16> to vector<64x128xbf16>
    %35 = vector.shape_cast %32 : vector<64x128xbf16> to vector<1x64x128xbf16>
    tpu.vector_store %arg7[%c1_23, %c0_24, %c0_25], %35 {strides = array<i32>} : memref<4x64x128xbf16, #tpu.memory_space<vmem>>, vector<1x64x128xbf16>,
    %36 = arith.truncf %31 : vector<64x128xf32> to vector<64x128xbf16>
    %c2 = arith.constant 2 : index
    %c0_26 = arith.constant 0 : index
    %c0_27 = arith.constant 0 : index
    %37 = vector.load %arg5[%c2, %c0_26, %c0_27] : memref<4x128x128xbf16, #tpu.memory_space<vmem>>, vector<1x128x128xbf16>
    %38 = vector.shape_cast %37 : vector<1x128x128xbf16> to vector<128x128xbf16>
    %cst_28 = arith.constant dense<0.000000e+00> : vector<64x128xf32>
    %39 = tpu.matmul %36, %38, %cst_28 {dimension_numbers = #tpu.dot_dimension_numbers<[1], [0], [0], [1], [0, 0, 1, 1], [], []>} : vector<64x128xbf16>, vector<128x128xbf16>, vector<64x128xf32> -> vector<64x128xf32>
    %c2_29 = arith.constant 2 : index
    %c0_30 = arith.constant 0 : index
    %c0_31 = arith.constant 0 : index
    %40 = vector.load %arg6[%c2_29, %c0_30, %c0_31] : memref<4x1x128xf32, #tpu.memory_space<vmem>>, vector<1x1x128xf32>
    %41 = vector.shape_cast %40 : vector<1x1x128xf32> to vector<1x128xf32>
    %42 = vector.broadcast %41 : vector<1x128xf32> to vector<64x128xf32>
    %43 = arith.addf %39, %42 : vector<64x128xf32>
    %44 = math.tanh %43 : vector<64x128xf32>
    %45 = arith.addf %31, %44 : vector<64x128xf32>
    %46 = arith.truncf %45 : vector<64x128xf32> to vector<64x128xbf16>
    %c2_32 = arith.constant 2 : index
    %c0_33 = arith.constant 0 : index
    %c0_34 = arith.constant 0 : index
    %47 = vector.load %arg7[%c2_32, %c0_33, %c0_34] : memref<4x64x128xbf16, #tpu.memory_space<vmem>>, vector<1x64x128xbf16>
    %48 = vector.shape_cast %47 : vector<1x64x128xbf16> to vector<64x128xbf16>
    %49 = vector.shape_cast %46 : vector<64x128xbf16> to vector<1x64x128xbf16>
    tpu.vector_store %arg7[%c2_32, %c0_33, %c0_34], %49 {strides = array<i32>} : memref<4x64x128xbf16, #tpu.memory_space<vmem>>, vector<1x64x128xbf16>,
    %50 = arith.truncf %45 : vector<64x128xf32> to vector<64x128xbf16>
    %c3 = arith.constant 3 : index
    %c0_35 = arith.constant 0 : index
    %c0_36 = arith.constant 0 : index
    %51 = vector.load %arg5[%c3, %c0_35, %c0_36] : memref<4x128x128xbf16, #tpu.memory_space<vmem>>, vector<1x128x128xbf16>
    %52 = vector.shape_cast %51 : vector<1x128x128xbf16> to vector<128x128xbf16>
    %cst_37 = arith.constant dense<0.000000e+00> : vector<64x128xf32>
    %53 = tpu.matmul %50, %52, %cst_37 {dimension_numbers = #tpu.dot_dimension_numbers<[1], [0], [0], [1], [0, 0, 1, 1], [], []>} : vector<64x128xbf16>, vector<128x128xbf16>, vector<64x128xf32> -> vector<64x128xf32>
    %c3_38 = arith.constant 3 : index
    %c0_39 = arith.constant 0 : index
    %c0_40 = arith.constant 0 : index
    %54 = vector.load %arg6[%c3_38, %c0_39, %c0_40] : memref<4x1x128xf32, #tpu.memory_space<vmem>>, vector<1x1x128xf32>
    %55 = vector.shape_cast %54 : vector<1x1x128xf32> to vector<1x128xf32>
    %56 = vector.broadcast %55 : vector<1x128xf32> to vector<64x128xf32>
    %57 = arith.addf %53, %56 : vector<64x128xf32>
    %58 = math.tanh %57 : vector<64x128xf32>
    %59 = arith.addf %45, %58 : vector<64x128xf32>
    %60 = arith.truncf %59 : vector<64x128xf32> to vector<64x128xbf16>
    %c3_41 = arith.constant 3 : index
    %c0_42 = arith.constant 0 : index
    %c0_43 = arith.constant 0 : index
    %61 = vector.load %arg7[%c3_41, %c0_42, %c0_43] : memref<4x64x128xbf16, #tpu.memory_space<vmem>>, vector<1x64x128xbf16>
    %62 = vector.shape_cast %61 : vector<1x64x128xbf16> to vector<64x128xbf16>
    %63 = vector.shape_cast %60 : vector<64x128xbf16> to vector<1x64x128xbf16>
    tpu.vector_store %arg7[%c3_41, %c0_42, %c0_43], %63 {strides = array<i32>} : memref<4x64x128xbf16, #tpu.memory_space<vmem>>, vector<1x64x128xbf16>,
    return
  }
  func.func @transform_0(%arg0: i32) -> (i32, i32) {
    %c0_i32 = arith.constant 0 : i32
    %c0_i32_0 = arith.constant 0 : i32
    return %arg0, %c0_i32 : i32, i32
  }
  func.func @transform_1(%arg0: i32) -> (i32, i32) {
    %c0_i32 = arith.constant 0 : i32
    %c0_i32_0 = arith.constant 0 : i32
    %c0_i32_1 = arith.constant 0 : i32
    return %c0_i32, %c0_i32_0 : i32, i32
  }
  func.func @transform_2(%arg0: i32) -> (i32, i32) {
    %c0_i32 = arith.constant 0 : i32
    %c0_i32_0 = arith.constant 0 : i32
    %c0_i32_1 = arith.constant 0 : i32
    return %c0_i32, %c0_i32_0 : i32, i32
  }
  func.func @transform_3(%arg0: i32) -> (i32, i32) {
    %c0_i32 = arith.constant 0 : i32
    %c0_i32_0 = arith.constant 0 : i32
    return %arg0, %c0_i32 : i32, i32
  }
  func.func @transform_4(%arg0: i32) -> (i32, i32, i32) {
    %c0_i32 = arith.constant 0 : i32
    %c0_i32_0 = arith.constant 0 : i32
    %c0_i32_1 = arith.constant 0 : i32
    %c0_i32_2 = arith.constant 0 : i32
    return %c0_i32, %c0_i32_0, %c0_i32_1 : i32, i32, i32
  }
  func.func @transform_5(%arg0: i32) -> (i32, i32, i32) {
    %c0_i32 = arith.constant 0 : i32
    %c0_i32_0 = arith.constant 0 : i32
    %c0_i32_1 = arith.constant 0 : i32
    %c0_i32_2 = arith.constant 0 : i32
    return %c0_i32, %c0_i32_0, %c0_i32_1 : i32, i32, i32
  }
  func.func @transform_6(%arg0: i32) -> (i32, i32, i32) {
    %c0_i32 = arith.constant 0 : i32
    %c0_i32_0 = arith.constant 0 : i32
    %c0_i32_1 = arith.constant 0 : i32
    return %c0_i32, %arg0, %c0_i32_0 : i32, i32, i32
  }
}

module attributes {stable_mosaic.version = 11 : i64} {
  func.func @_matmul_bias_kernel(%arg0: i32, %arg1: memref<64x128xbf16, #tpu.memory_space<vmem>>, %arg2: memref<128x256xbf16, #tpu.memory_space<vmem>>, %arg3: memref<1x256xf32, #tpu.memory_space<vmem>>, %arg4: memref<64x256xf32, #tpu.memory_space<vmem>>) attributes {dimension_semantics = [#tpu.dimension_semantics<parallel>], iteration_bounds = array<i64: 2>, scalar_prefetch = 0 : i64, scratch_operands = 0 : i64, tpu.core_type = #tpu.core_type<tc>, window_params = [{transform_indices = @transform_0, window_bounds = array<i64: 64, 128>}, {pipeline_mode = #tpu.pipeline_mode<synchronous>, transform_indices = @transform_1, window_bounds = array<i64: 128, 256>}, {pipeline_mode = #tpu.pipeline_mode<synchronous>, transform_indices = @transform_2, window_bounds = array<i64: 1, 256>}, {transform_indices = @transform_3, window_bounds = array<i64: 64, 256>}]} {
    %c0 = arith.constant 0 : index
    %c0_0 = arith.constant 0 : index
    %0 = vector.load %arg1[%c0, %c0_0] : memref<64x128xbf16, #tpu.memory_space<vmem>>, vector<64x128xbf16>
    %c0_1 = arith.constant 0 : index
    %c0_2 = arith.constant 0 : index
    %1 = vector.load %arg2[%c0_1, %c0_2] : memref<128x256xbf16, #tpu.memory_space<vmem>>, vector<128x256xbf16>
    %cst = arith.constant dense<0.000000e+00> : vector<64x256xf32>
    %2 = tpu.matmul %0, %1, %cst {dimension_numbers = #tpu.dot_dimension_numbers<[1], [0], [0], [1], [0, 0, 1, 1], [], []>} : vector<64x128xbf16>, vector<128x256xbf16>, vector<64x256xf32> -> vector<64x256xf32>
    %c0_3 = arith.constant 0 : index
    %c0_4 = arith.constant 0 : index
    %3 = vector.load %arg3[%c0_3, %c0_4] : memref<1x256xf32, #tpu.memory_space<vmem>>, vector<1x256xf32>
    %4 = vector.broadcast %3 : vector<1x256xf32> to vector<64x256xf32>
    %5 = arith.addf %2, %4 : vector<64x256xf32>
    %c0_5 = arith.constant 0 : index
    %c0_6 = arith.constant 0 : index
    %6 = vector.load %arg4[%c0_5, %c0_6] : memref<64x256xf32, #tpu.memory_space<vmem>>, vector<64x256xf32>
    tpu.vector_store %arg4[%c0_5, %c0_6], %5 {strides = array<i32>} : memref<64x256xf32, #tpu.memory_space<vmem>>, vector<64x256xf32>,
    return
  }
  func.func @transform_0(%arg0: i32) -> (i32, i32) {
    %c0_i32 = arith.constant 0 : i32
    %c0_i32_0 = arith.constant 0 : i32
    return %arg0, %c0_i32 : i32, i32
  }
  func.func @transform_1(%arg0: i32) -> (i32, i32) {
    %c0_i32 = arith.constant 0 : i32
    %c0_i32_0 = arith.constant 0 : i32
    %c0_i32_1 = arith.constant 0 : i32
    return %c0_i32, %c0_i32_0 : i32, i32
  }
  func.func @transform_2(%arg0: i32) -> (i32, i32) {
    %c0_i32 = arith.constant 0 : i32
    %c0_i32_0 = arith.constant 0 : i32
    %c0_i32_1 = arith.constant 0 : i32
    return %c0_i32, %c0_i32_0 : i32, i32
  }
  func.func @transform_3(%arg0: i32) -> (i32, i32) {
    %c0_i32 = arith.constant 0 : i32
    %c0_i32_0 = arith.constant 0 : i32
    return %arg0, %c0_i32 : i32, i32
  }
}

module attributes {stable_mosaic.version = 11 : i64} {
  func.func @_conv3x3s2_maxpool2_kernel(%arg0: memref<4x4x22x128xbf16, #tpu.memory_space<vmem>>, %arg1: memref<3x3x128x256xbf16, #tpu.memory_space<vmem>>, %arg2: memref<1x256xf32, #tpu.memory_space<vmem>>, %arg3: memref<18x256xf32, #tpu.memory_space<vmem>>) attributes {dimension_semantics = [], scalar_prefetch = 0 : i64, scratch_operands = 0 : i64, tpu.core_type = #tpu.core_type<tc>} {
    %c0 = arith.constant 0 : index
    %c0_0 = arith.constant 0 : index
    %c0_1 = arith.constant 0 : index
    %c0_2 = arith.constant 0 : index
    %0 = vector.load %arg0[%c0, %c0_0, %c0_1, %c0_2] : memref<4x4x22x128xbf16, #tpu.memory_space<vmem>>, vector<1x1x18x128xbf16>
    %1 = vector.shape_cast %0 : vector<1x1x18x128xbf16> to vector<18x128xbf16>
    %c0_3 = arith.constant 0 : index
    %c1 = arith.constant 1 : index
    %c0_4 = arith.constant 0 : index
    %c0_5 = arith.constant 0 : index
    %2 = vector.load %arg0[%c0_3, %c1, %c0_4, %c0_5] : memref<4x4x22x128xbf16, #tpu.memory_space<vmem>>, vector<1x1x18x128xbf16>
    %3 = vector.shape_cast %2 : vector<1x1x18x128xbf16> to vector<18x128xbf16>
    %c0_6 = arith.constant 0 : index
    %c2 = arith.constant 2 : index
    %c0_7 = arith.constant 0 : index
    %c0_8 = arith.constant 0 : index
    %4 = vector.load %arg0[%c0_6, %c2, %c0_7, %c0_8] : memref<4x4x22x128xbf16, #tpu.memory_space<vmem>>, vector<1x1x18x128xbf16>
    %5 = vector.shape_cast %4 : vector<1x1x18x128xbf16> to vector<18x128xbf16>
    %c0_9 = arith.constant 0 : index
    %c3 = arith.constant 3 : index
    %c0_10 = arith.constant 0 : index
    %c0_11 = arith.constant 0 : index
    %6 = vector.load %arg0[%c0_9, %c3, %c0_10, %c0_11] : memref<4x4x22x128xbf16, #tpu.memory_space<vmem>>, vector<1x1x18x128xbf16>
    %7 = vector.shape_cast %6 : vector<1x1x18x128xbf16> to vector<18x128xbf16>
    %c0_12 = arith.constant 0 : index
    %c0_13 = arith.constant 0 : index
    %c1_14 = arith.constant 1 : index
    %c0_15 = arith.constant 0 : index
    %8 = vector.load %arg0[%c0_12, %c0_13, %c1_14, %c0_15] : memref<4x4x22x128xbf16, #tpu.memory_space<vmem>>, vector<1x1x18x128xbf16>
    %9 = vector.shape_cast %8 : vector<1x1x18x128xbf16> to vector<18x128xbf16>
    %c1_16 = arith.constant 1 : index
    %c0_17 = arith.constant 0 : index
    %c0_18 = arith.constant 0 : index
    %c0_19 = arith.constant 0 : index
    %10 = vector.load %arg0[%c1_16, %c0_17, %c0_18, %c0_19] : memref<4x4x22x128xbf16, #tpu.memory_space<vmem>>, vector<1x1x18x128xbf16>
    %11 = vector.shape_cast %10 : vector<1x1x18x128xbf16> to vector<18x128xbf16>
    %c1_20 = arith.constant 1 : index
    %c1_21 = arith.constant 1 : index
    %c0_22 = arith.constant 0 : index
    %c0_23 = arith.constant 0 : index
    %12 = vector.load %arg0[%c1_20, %c1_21, %c0_22, %c0_23] : memref<4x4x22x128xbf16, #tpu.memory_space<vmem>>, vector<1x1x18x128xbf16>
    %13 = vector.shape_cast %12 : vector<1x1x18x128xbf16> to vector<18x128xbf16>
    %c1_24 = arith.constant 1 : index
    %c2_25 = arith.constant 2 : index
    %c0_26 = arith.constant 0 : index
    %c0_27 = arith.constant 0 : index
    %14 = vector.load %arg0[%c1_24, %c2_25, %c0_26, %c0_27] : memref<4x4x22x128xbf16, #tpu.memory_space<vmem>>, vector<1x1x18x128xbf16>
    %15 = vector.shape_cast %14 : vector<1x1x18x128xbf16> to vector<18x128xbf16>
    %c1_28 = arith.constant 1 : index
    %c3_29 = arith.constant 3 : index
    %c0_30 = arith.constant 0 : index
    %c0_31 = arith.constant 0 : index
    %16 = vector.load %arg0[%c1_28, %c3_29, %c0_30, %c0_31] : memref<4x4x22x128xbf16, #tpu.memory_space<vmem>>, vector<1x1x18x128xbf16>
    %17 = vector.shape_cast %16 : vector<1x1x18x128xbf16> to vector<18x128xbf16>
    %c1_32 = arith.constant 1 : index
    %c0_33 = arith.constant 0 : index
    %c1_34 = arith.constant 1 : index
    %c0_35 = arith.constant 0 : index
    %18 = vector.load %arg0[%c1_32, %c0_33, %c1_34, %c0_35] : memref<4x4x22x128xbf16, #tpu.memory_space<vmem>>, vector<1x1x18x128xbf16>
    %19 = vector.shape_cast %18 : vector<1x1x18x128xbf16> to vector<18x128xbf16>
    %c2_36 = arith.constant 2 : index
    %c0_37 = arith.constant 0 : index
    %c0_38 = arith.constant 0 : index
    %c0_39 = arith.constant 0 : index
    %20 = vector.load %arg0[%c2_36, %c0_37, %c0_38, %c0_39] : memref<4x4x22x128xbf16, #tpu.memory_space<vmem>>, vector<1x1x18x128xbf16>
    %21 = vector.shape_cast %20 : vector<1x1x18x128xbf16> to vector<18x128xbf16>
    %c2_40 = arith.constant 2 : index
    %c1_41 = arith.constant 1 : index
    %c0_42 = arith.constant 0 : index
    %c0_43 = arith.constant 0 : index
    %22 = vector.load %arg0[%c2_40, %c1_41, %c0_42, %c0_43] : memref<4x4x22x128xbf16, #tpu.memory_space<vmem>>, vector<1x1x18x128xbf16>
    %23 = vector.shape_cast %22 : vector<1x1x18x128xbf16> to vector<18x128xbf16>
    %c2_44 = arith.constant 2 : index
    %c2_45 = arith.constant 2 : index
    %c0_46 = arith.constant 0 : index
    %c0_47 = arith.constant 0 : index
    %24 = vector.load %arg0[%c2_44, %c2_45, %c0_46, %c0_47] : memref<4x4x22x128xbf16, #tpu.memory_space<vmem>>, vector<1x1x18x128xbf16>
    %25 = vector.shape_cast %24 : vector<1x1x18x128xbf16> to vector<18x128xbf16>
    %c2_48 = arith.constant 2 : index
    %c3_49 = arith.constant 3 : index
    %c0_50 = arith.constant 0 : index
    %c0_51 = arith.constant 0 : index
    %26 = vector.load %arg0[%c2_48, %c3_49, %c0_50, %c0_51] : memref<4x4x22x128xbf16, #tpu.memory_space<vmem>>, vector<1x1x18x128xbf16>
    %27 = vector.shape_cast %26 : vector<1x1x18x128xbf16> to vector<18x128xbf16>
    %c2_52 = arith.constant 2 : index
    %c0_53 = arith.constant 0 : index
    %c1_54 = arith.constant 1 : index
    %c0_55 = arith.constant 0 : index
    %28 = vector.load %arg0[%c2_52, %c0_53, %c1_54, %c0_55] : memref<4x4x22x128xbf16, #tpu.memory_space<vmem>>, vector<1x1x18x128xbf16>
    %29 = vector.shape_cast %28 : vector<1x1x18x128xbf16> to vector<18x128xbf16>
    %c3_56 = arith.constant 3 : index
    %c0_57 = arith.constant 0 : index
    %c0_58 = arith.constant 0 : index
    %c0_59 = arith.constant 0 : index
    %30 = vector.load %arg0[%c3_56, %c0_57, %c0_58, %c0_59] : memref<4x4x22x128xbf16, #tpu.memory_space<vmem>>, vector<1x1x18x128xbf16>
    %31 = vector.shape_cast %30 : vector<1x1x18x128xbf16> to vector<18x128xbf16>
    %c3_60 = arith.constant 3 : index
    %c1_61 = arith.constant 1 : index
    %c0_62 = arith.constant 0 : index
    %c0_63 = arith.constant 0 : index
    %32 = vector.load %arg0[%c3_60, %c1_61, %c0_62, %c0_63] : memref<4x4x22x128xbf16, #tpu.memory_space<vmem>>, vector<1x1x18x128xbf16>
    %33 = vector.shape_cast %32 : vector<1x1x18x128xbf16> to vector<18x128xbf16>
    %c3_64 = arith.constant 3 : index
    %c2_65 = arith.constant 2 : index
    %c0_66 = arith.constant 0 : index
    %c0_67 = arith.constant 0 : index
    %34 = vector.load %arg0[%c3_64, %c2_65, %c0_66, %c0_67] : memref<4x4x22x128xbf16, #tpu.memory_space<vmem>>, vector<1x1x18x128xbf16>
    %35 = vector.shape_cast %34 : vector<1x1x18x128xbf16> to vector<18x128xbf16>
    %c3_68 = arith.constant 3 : index
    %c3_69 = arith.constant 3 : index
    %c0_70 = arith.constant 0 : index
    %c0_71 = arith.constant 0 : index
    %36 = vector.load %arg0[%c3_68, %c3_69, %c0_70, %c0_71] : memref<4x4x22x128xbf16, #tpu.memory_space<vmem>>, vector<1x1x18x128xbf16>
    %37 = vector.shape_cast %36 : vector<1x1x18x128xbf16> to vector<18x128xbf16>
    %c3_72 = arith.constant 3 : index
    %c0_73 = arith.constant 0 : index
    %c1_74 = arith.constant 1 : index
    %c0_75 = arith.constant 0 : index
    %38 = vector.load %arg0[%c3_72, %c0_73, %c1_74, %c0_75] : memref<4x4x22x128xbf16, #tpu.memory_space<vmem>>, vector<1x1x18x128xbf16>
    %39 = vector.shape_cast %38 : vector<1x1x18x128xbf16> to vector<18x128xbf16>
    %c0_76 = arith.constant 0 : index
    %c0_77 = arith.constant 0 : index
    %c3_78 = arith.constant 3 : index
    %c0_79 = arith.constant 0 : index
    %40 = vector.load %arg0[%c0_76, %c0_77, %c3_78, %c0_79] : memref<4x4x22x128xbf16, #tpu.memory_space<vmem>>, vector<1x1x18x128xbf16>
    %41 = vector.shape_cast %40 : vector<1x1x18x128xbf16> to vector<18x128xbf16>
    %c0_80 = arith.constant 0 : index
    %c1_81 = arith.constant 1 : index
    %c3_82 = arith.constant 3 : index
    %c0_83 = arith.constant 0 : index
    %42 = vector.load %arg0[%c0_80, %c1_81, %c3_82, %c0_83] : memref<4x4x22x128xbf16, #tpu.memory_space<vmem>>, vector<1x1x18x128xbf16>
    %43 = vector.shape_cast %42 : vector<1x1x18x128xbf16> to vector<18x128xbf16>
    %c0_84 = arith.constant 0 : index
    %c2_85 = arith.constant 2 : index
    %c3_86 = arith.constant 3 : index
    %c0_87 = arith.constant 0 : index
    %44 = vector.load %arg0[%c0_84, %c2_85, %c3_86, %c0_87] : memref<4x4x22x128xbf16, #tpu.memory_space<vmem>>, vector<1x1x18x128xbf16>
    %45 = vector.shape_cast %44 : vector<1x1x18x128xbf16> to vector<18x128xbf16>
    %c0_88 = arith.constant 0 : index
    %c3_89 = arith.constant 3 : index
    %c3_90 = arith.constant 3 : index
    %c0_91 = arith.constant 0 : index
    %46 = vector.load %arg0[%c0_88, %c3_89, %c3_90, %c0_91] : memref<4x4x22x128xbf16, #tpu.memory_space<vmem>>, vector<1x1x18x128xbf16>
    %47 = vector.shape_cast %46 : vector<1x1x18x128xbf16> to vector<18x128xbf16>
    %c0_92 = arith.constant 0 : index
    %c0_93 = arith.constant 0 : index
    %c4 = arith.constant 4 : index
    %c0_94 = arith.constant 0 : index
    %48 = vector.load %arg0[%c0_92, %c0_93, %c4, %c0_94] : memref<4x4x22x128xbf16, #tpu.memory_space<vmem>>, vector<1x1x18x128xbf16>
    %49 = vector.shape_cast %48 : vector<1x1x18x128xbf16> to vector<18x128xbf16>
    %c0_95 = arith.constant 0 : index
    %c0_96 = arith.constant 0 : index
    %c0_97 = arith.constant 0 : index
    %c0_98 = arith.constant 0 : index
    %50 = vector.load %arg1[%c0_95, %c0_96, %c0_97, %c0_98] : memref<3x3x128x256xbf16, #tpu.memory_space<vmem>>, vector<1x1x128x256xbf16>
    %51 = vector.shape_cast %50 : vector<1x1x128x256xbf16> to vector<128x256xbf16>
    %cst = arith.constant dense<0.000000e+00> : vector<18x256xf32>
    %52 = tpu.matmul %1, %51, %cst {dimension_numbers = #tpu.dot_dimension_numbers<[1], [0], [0], [1], [0, 0, 1, 1], [], []>} : vector<18x128xbf16>, vector<128x256xbf16>, vector<18x256xf32> -> vector<18x256xf32>
    %cst_99 = arith.constant dense<0.000000e+00> : vector<18x256xf32>
    %53 = tpu.matmul %5, %51, %cst_99 {dimension_numbers = #tpu.dot_dimension_numbers<[1], [0], [0], [1], [0, 0, 1, 1], [], []>} : vector<18x128xbf16>, vector<128x256xbf16>, vector<18x256xf32> -> vector<18x256xf32>
    %cst_100 = arith.constant dense<0.000000e+00> : vector<18x256xf32>
    %54 = tpu.matmul %21, %51, %cst_100 {dimension_numbers = #tpu.dot_dimension_numbers<[1], [0], [0], [1], [0, 0, 1, 1], [], []>} : vector<18x128xbf16>, vector<128x256xbf16>, vector<18x256xf32> -> vector<18x256xf32>
    %cst_101 = arith.constant dense<0.000000e+00> : vector<18x256xf32>
    %55 = tpu.matmul %25, %51, %cst_101 {dimension_numbers = #tpu.dot_dimension_numbers<[1], [0], [0], [1], [0, 0, 1, 1], [], []>} : vector<18x128xbf16>, vector<128x256xbf16>, vector<18x256xf32> -> vector<18x256xf32>
    %c0_102 = arith.constant 0 : index
    %c1_103 = arith.constant 1 : index
    %c0_104 = arith.constant 0 : index
    %c0_105 = arith.constant 0 : index
    %56 = vector.load %arg1[%c0_102, %c1_103, %c0_104, %c0_105] : memref<3x3x128x256xbf16, #tpu.memory_space<vmem>>, vector<1x1x128x256xbf16>
    %57 = vector.shape_cast %56 : vector<1x1x128x256xbf16> to vector<128x256xbf16>
    %cst_106 = arith.constant dense<0.000000e+00> : vector<18x256xf32>
    %58 = tpu.matmul %3, %57, %cst_106 {dimension_numbers = #tpu.dot_dimension_numbers<[1], [0], [0], [1], [0, 0, 1, 1], [], []>} : vector<18x128xbf16>, vector<128x256xbf16>, vector<18x256xf32> -> vector<18x256xf32>
    %59 = arith.addf %52, %58 : vector<18x256xf32>
    %cst_107 = arith.constant dense<0.000000e+00> : vector<18x256xf32>
    %60 = tpu.matmul %7, %57, %cst_107 {dimension_numbers = #tpu.dot_dimension_numbers<[1], [0], [0], [1], [0, 0, 1, 1], [], []>} : vector<18x128xbf16>, vector<128x256xbf16>, vector<18x256xf32> -> vector<18x256xf32>
    %61 = arith.addf %53, %60 : vector<18x256xf32>
    %cst_108 = arith.constant dense<0.000000e+00> : vector<18x256xf32>
    %62 = tpu.matmul %23, %57, %cst_108 {dimension_numbers = #tpu.dot_dimension_numbers<[1], [0], [0], [1], [0, 0, 1, 1], [], []>} : vector<18x128xbf16>, vector<128x256xbf16>, vector<18x256xf32> -> vector<18x256xf32>
    %63 = arith.addf %54, %62 : vector<18x256xf32>
    %cst_109 = arith.constant dense<0.000000e+00> : vector<18x256xf32>
    %64 = tpu.matmul %27, %57, %cst_109 {dimension_numbers = #tpu.dot_dimension_numbers<[1], [0], [0], [1], [0, 0, 1, 1], [], []>} : vector<18x128xbf16>, vector<128x256xbf16>, vector<18x256xf32> -> vector<18x256xf32>
    %65 = arith.addf %55, %64 : vector<18x256xf32>
    %c0_110 = arith.constant 0 : index
    %c2_111 = arith.constant 2 : index
    %c0_112 = arith.constant 0 : index
    %c0_113 = arith.constant 0 : index
    %66 = vector.load %arg1[%c0_110, %c2_111, %c0_112, %c0_113] : memref<3x3x128x256xbf16, #tpu.memory_space<vmem>>, vector<1x1x128x256xbf16>
    %67 = vector.shape_cast %66 : vector<1x1x128x256xbf16> to vector<128x256xbf16>
    %cst_114 = arith.constant dense<0.000000e+00> : vector<18x256xf32>
    %68 = tpu.matmul %5, %67, %cst_114 {dimension_numbers = #tpu.dot_dimension_numbers<[1], [0], [0], [1], [0, 0, 1, 1], [], []>} : vector<18x128xbf16>, vector<128x256xbf16>, vector<18x256xf32> -> vector<18x256xf32>
    %69 = arith.addf %59, %68 : vector<18x256xf32>
    %cst_115 = arith.constant dense<0.000000e+00> : vector<18x256xf32>
    %70 = tpu.matmul %9, %67, %cst_115 {dimension_numbers = #tpu.dot_dimension_numbers<[1], [0], [0], [1], [0, 0, 1, 1], [], []>} : vector<18x128xbf16>, vector<128x256xbf16>, vector<18x256xf32> -> vector<18x256xf32>
    %71 = arith.addf %61, %70 : vector<18x256xf32>
    %cst_116 = arith.constant dense<0.000000e+00> : vector<18x256xf32>
    %72 = tpu.matmul %25, %67, %cst_116 {dimension_numbers = #tpu.dot_dimension_numbers<[1], [0], [0], [1], [0, 0, 1, 1], [], []>} : vector<18x128xbf16>, vector<128x256xbf16>, vector<18x256xf32> -> vector<18x256xf32>
    %73 = arith.addf %63, %72 : vector<18x256xf32>
    %cst_117 = arith.constant dense<0.000000e+00> : vector<18x256xf32>
    %74 = tpu.matmul %29, %67, %cst_117 {dimension_numbers = #tpu.dot_dimension_numbers<[1], [0], [0], [1], [0, 0, 1, 1], [], []>} : vector<18x128xbf16>, vector<128x256xbf16>, vector<18x256xf32> -> vector<18x256xf32>
    %75 = arith.addf %65, %74 : vector<18x256xf32>
    %c1_118 = arith.constant 1 : index
    %c0_119 = arith.constant 0 : index
    %c0_120 = arith.constant 0 : index
    %c0_121 = arith.constant 0 : index
    %76 = vector.load %arg1[%c1_118, %c0_119, %c0_120, %c0_121] : memref<3x3x128x256xbf16, #tpu.memory_space<vmem>>, vector<1x1x128x256xbf16>
    %77 = vector.shape_cast %76 : vector<1x1x128x256xbf16> to vector<128x256xbf16>
    %cst_122 = arith.constant dense<0.000000e+00> : vector<18x256xf32>
    %78 = tpu.matmul %11, %77, %cst_122 {dimension_numbers = #tpu.dot_dimension_numbers<[1], [0], [0], [1], [0, 0, 1, 1], [], []>} : vector<18x128xbf16>, vector<128x256xbf16>, vector<18x256xf32> -> vector<18x256xf32>
    %79 = arith.addf %69, %78 : vector<18x256xf32>
    %cst_123 = arith.constant dense<0.000000e+00> : vector<18x256xf32>
    %80 = tpu.matmul %15, %77, %cst_123 {dimension_numbers = #tpu.dot_dimension_numbers<[1], [0], [0], [1], [0, 0, 1, 1], [], []>} : vector<18x128xbf16>, vector<128x256xbf16>, vector<18x256xf32> -> vector<18x256xf32>
    %81 = arith.addf %71, %80 : vector<18x256xf32>
    %cst_124 = arith.constant dense<0.000000e+00> : vector<18x256xf32>
    %82 = tpu.matmul %31, %77, %cst_124 {dimension_numbers = #tpu.dot_dimension_numbers<[1], [0], [0], [1], [0, 0, 1, 1], [], []>} : vector<18x128xbf16>, vector<128x256xbf16>, vector<18x256xf32> -> vector<18x256xf32>
    %83 = arith.addf %73, %82 : vector<18x256xf32>
    %cst_125 = arith.constant dense<0.000000e+00> : vector<18x256xf32>
    %84 = tpu.matmul %35, %77, %cst_125 {dimension_numbers = #tpu.dot_dimension_numbers<[1], [0], [0], [1], [0, 0, 1, 1], [], []>} : vector<18x128xbf16>, vector<128x256xbf16>, vector<18x256xf32> -> vector<18x256xf32>
    %85 = arith.addf %75, %84 : vector<18x256xf32>
    %c1_126 = arith.constant 1 : index
    %c1_127 = arith.constant 1 : index
    %c0_128 = arith.constant 0 : index
    %c0_129 = arith.constant 0 : index
    %86 = vector.load %arg1[%c1_126, %c1_127, %c0_128, %c0_129] : memref<3x3x128x256xbf16, #tpu.memory_space<vmem>>, vector<1x1x128x256xbf16>
    %87 = vector.shape_cast %86 : vector<1x1x128x256xbf16> to vector<128x256xbf16>
    %cst_130 = arith.constant dense<0.000000e+00> : vector<18x256xf32>
    %88 = tpu.matmul %13, %87, %cst_130 {dimension_numbers = #tpu.dot_dimension_numbers<[1], [0], [0], [1], [0, 0, 1, 1], [], []>} : vector<18x128xbf16>, vector<128x256xbf16>, vector<18x256xf32> -> vector<18x256xf32>
    %89 = arith.addf %79, %88 : vector<18x256xf32>
    %cst_131 = arith.constant dense<0.000000e+00> : vector<18x256xf32>
    %90 = tpu.matmul %17, %87, %cst_131 {dimension_numbers = #tpu.dot_dimension_numbers<[1], [0], [0], [1], [0, 0, 1, 1], [], []>} : vector<18x128xbf16>, vector<128x256xbf16>, vector<18x256xf32> -> vector<18x256xf32>
    %91 = arith.addf %81, %90 : vector<18x256xf32>
    %cst_132 = arith.constant dense<0.000000e+00> : vector<18x256xf32>
    %92 = tpu.matmul %33, %87, %cst_132 {dimension_numbers = #tpu.dot_dimension_numbers<[1], [0], [0], [1], [0, 0, 1, 1], [], []>} : vector<18x128xbf16>, vector<128x256xbf16>, vector<18x256xf32> -> vector<18x256xf32>
    %93 = arith.addf %83, %92 : vector<18x256xf32>
    %cst_133 = arith.constant dense<0.000000e+00> : vector<18x256xf32>
    %94 = tpu.matmul %37, %87, %cst_133 {dimension_numbers = #tpu.dot_dimension_numbers<[1], [0], [0], [1], [0, 0, 1, 1], [], []>} : vector<18x128xbf16>, vector<128x256xbf16>, vector<18x256xf32> -> vector<18x256xf32>
    %95 = arith.addf %85, %94 : vector<18x256xf32>
    %c1_134 = arith.constant 1 : index
    %c2_135 = arith.constant 2 : index
    %c0_136 = arith.constant 0 : index
    %c0_137 = arith.constant 0 : index
    %96 = vector.load %arg1[%c1_134, %c2_135, %c0_136, %c0_137] : memref<3x3x128x256xbf16, #tpu.memory_space<vmem>>, vector<1x1x128x256xbf16>
    %97 = vector.shape_cast %96 : vector<1x1x128x256xbf16> to vector<128x256xbf16>
    %cst_138 = arith.constant dense<0.000000e+00> : vector<18x256xf32>
    %98 = tpu.matmul %15, %97, %cst_138 {dimension_numbers = #tpu.dot_dimension_numbers<[1], [0], [0], [1], [0, 0, 1, 1], [], []>} : vector<18x128xbf16>, vector<128x256xbf16>, vector<18x256xf32> -> vector<18x256xf32>
    %99 = arith.addf %89, %98 : vector<18x256xf32>
    %cst_139 = arith.constant dense<0.000000e+00> : vector<18x256xf32>
    %100 = tpu.matmul %19, %97, %cst_139 {dimension_numbers = #tpu.dot_dimension_numbers<[1], [0], [0], [1], [0, 0, 1, 1], [], []>} : vector<18x128xbf16>, vector<128x256xbf16>, vector<18x256xf32> -> vector<18x256xf32>
    %101 = arith.addf %91, %100 : vector<18x256xf32>
    %cst_140 = arith.constant dense<0.000000e+00> : vector<18x256xf32>
    %102 = tpu.matmul %35, %97, %cst_140 {dimension_numbers = #tpu.dot_dimension_numbers<[1], [0], [0], [1], [0, 0, 1, 1], [], []>} : vector<18x128xbf16>, vector<128x256xbf16>, vector<18x256xf32> -> vector<18x256xf32>
    %103 = arith.addf %93, %102 : vector<18x256xf32>
    %cst_141 = arith.constant dense<0.000000e+00> : vector<18x256xf32>
    %104 = tpu.matmul %39, %97, %cst_141 {dimension_numbers = #tpu.dot_dimension_numbers<[1], [0], [0], [1], [0, 0, 1, 1], [], []>} : vector<18x128xbf16>, vector<128x256xbf16>, vector<18x256xf32> -> vector<18x256xf32>
    %105 = arith.addf %95, %104 : vector<18x256xf32>
    %c2_142 = arith.constant 2 : index
    %c0_143 = arith.constant 0 : index
    %c0_144 = arith.constant 0 : index
    %c0_145 = arith.constant 0 : index
    %106 = vector.load %arg1[%c2_142, %c0_143, %c0_144, %c0_145] : memref<3x3x128x256xbf16, #tpu.memory_space<vmem>>, vector<1x1x128x256xbf16>
    %107 = vector.shape_cast %106 : vector<1x1x128x256xbf16> to vector<128x256xbf16>
    %cst_146 = arith.constant dense<0.000000e+00> : vector<18x256xf32>
    %108 = tpu.matmul %21, %107, %cst_146 {dimension_numbers = #tpu.dot_dimension_numbers<[1], [0], [0], [1], [0, 0, 1, 1], [], []>} : vector<18x128xbf16>, vector<128x256xbf16>, vector<18x256xf32> -> vector<18x256xf32>
    %109 = arith.addf %99, %108 : vector<18x256xf32>
    %cst_147 = arith.constant dense<0.000000e+00> : vector<18x256xf32>
    %110 = tpu.matmul %25, %107, %cst_147 {dimension_numbers = #tpu.dot_dimension_numbers<[1], [0], [0], [1], [0, 0, 1, 1], [], []>} : vector<18x128xbf16>, vector<128x256xbf16>, vector<18x256xf32> -> vector<18x256xf32>
    %111 = arith.addf %101, %110 : vector<18x256xf32>
    %cst_148 = arith.constant dense<0.000000e+00> : vector<18x256xf32>
    %112 = tpu.matmul %41, %107, %cst_148 {dimension_numbers = #tpu.dot_dimension_numbers<[1], [0], [0], [1], [0, 0, 1, 1], [], []>} : vector<18x128xbf16>, vector<128x256xbf16>, vector<18x256xf32> -> vector<18x256xf32>
    %113 = arith.addf %103, %112 : vector<18x256xf32>
    %cst_149 = arith.constant dense<0.000000e+00> : vector<18x256xf32>
    %114 = tpu.matmul %45, %107, %cst_149 {dimension_numbers = #tpu.dot_dimension_numbers<[1], [0], [0], [1], [0, 0, 1, 1], [], []>} : vector<18x128xbf16>, vector<128x256xbf16>, vector<18x256xf32> -> vector<18x256xf32>
    %115 = arith.addf %105, %114 : vector<18x256xf32>
    %c2_150 = arith.constant 2 : index
    %c1_151 = arith.constant 1 : index
    %c0_152 = arith.constant 0 : index
    %c0_153 = arith.constant 0 : index
    %116 = vector.load %arg1[%c2_150, %c1_151, %c0_152, %c0_153] : memref<3x3x128x256xbf16, #tpu.memory_space<vmem>>, vector<1x1x128x256xbf16>
    %117 = vector.shape_cast %116 : vector<1x1x128x256xbf16> to vector<128x256xbf16>
    %cst_154 = arith.constant dense<0.000000e+00> : vector<18x256xf32>
    %118 = tpu.matmul %23, %117, %cst_154 {dimension_numbers = #tpu.dot_dimension_numbers<[1], [0], [0], [1], [0, 0, 1, 1], [], []>} : vector<18x128xbf16>, vector<128x256xbf16>, vector<18x256xf32> -> vector<18x256xf32>
    %119 = arith.addf %109, %118 : vector<18x256xf32>
    %cst_155 = arith.constant dense<0.000000e+00> : vector<18x256xf32>
    %120 = tpu.matmul %27, %117, %cst_155 {dimension_numbers = #tpu.dot_dimension_numbers<[1], [0], [0], [1], [0, 0, 1, 1], [], []>} : vector<18x128xbf16>, vector<128x256xbf16>, vector<18x256xf32> -> vector<18x256xf32>
    %121 = arith.addf %111, %120 : vector<18x256xf32>
    %cst_156 = arith.constant dense<0.000000e+00> : vector<18x256xf32>
    %122 = tpu.matmul %43, %117, %cst_156 {dimension_numbers = #tpu.dot_dimension_numbers<[1], [0], [0], [1], [0, 0, 1, 1], [], []>} : vector<18x128xbf16>, vector<128x256xbf16>, vector<18x256xf32> -> vector<18x256xf32>
    %123 = arith.addf %113, %122 : vector<18x256xf32>
    %cst_157 = arith.constant dense<0.000000e+00> : vector<18x256xf32>
    %124 = tpu.matmul %47, %117, %cst_157 {dimension_numbers = #tpu.dot_dimension_numbers<[1], [0], [0], [1], [0, 0, 1, 1], [], []>} : vector<18x128xbf16>, vector<128x256xbf16>, vector<18x256xf32> -> vector<18x256xf32>
    %125 = arith.addf %115, %124 : vector<18x256xf32>
    %c2_158 = arith.constant 2 : index
    %c2_159 = arith.constant 2 : index
    %c0_160 = arith.constant 0 : index
    %c0_161 = arith.constant 0 : index
    %126 = vector.load %arg1[%c2_158, %c2_159, %c0_160, %c0_161] : memref<3x3x128x256xbf16, #tpu.memory_space<vmem>>, vector<1x1x128x256xbf16>
    %127 = vector.shape_cast %126 : vector<1x1x128x256xbf16> to vector<128x256xbf16>
    %cst_162 = arith.constant dense<0.000000e+00> : vector<18x256xf32>
    %128 = tpu.matmul %25, %127, %cst_162 {dimension_numbers = #tpu.dot_dimension_numbers<[1], [0], [0], [1], [0, 0, 1, 1], [], []>} : vector<18x128xbf16>, vector<128x256xbf16>, vector<18x256xf32> -> vector<18x256xf32>
    %129 = arith.addf %119, %128 : vector<18x256xf32>
    %cst_163 = arith.constant dense<0.000000e+00> : vector<18x256xf32>
    %130 = tpu.matmul %29, %127, %cst_163 {dimension_numbers = #tpu.dot_dimension_numbers<[1], [0], [0], [1], [0, 0, 1, 1], [], []>} : vector<18x128xbf16>, vector<128x256xbf16>, vector<18x256xf32> -> vector<18x256xf32>
    %131 = arith.addf %121, %130 : vector<18x256xf32>
    %cst_164 = arith.constant dense<0.000000e+00> : vector<18x256xf32>
    %132 = tpu.matmul %45, %127, %cst_164 {dimension_numbers = #tpu.dot_dimension_numbers<[1], [0], [0], [1], [0, 0, 1, 1], [], []>} : vector<18x128xbf16>, vector<128x256xbf16>, vector<18x256xf32> -> vector<18x256xf32>
    %133 = arith.addf %123, %132 : vector<18x256xf32>
    %cst_165 = arith.constant dense<0.000000e+00> : vector<18x256xf32>
    %134 = tpu.matmul %49, %127, %cst_165 {dimension_numbers = #tpu.dot_dimension_numbers<[1], [0], [0], [1], [0, 0, 1, 1], [], []>} : vector<18x128xbf16>, vector<128x256xbf16>, vector<18x256xf32> -> vector<18x256xf32>
    %135 = arith.addf %125, %134 : vector<18x256xf32>
    %136 = arith.maximumf %129, %131 : vector<18x256xf32>
    %137 = arith.maximumf %133, %135 : vector<18x256xf32>
    %138 = arith.maximumf %136, %137 : vector<18x256xf32>
    %c0_166 = arith.constant 0 : index
    %c0_167 = arith.constant 0 : index
    %139 = vector.load %arg2[%c0_166, %c0_167] : memref<1x256xf32, #tpu.memory_space<vmem>>, vector<1x256xf32>
    %140 = vector.broadcast %139 : vector<1x256xf32> to vector<18x256xf32>
    %141 = arith.addf %138, %140 : vector<18x256xf32>
    %c0_168 = arith.constant 0 : index
    %c0_169 = arith.constant 0 : index
    %142 = vector.load %arg3[%c0_168, %c0_169] : memref<18x256xf32, #tpu.memory_space<vmem>>, vector<18x256xf32>
    tpu.vector_store %arg3[%c0_168, %c0_169], %141 {strides = array<i32>} : memref<18x256xf32, #tpu.memory_space<vmem>>, vector<18x256xf32>,
    return
  }
}

</mosaic_0001>

<bundles_post_ra>
// kernel: forward.5
= control target key start
LH: loop header
LB: loop body
LE: loop exit
PB: predicated region body
PF: predicated region fallthrough
CT: control target
= control target key end

     0   :  { %s2830_s21 = smov 0   ;;  %s2832_s22 = smov 0   ;;  %s3280_s0 = inlined_call_operand.vmem [shape: bf16[128,640], index: 0, kind: input, shape index: {}]   ;;  %s3281_s1 = inlined_call_operand.vmem [shape: bf16[640,128], index: 1, kind: input, shape index: {}]   ;;  %s3282_s2 = inlined_call_operand.vmem [shape: f32[1,128], index: 2, kind: input, shape index: {}]   ;;  %s3283_s3 = inlined_call_operand.vmem [shape: f32[128,128], index: 3, kind: input, shape index: {}]   ;;  %s3284_s4 = inlined_call_operand.vmem [shape: bf16[4,128,128], index: 4, kind: input, shape index: {}]   ;;  %s3285_s5 = inlined_call_operand.vmem [shape: f32[4,1,128], index: 5, kind: input, shape index: {}]   ;;  %s3286_s6 = inlined_call_operand.vmem [shape: bf16[4,128,128], index: 6, kind: output, shape index: {}]  }
   0x1   :  { %s2834_s23 = smov 0  }
   0x2 LB: > { %s2843_s24 = sadd.s32 4294967295, %s2793_s23   ;;  %s2845_s25 = sadd.s32 1, %s2793_s23   ;;  %s2793_s23 = sphi %s2834_s23, %s3290_s23   ;;  %s2789_s22 = sphi %s2832_s22, %s3289_s22   ;;  %s2785_s21 = sphi %s2830_s21, %s3288_s21  }
   0x3   : > { %s156_s26 = ssub.s32 %s2793_s23, %s2845_s25  ;;  %s159_s27 = sadd.s32 1, %s2789_s22 }
   0x4   : > { %p157_p0 = scmp.eq.s32.totalorder %s156_s26, 0  ;;  %p169_p1 = scmp.ne.s32.totalorder %s2789_s22, %s2785_s21 }
   0x5   : > { %p170_p2 = scmp.eq.s32.totalorder %s2843_s24, 1  ;;  %p1963_p3 = scmp.ge.s32.totalorder %s2793_s23, 1 }
   0x6   : > { %s2853_s28 = scalar_select %p157_p0, %s2789_s22, %s159_s27  }
   0x7   : > { %p2855_p4 = por %p170_p2, %p169_p1  ;;  %p225_p5 = scmp.lt.s32.totalorder %s2793_s23, 3 }
   0x9   : > { %p226_p6 = pnand %p1963_p3, %p225_p5 }
   0xa   : > { %s1965_s16 = sshll.u32 (!%p226_p6), %s2843_s24, 3 }
   0xb   : > { %229 = sbr.rel (%p226_p6) target bundleno = 1183 (0x49f), region = 44  ;;  %p261_p7 = scmp.lt.s32.totalorder (!%p226_p6), %s1965_s16, 15 }
  0x10   : > { %v2607_v0 = vld [vmem:[%s3281_s1 + $0x78] sm:$0xff]   ;;  %v2611_v4 = vld [vmem:[%s3281_s1 + $0x70] sm:$0xff]   ;;  %v2615_v8 = vld [vmem:[%s3281_s1 + $0x68] sm:$0xff]   ;;  %s3292_s16 = smov (!%p261_p7, %s1965_s16), 15  ;;  %s2210_s12 = sshll.u32 (%p2855_p4), %s2843_s24, 5 }
  0x11   : > { %v2608_v1 = vld [vmem:[%s3281_s1 + $0x38] sm:$0xff]   ;;  %2306 = vmatprep.subr.bf16.mxu0 %v2607_v0  ;;  %v2612_v5 = vld [vmem:[%s3281_s1 + $0x30] sm:$0xff]   ;;  %v2616_v9 = vld [vmem:[%s3281_s1 + $0x28] sm:$0xff]   ;;  %s2582_s26 = smul.u32 20, %s3292_s16  ;;  %s1968_s8 = sshll.u32 %s3292_s16, 3 }
  0x12   : > { %v2609_v2 = vld [vmem:[%s3281_s1 + $0xf8] sm:$0xff]   ;;  %2307 = vmatpush3.bf16.msra.mxu0 %v2608_v1  ;;  %v2613_v6 = vld [vmem:[%s3281_s1 + $0xf0] sm:$0xff]   ;;  %v2617_v10 = vld [vmem:[%s3281_s1 + $0xe8] sm:$0xff]   ;;  %s257_s16 = sand.u32 1, %s2785_s21   ;;  %s1731_s17 = scalar_lea.vmem (%p2855_p4), %s3286_s6, %s2210_s12 }
  0x13   : > { %v2610_v3 = vld [vmem:[%s3281_s1 + $0xb8] sm:$0xff]   ;;  %2346 = vmatprep.subr.bf16.mxu1 %v2609_v2  ;;  %2308 = vmatprep.subr.bf16.mxu0 %v2611_v4  ;;  %v2614_v7 = vld [vmem:[%s3281_s1 + $0xb0] sm:$0xff]   ;;  %v2618_v11 = vld [vmem:[%s3281_s1 + $0xa8] sm:$0xff]   ;;  %s2953_s15 = scalar_lea.vmem %s3280_s0, %s2582_s26  ;;  %s1964_s11 = sshll.u32 %s257_s16, 7 }
  0x14   : > { %2347 = vmatpush3.bf16.msra.mxu1 %v2610_v3  ;;  %v2619_v12 = vld [vmem:[%s3281_s1 + $0x60] sm:$0xff]   ;;  %v2623_v16 = vld [vmem:[%s3281_s1 + $0x58] sm:$0xff]   ;;  %v2627_v20 = vld [vmem:[%s3281_s1 + $0x50] sm:$0xff]   ;;  %s3120_s21 = scalar_lea.vmem [#allocation2], %s1964_s11 }
  0x15   : > { %2348 = vmatprep.subr.bf16.mxu1 %v2613_v6  ;;  %v2620_v13 = vld [vmem:[%s3281_s1 + $0x20] sm:$0xff]   ;;  %v2624_v17 = vld [vmem:[%s3281_s1 + $0x18] sm:$0xff]   ;;  %v2628_v21 = vld [vmem:[%s3281_s1 + $0x10] sm:$0xff]  }
  0x16   : > { %2309 = vmatpush3.bf16.msra.mxu0 %v2612_v5  ;;  %v2621_v14 = vld [vmem:[%s3281_s1 + $0xe0] sm:$0xff]   ;;  %v2625_v18 = vld [vmem:[%s3281_s1 + $0xd8] sm:$0xff]   ;;  %v2629_v22 = vld [vmem:[%s3281_s1 + $0xd0] sm:$0xff]  }
  0x17   : > { %2310 = vmatprep.subr.bf16.mxu0 %v2615_v8  ;;  %v2622_v15 = vld [vmem:[%s3281_s1 + $0xa0] sm:$0xff]   ;;  %v2626_v19 = vld [vmem:[%s3281_s1 + $0x98] sm:$0xff]   ;;  %v2630_v23 = vld [vmem:[%s3281_s1 + $0x90] sm:$0xff]  }
  0x18   : > { %2349 = vmatpush3.bf16.msra.mxu1 %v2614_v7  ;;  %v2631_v24 = vld [vmem:[%s3281_s1 + $0x48] sm:$0xff]   ;;  %v2635_v28 = vld [vmem:[%s3281_s1 + $0x40] sm:$0xff]   ;;  %v2642_v34 = vld [vmem:[%s3281_s1 + $0x138] sm:$0xff]  }
  0x19   : > { %2350 = vmatprep.subr.bf16.mxu1 %v2617_v10  ;;  %v2632_v25 = vld [vmem:[%s3281_s1 + $0x8] sm:$0xff]   ;;  %v2636_v29 = vld [vmem:[%s3281_s1] sm:$0xff]   ;;  %v2646_v37 = vld [vmem:[%s3281_s1 + $0x130] sm:$0xff]  }
  0x1a   : > { %2311 = vmatpush3.bf16.msra.mxu0 %v2616_v9  ;;  %v2633_v26 = vld [vmem:[%s3281_s1 + $0xc8] sm:$0xff]   ;;  %v2637_v30 = vld [vmem:[%s3281_s1 + $0xc0] sm:$0xff]   ;;  %v2659_v45 = vld [vmem:[%s2953_s15 + $0x5c] ss:$20 sps:$4 sm:$0xff]  }
  0x1b   : > { %2312 = vmatprep.subr.bf16.mxu0 %v2619_v12  ;;  %v2634_v27 = vld [vmem:[%s3281_s1 + $0x88] sm:$0xff]   ;;  %v2638_v31 = vld [vmem:[%s2953_s15] ss:$20 sps:$4 sm:$0xff]   ;;  %v2640_v32 = vld [vmem:[%s2953_s15 + $0x4] ss:$20 sps:$4 sm:$0xff]  }
  0x1c   : > { %2351 = vmatpush3.bf16.msra.mxu1 %v2618_v11  ;;  %v2641_v33 = vld [vmem:[%s3281_s1 + $0x80] sm:$0xff]   ;;  %762 = vmatprep.mubr.bf16.mxu0 %v2640_v32  ;;  %v2643_v35 = vld [vmem:[%s2953_s15 + $0x8] ss:$20 sps:$4 sm:$0xff]   ;;  %v2661_v49 = vld [vmem:[%s2953_s15 + $0x58] ss:$20 sps:$4 sm:$0xff]  }
  0x1d   : > { %2352 = vmatprep.subr.bf16.mxu1 %v2621_v14  ;;  %v2645_v36 = vld [vmem:[%s2953_s15 + $0xc] ss:$20 sps:$4 sm:$0xff]   ;;  %v2649_v39 = vld [vmem:[%s2953_s15 + $0x28] ss:$20 sps:$4 sm:$0xff]   ;;  %v2653_v42 = vld [vmem:[%s2953_s15 + $0x30] ss:$20 sps:$4 sm:$0xff]  }
  0x1e   : > { %2313 = vmatpush3.bf16.msra.mxu0 %v2620_v13  ;;  %827 = vmatprep.mubr.bf16.mxu1 %v2645_v36  ;;  %v2647_v38 = vld [vmem:[%s2953_s15 + $0x2c] ss:$20 sps:$4 sm:$0xff]   ;;  %v2651_v41 = vld [vmem:[%s2953_s15 + $0x34] ss:$20 sps:$4 sm:$0xff]   ;;  %v2658_v46 = vld [vmem:[%s3281_s1 + $0x118] sm:$0xff]  }
  0x1f   : > { %2314 = vmatprep.subr.bf16.mxu0 %v2623_v16  ;;  %v2650_v40 = vld [vmem:[%s3281_s1 + $0x128] sm:$0xff]   ;;  %v2654_v43 = vld [vmem:[%s3281_s1 + $0x120] sm:$0xff]   ;;  %v2663_v48 = vld [vmem:[%s2953_s15 + $0x7c] ss:$20 sps:$4 sm:$0xff]  }
  0x20   : > { %2353 = vmatpush3.bf16.msra.mxu1 %v2622_v15  ;;  %v2655_v44 = vld [vmem:[%s2953_s15 + $0x54] ss:$20 sps:$4 sm:$0xff]   ;;  %v2657_v47 = vld [vmem:[%s2953_s15 + $0x50] ss:$20 sps:$4 sm:$0xff]   ;;  %v2665_v52 = vld [vmem:[%s2953_s15 + $0x78] ss:$20 sps:$4 sm:$0xff]  }
  0x21   : > { %2354 = vmatprep.subr.bf16.mxu1 %v2625_v18  ;;  %v2662_v50 = vld [vmem:[%s3281_s1 + $0x110] sm:$0xff]   ;;  %v2667_v51 = vld [vmem:[%s2953_s15 + $0x84] ss:$20 sps:$4 sm:$0xff]   ;;  %v2666_v53 = vld [vmem:[%s3281_s1 + $0x108] sm:$0xff]  }
  0x22   : > { %2315 = vmatpush3.bf16.msra.mxu0 %v2624_v17  ;;  %v2671_v54 = vld [vmem:[%s2953_s15 + $0x10] ss:$20 sps:$4 sm:$0xff]   ;;  %v2669_v55 = vld [vmem:[%s2953_s15 + $0x80] ss:$20 sps:$4 sm:$0xff]   ;;  %v2672_v57 = vld [vmem:[%s2953_s15 + $0x38] ss:$20 sps:$4 sm:$0xff]  }
  0x23   : > { %2316 = vmatprep.subr.bf16.mxu0 %v2627_v20  ;;  %v2670_v56 = vld [vmem:[%s3281_s1 + $0x100] sm:$0xff]   ;;  %v2674_v59 = vld [vmem:[%s2953_s15 + $0x88] ss:$20 sps:$4 sm:$0xff]   ;;  %v2676_v61 = vld [vmem:[%s3284_s4 + $0x30] sm:$0xff]  }
  0x24   : > { %2355 = vmatpush3.bf16.msra.mxu1 %v2626_v19  ;;  %v2673_v58 = vld [vmem:[%s2953_s15 + $0x60] ss:$20 sps:$4 sm:$0xff]   ;;  %v2675_v60 = vld [vmem:[%s3284_s4 + $0x38] sm:$0xff]   ;;  %v2677_v62 = vld [vmem:[%s3284_s4 + $0x28] sm:$0xff]   ;;  %s3042_s15 = scalar_lea.vmem %s3283_s3, %s1968_s8 }
  0x25   : > { %2356 = vmatprep.subr.bf16.mxu1 %v2629_v22  ;;  %v2678_v63 = vld [vmem:[%s3284_s4 + $0x20] sm:$0xff]   ;;  %v2679_v0 = vld [vmem:[%s3284_s4 + $0x18] sm:$0xff]   ;;  %v2680_v1 = vld [vmem:[%s3284_s4 + $0x10] sm:$0xff]  }
  0x26   : > { %2317 = vmatpush3.bf16.msra.mxu0 %v2628_v21  ;;  %v2681_v2 = vld [vmem:[%s3284_s4 + $0x8] sm:$0xff]   ;;  %v2682_v3 = vld [vmem:[%s3284_s4] sm:$0xff]   ;;  %v2683_v4 = vld [vmem:[%s3284_s4 + $0x78] sm:$0xff]  }
  0x27   : > { %2318 = vmatprep.subr.bf16.mxu0 %v2631_v24 }
  0x28   : > { %2357 = vmatpush3.bf16.msra.mxu1 %v2630_v23 }
  0x29   : > { %2358 = vmatprep.subr.bf16.mxu1 %v2633_v26 }
  0x2a   : > { %2319 = vmatpush3.bf16.msra.mxu0 %v2632_v25 }
  0x2b   : > { %2320 = vmatprep.subr.bf16.mxu0 %v2635_v28 }
  0x2c   : > { %2359 = vmatpush3.bf16.msra.mxu1 %v2634_v27 }
  0x2d   : > { %2360 = vmatprep.subr.bf16.mxu1 %v2637_v30 }
  0x2e   : > { %2321 = vmatpush3.bf16.msra.mxu0 %v2636_v29 }
  0x2f   : > { %2446 = vmatprep.subr.bf16.mxu0 %v2642_v34 }
  0x30   : > { %2361 = vmatpush3.bf16.msra.mxu1 %v2641_v33 }
  0x31   : > { %763 = vmatmul.mubr.bf16.vlgmr.msra.gmra.mxu0 %v2638_v31  ;;  %2470 = vmatprep.subr.bf16.mxu1 %v2675_v60 }
  0x32   : > { %2447 = vmatpush3.bf16.msra.mxu0 %v2642_v34  ;;  %770 = vmatprep.mubr.bf16.mxu0 %v2647_v38 }
  0x33   : > { %828 = vmatmul.mubr.bf16.vlgmr.msra.gmra.mxu1 %v2643_v35  ;;  %2448 = vmatprep.subr.bf16.mxu0 %v2646_v37  ;;  %v1969_v35 = vld [vmem:[%s3282_s2] ss:$0 sm:$0xff] }
  0x34   : > { %835 = vmatprep.mubr.bf16.mxu1 %v2651_v41  ;;  %2471 = vmatpush3.bf16.msra.mxu1 %v2675_v60 }
  0x35   : > { %2472 = vmatprep.subr.bf16.mxu1 %v2676_v61 }
  0x36   : > { %2449 = vmatpush3.bf16.msra.mxu0 %v2646_v37 }
  0x37   : > { %2450 = vmatprep.subr.bf16.mxu0 %v2650_v40 }
  0x38   : > { %2473 = vmatpush3.bf16.msra.mxu1 %v2676_v61 }
  0x39   : > { %771 = vmatmul.mubr.bf16.gmra.mxu0 %v2649_v39  ;;  %2474 = vmatprep.subr.bf16.mxu1 %v2677_v62 }
  0x3a   : > { %778 = vmatprep.mubr.bf16.mxu0 %v2655_v44  ;;  %2451 = vmatpush3.bf16.msra.mxu0 %v2650_v40 }
  0x3b   : > { %836 = vmatmul.mubr.bf16.gmra.mxu1 %v2653_v42  ;;  %2452 = vmatprep.subr.bf16.mxu0 %v2654_v43 }
  0x3c   : > { %843 = vmatprep.mubr.bf16.mxu1 %v2659_v45  ;;  %2475 = vmatpush3.bf16.msra.mxu1 %v2677_v62  ;;  %v928_v62 = vld [vmem:[%s3042_s15 + $0x18] sm:$0xff] }
  0x3d   : > { %2476 = vmatprep.subr.bf16.mxu1 %v2678_v63 }
  0x3e   : > { %2453 = vmatpush3.bf16.msra.mxu0 %v2654_v43 }
  0x3f   : > { %2454 = vmatprep.subr.bf16.mxu0 %v2658_v46 }
  0x40   : > { %2477 = vmatpush3.bf16.msra.mxu1 %v2678_v63 }
  0x41   : > { %779 = vmatmul.mubr.bf16.gmra.mxu0 %v2657_v47  ;;  %2478 = vmatprep.subr.bf16.mxu1 %v2679_v0 }
  0x42   : > { %786 = vmatprep.mubr.bf16.mxu0 %v2663_v48  ;;  %2455 = vmatpush3.bf16.msra.mxu0 %v2658_v46 }
  0x43   : > { %844 = vmatmul.mubr.bf16.gmra.mxu1 %v2661_v49  ;;  %2456 = vmatprep.subr.bf16.mxu0 %v2662_v50 }
  0x44   : > { %851 = vmatprep.mubr.bf16.mxu1 %v2667_v51  ;;  %2479 = vmatpush3.bf16.msra.mxu1 %v2679_v0 }
  0x45   : > { %2480 = vmatprep.subr.bf16.mxu1 %v2680_v1 }
  0x46   : > { %2457 = vmatpush3.bf16.msra.mxu0 %v2662_v50 }
  0x47   : > { %2458 = vmatprep.subr.bf16.mxu0 %v2666_v53 }
  0x48   : > { %2481 = vmatpush3.bf16.msra.mxu1 %v2680_v1 }
  0x49   : > { %787 = vmatmul.mubr.bf16.gmra.mxu0 %v2665_v52  ;;  %2482 = vmatprep.subr.bf16.mxu1 %v2681_v2 }
  0x4a   : > { %2462 = vmatprep.mubr.bf16.mxu0 %v2671_v54  ;;  %2459 = vmatpush3.bf16.msra.mxu0 %v2666_v53 }
  0x4b   : > { %852 = vmatmul.mubr.bf16.gmra.mxu1 %v2669_v55  ;;  %2460 = vmatprep.subr.bf16.mxu0 %v2670_v56 }
  0x4c   : > { %2483 = vmatpush3.bf16.msra.mxu1 %v2681_v2  ;;  %v925_v2 = vld [vmem:[%s3042_s15] sm:$0xff] }
  0x4d   : > { %2484 = vmatprep.subr.bf16.mxu1 %v2682_v3 }
  0x4e   : > { %2461 = vmatpush3.bf16.msra.mxu0 %v2670_v56 }
  0x4f   : > { %2494 = vmatprep.subr.bf16.mxu0 %v2683_v4 }
  0x50   : > { %2485 = vmatpush3.bf16.msra.mxu1 %v2682_v3 }
  0x51   : > { %2463 = vmatmul.mubr.bf16.vlgmr.msra.gmra.mxu0 %v2672_v57 }
  0x52   : > { %2466 = vmatprep.mubr.bf16.mxu0 %v2673_v58  ;;  %2495 = vmatpush3.bf16.msra.mxu0 %v2683_v4  ;;  %v926_v4 = vld [vmem:[%s3042_s15 + $0x8] sm:$0xff] }
  0x59   : > { %2467 = vmatmul.mubr.bf16.gmra.mxu0 %v2674_v59 }
  0xf1   : > { %v2322_v5 = vpop.f32.mrf.mxu0 }
  0xf3   : > { %v2323_v6 = vpop.f32.mrf.mxu0  ;;  %v2362_v7 = vpop.f32.mrf.mxu1 }
  0xf4   : > { %v2324_v32 = vadd.f32 %v2323_v6, %v2322_v5 }
  0xf5   : > { %v2325_v8 = vpop.f32.mrf.mxu0  ;;  %v2363_v9 = vpop.f32.mrf.mxu1 }
  0xf6   : > { %v765_v40 = vadd.f32 %v2324_v32, %v1969_v35  ;;  %v2364_v41 = vadd.f32 %v2363_v9, %v2362_v7 }
  0xf7   : > { %v2326_v10 = vpop.f32.mrf.mxu0  ;;  %v2365_v11 = vpop.f32.mrf.mxu1 }
  0xf8   : > { %v2327_v38 = vadd.f32 %v2326_v10, %v2325_v8  ;;  %v830_v53 = vadd.f32 %v2364_v41, %v765_v40  ;;  %v927_v8 = vld [vmem:[%s3042_s15 + $0x10] sm:$0xff] }
  0xf9   : > { %v2328_v12 = vpop.f32.mrf.mxu0  ;;  %v2366_v13 = vpop.f32.mrf.mxu1 }
  0xfa   : > { %v768_v48 = vadd.f32 %v2327_v38, %v1969_v35  ;;  %v2367_v49 = vadd.f32 %v2366_v13, %v2365_v11 }
  0xfb   : > { %v2329_v14 = vpop.f32.mrf.mxu0  ;;  %v2368_v15 = vpop.f32.mrf.mxu1 }
  0xfc   : > { %v2330_v36 = vadd.f32 %v2329_v14, %v2328_v12  ;;  %v833_v63 = vadd.f32 %v2367_v49, %v768_v48  ;;  %v2690_v48 = vld [vmem:[%s3284_s4 + $0x40] sm:$0xff]   ;;  %v2691_v49 = vld [vmem:[%s3284_s4 + $0xb8] sm:$0xff]  }
  0xfd   : > { %v2331_v16 = vpop.f32.mrf.mxu0  ;;  %v2369_v17 = vpop.f32.mrf.mxu1  ;;  %2518 = vmatprep.subr.bf16.mxu1 %v2691_v49 }
  0xfe   : > { %v773_v44 = vadd.f32 %v2330_v36, %v1969_v35  ;;  %v2370_v45 = vadd.f32 %v2369_v17, %v2368_v15 }
  0xff   : > { %v2332_v18 = vpop.f32.mrf.mxu0  ;;  %v2371_v19 = vpop.f32.mrf.mxu1 }
 0x100   : > { %v2333_v33 = vadd.f32 %v2332_v18, %v2331_v16  ;;  %v838_v57 = vadd.f32 %v2370_v45, %v773_v44  ;;  %v2686_v44 = vld [vmem:[%s3284_s4 + $0x60] sm:$0xff]   ;;  %v2687_v45 = vld [vmem:[%s3284_s4 + $0x58] sm:$0xff]  }
 0x101   : > { %v2334_v20 = vpop.f32.mrf.mxu0  ;;  %v2372_v21 = vpop.f32.mrf.mxu1 }
 0x102   : > { %v776_v42 = vadd.f32 %v2333_v33, %v1969_v35  ;;  %v2373_v43 = vadd.f32 %v2372_v21, %v2371_v19  ;;  %v930_v33 = vld [vmem:[%s3042_s15 + $0x28] sm:$0xff] }
 0x103   : > { %v2335_v22 = vpop.f32.mrf.mxu0  ;;  %v2374_v23 = vpop.f32.mrf.mxu1 }
 0x104   : > { %v2336_v50 = vadd.f32 %v2335_v22, %v2334_v20  ;;  %v841_v54 = vadd.f32 %v2373_v43, %v776_v42  ;;  %v2684_v42 = vld [vmem:[%s3284_s4 + $0x70] sm:$0xff]   ;;  %v2685_v43 = vld [vmem:[%s3284_s4 + $0x68] sm:$0xff]  }
 0x105   : > { %v2337_v24 = vpop.f32.mrf.mxu0  ;;  %v2375_v25 = vpop.f32.mrf.mxu1  ;;  %2496 = vmatprep.subr.bf16.mxu0 %v2684_v42 }
 0x106   : > { %v781_v0 = vadd.f32 %v2336_v50, %v1969_v35  ;;  %v2376_v5 = vadd.f32 %v2375_v25, %v2374_v23  ;;  %2497 = vmatpush3.bf16.msra.mxu0 %v2684_v42  ;;  %v2030_v50 = vld [vmem:[%s3285_s5] ss:$0 sm:$0xff] }
 0x107   : > { %v2338_v26 = vpop.f32.mrf.mxu0  ;;  %v2377_v27 = vpop.f32.mrf.mxu1  ;;  %2498 = vmatprep.subr.bf16.mxu0 %v2685_v43 }
 0x108   : > { %v2339_v59 = vadd.f32 %v2338_v26, %v2337_v24  ;;  %v846_v20 = vadd.f32 %v2376_v5, %v781_v0 }
 0x109   : > { %v2340_v28 = vpop.f32.mrf.mxu0  ;;  %v2378_v29 = vpop.f32.mrf.mxu1 }
 0x10a   : > { %v784_v14 = vadd.f32 %v2339_v59, %v1969_v35  ;;  %v2379_v15 = vadd.f32 %v2378_v29, %v2377_v27  ;;  %2499 = vmatpush3.bf16.msra.mxu0 %v2685_v43 }
 0x10b   : > { %v2341_v30 = vpop.f32.mrf.mxu0  ;;  %v2380_v31 = vpop.f32.mrf.mxu1  ;;  %2500 = vmatprep.subr.bf16.mxu0 %v2686_v44 }
 0x10c   : > { %v2342_v55 = vadd.f32 %v2341_v30, %v2340_v28  ;;  %v932_v28 = vld [vmem:[%s3042_s15 + $0x38] sm:$0xff]  ;;  %v849_v29 = vadd.f32 %v2379_v15, %v784_v14 }
 0x10d   : > { %v2343_v34 = vpop.f32.mrf.mxu0  ;;  %v2381_v37 = vpop.f32.mrf.mxu1 }
 0x10e   : > { %v789_v10 = vadd.f32 %v2342_v55, %v1969_v35  ;;  %v2382_v11 = vadd.f32 %v2381_v37, %v2380_v31  ;;  %v929_v31 = vld [vmem:[%s3042_s15 + $0x20] sm:$0xff]  ;;  %2501 = vmatpush3.bf16.msra.mxu0 %v2686_v44 }
 0x10f   : > { %v2344_v39 = vpop.f32.mrf.mxu0  ;;  %v2383_v46 = vpop.f32.mrf.mxu1  ;;  %2502 = vmatprep.subr.bf16.mxu0 %v2687_v45 }
 0x110   : > { %v2345_v52 = vadd.f32 %v2344_v39, %v2343_v34  ;;  %v854_v24 = vadd.f32 %v2382_v11, %v789_v10  ;;  %v931_v34 = vld [vmem:[%s3042_s15 + $0x30] sm:$0xff] }
 0x111   : > { %v2464_v47 = vpop.f32.mrf.mxu0  ;;  %v2384_v56 = vpop.f32.mrf.mxu1 }
 0x112   : > { %v903_v1 = vadd.f32 %v2464_v47, %v838_v57  ;;  %v792_v6 = vadd.f32 %v2345_v52, %v1969_v35  ;;  %v2385_v7 = vadd.f32 %v2384_v56, %v2383_v46  ;;  %2503 = vmatpush3.bf16.msra.mxu0 %v2687_v45  ;;  %v2688_v46 = vld [vmem:[%s3284_s4 + $0x50] sm:$0xff]   ;;  %v2689_v47 = vld [vmem:[%s3284_s4 + $0x48] sm:$0xff]  }
 0x113   : > { %v894_v51 = vpop.f32.mrf.mxu0  ;;  %2504 = vmatprep.subr.bf16.mxu0 %v2688_v46 }
 0x114   : > { %v895_v60 = vadd.f32 %v894_v51, %v830_v53  ;;  %v3054_v18 = vadd.f32 %v927_v8, %v903_v1  ;;  %v857_v21 = vadd.f32 %v2385_v7, %v792_v6 }
 0x115   : > { %v2465_v58 = vpop.f32.mrf.mxu0 }
 0x116   : > { %v906_v61 = vadd.f32 %v2465_v58, %v841_v54  ;;  %v3050_v16 = vadd.f32 %v925_v2, %v895_v60  ;;  %2505 = vmatpush3.bf16.msra.mxu0 %v2688_v46 }
 0x117   : > { %v897_v3 = vpop.f32.mrf.mxu0  ;;  %2506 = vmatprep.subr.bf16.mxu0 %v2689_v47 }
 0x118   : > { %v898_v9 = vadd.f32 %v897_v3, %v833_v63  ;;  %v3048_v12 = vadd.f32 %v928_v62, %v906_v61 }
 0x119   : > { %v2468_v13 = vpop.f32.mrf.mxu0 }
 0x11a   : > { %v3052_v17 = vadd.f32 %v926_v4, %v898_v9  ;;  %v942_v23 = vpack.c.bf16 %v3048_v12, %v3054_v18  ;;  %v919_v30 = vadd.f32 %v2468_v13, %v854_v24  ;;  %2507 = vmatpush3.bf16.msra.mxu0 %v2689_v47  ;;  %v2693_v24 = vld [vmem:[%s3284_s4 + $0xa8] sm:$0xff]  }
 0x11b   : > { %v910_v19 = vpop.f32.mrf.mxu0  ;;  %2508 = vmatprep.subr.bf16.mxu0 %v2690_v48 }
 0x11c   : > { %v941_v22 = vpack.c.bf16 %v3052_v17, %v3050_v16  ;;  %v911_v26 = vadd.f32 %v910_v19, %v846_v20  ;;  %v3070_v39 = vadd.f32 %v931_v34, %v919_v30  ;;  %v2699_v30 = vld [vmem:[%s3284_s4 + $0xf8] sm:$0xff]  }
 0x11d   : > { %v2469_v25 = vpop.f32.mrf.mxu0 }
 0x11e   : > { %v922_v27 = vadd.f32 %v2469_v25, %v857_v21  ;;  %2486 = vmatprep.mubr.bf16.mxu1 %v941_v22  ;;  %v3066_v37 = vadd.f32 %v929_v31, %v911_v26  ;;  %2509 = vmatpush3.bf16.msra.mxu0 %v2690_v48  ;;  %v2694_v25 = vld [vmem:[%s3284_s4 + $0xa0] sm:$0xff]   ;;  %v2695_v26 = vld [vmem:[%s3284_s4 + $0x98] sm:$0xff]  }
 0x11f   : > { %v913_v32 = vpop.f32.mrf.mxu0  ;;  %2487 = vmatmul.mubr.bf16.vlgmr.msra.gmra.mxu1 %v942_v23  ;;  %v2692_v23 = vld [vmem:[%s3284_s4 + $0xb0] sm:$0xff]   ;;  %2542 = vmatprep.subr.bf16.mxu0 %v2699_v30  ;;  %v2064_v31 = vld [vmem:[%s3285_s5 + $0x1] ss:$0 sm:$0xff] }
 0x120   : > { %v914_v35 = vadd.f32 %v913_v32, %v849_v29  ;;  %v3064_v36 = vadd.f32 %v932_v28, %v922_v27  ;;  %2519 = vmatpush3.bf16.msra.mxu1 %v2691_v49  ;;  %v2696_v27 = vld [vmem:[%s3284_s4 + $0x90] sm:$0xff]   ;;  %v2697_v28 = vld [vmem:[%s3284_s4 + $0x88] sm:$0xff]   ;;  %v2698_v29 = vld [vmem:[%s3284_s4 + $0x80] sm:$0xff]  }
 0x121   : > { %2520 = vmatprep.subr.bf16.mxu1 %v2692_v23 }
 0x122   : > { %v3068_v38 = vadd.f32 %v930_v33, %v914_v35  ;;  %v944_v41 = vpack.c.bf16 %v3064_v36, %v3070_v39 }
 0x124   : > { %v943_v40 = vpack.c.bf16 %v3068_v38, %v3066_v37  ;;  %2521 = vmatpush3.bf16.msra.mxu1 %v2692_v23 }
 0x125   : > { %2522 = vmatprep.subr.bf16.mxu1 %v2693_v24 }
 0x126   : > { %2490 = vmatprep.mubr.bf16.mxu1 %v943_v40 }
 0x127   : > { %2491 = vmatmul.mubr.bf16.gmra.mxu1 %v944_v41 }
 0x128   : > { %2523 = vmatpush3.bf16.msra.mxu1 %v2693_v24 }
 0x129   : > { %2524 = vmatprep.subr.bf16.mxu1 %v2694_v25 }
 0x12c   : > { %2525 = vmatpush3.bf16.msra.mxu1 %v2694_v25 }
 0x12d   : > { %2526 = vmatprep.subr.bf16.mxu1 %v2695_v26 }
 0x130   : > { %2527 = vmatpush3.bf16.msra.mxu1 %v2695_v26 }
 0x131   : > { %2528 = vmatprep.subr.bf16.mxu1 %v2696_v27 }
 0x134   : > { %2529 = vmatpush3.bf16.msra.mxu1 %v2696_v27 }
 0x135   : > { %2530 = vmatprep.subr.bf16.mxu1 %v2697_v28 }
 0x138   : > { %2531 = vmatpush3.bf16.msra.mxu1 %v2697_v28 }
 0x139   : > { %2532 = vmatprep.subr.bf16.mxu1 %v2698_v29 }
 0x13c   : > { %2533 = vmatpush3.bf16.msra.mxu1 %v2698_v29 }
 0x13d   : > { %2566 = vmatprep.subr.bf16.mxu1 %v2699_v30 }
 0x1df   : > { %v2488_v51 = vpop.f32.mrf.mxu1 }
 0x1e0   : > { %v1059_v52 = vadd.f32 %v2488_v51, %v2030_v50 }
 0x1e1   : > { %v1050_v53 = vpop.f32.mrf.mxu1 }
 0x1e2   : > { %v1051_v54 = vadd.f32 %v2030_v50, %v1050_v53  ;;  %2707 = vtanh.f32 %v1059_v52 }
 0x1e3   : > { %v2489_v55 = vpop.f32.mrf.mxu1 }
 0x1e4   : > { %v1062_v56 = vadd.f32 %v2489_v55, %v2030_v50  ;;  %2709 = vtanh.f32 %v1051_v54 }
 0x1e5   : > { %v1053_v57 = vpop.f32.mrf.mxu1 }
 0x1e6   : > { %2711 = vtanh.f32 %v1062_v56  ;;  %v1054_v58 = vadd.f32 %v2030_v50, %v1053_v57 }
 0x1e7   : > { %v2492_v59 = vpop.f32.mrf.mxu1 }
 0x1e8   : > { %2713 = vtanh.f32 %v1054_v58  ;;  %v1075_v60 = vadd.f32 %v2492_v59, %v2030_v50 }
 0x1e9   : > { %v1066_v61 = vpop.f32.mrf.mxu1 }
 0x1ea   : > { %v1067_v62 = vadd.f32 %v2030_v50, %v1066_v61  ;;  %2715 = vtanh.f32 %v1075_v60 }
 0x1eb   : > { %v2493_v63 = vpop.f32.mrf.mxu1 }
 0x1ec   : > { %v1078_v0 = vadd.f32 %v2493_v63, %v2030_v50  ;;  %2717 = vtanh.f32 %v1067_v62 }
 0x1ed   : > { %v1069_v1 = vpop.f32.mrf.mxu1 }
 0x1ee   : > { %2719 = vtanh.f32 %v1078_v0  ;;  %v1070_v2 = vadd.f32 %v2030_v50, %v1069_v1 }
 0x1ef   : > { %v2708_v3 = vpop.eup %2707 }
 0x1f0   : > { %2721 = vtanh.f32 %v1070_v2  ;;  %v3105_v6 = vadd.f32 %v2708_v3, %v3054_v18 }
 0x1f1   : > { %v2710_v4 = vpop.eup %2709 }
 0x1f2   : > { %v3111_v9 = vadd.f32 %v2710_v4, %v3050_v16  ;;  %v2700_v4 = vld [vmem:[%s3284_s4 + $0xf0] sm:$0xff]  }
 0x1f3   : > { %v2712_v5 = vpop.eup %2711 }
 0x1f4   : > { %v3108_v7 = vadd.f32 %v2712_v5, %v3048_v12  ;;  %v2701_v5 = vld [vmem:[%s3284_s4 + $0xe8] sm:$0xff]  }
 0x1f5   : > { %v2714_v8 = vpop.eup %2713 }
 0x1f6   : > { %v3114_v10 = vadd.f32 %v2714_v8, %v3052_v17  ;;  %v1098_v11 = vpack.c.bf16 %v3108_v7, %v3105_v6  ;;  %v2704_v8 = vld [vmem:[%s3284_s4 + $0xd0] sm:$0xff]  }
 0x1f7   : > { %v2716_v12 = vpop.eup %2715 }
 0x1f8   : > { %v1097_v13 = vpack.c.bf16 %v3114_v10, %v3111_v9  ;;  %2291 = vst [vmem:[%s3120_s21 + $0x8] sm:$0xff] %v1098_v11   ;;  %v3125_v16 = vadd.f32 %v2716_v12, %v3070_v39 }
 0x1f9   : > { %v2718_v14 = vpop.eup %2717 }
 0x1fa   : > { %2215 = vst [vmem:[%s3120_s21] sm:$0xff] %v1097_v13   ;;  %2510 = vmatprep.mubr.bf16.mxu0 %v1097_v13  ;;  %v3131_v19 = vadd.f32 %v2718_v14, %v3066_v37 }
 0x1fb   : > { %v2720_v15 = vpop.eup %2719  ;;  %2511 = vmatmul.mubr.bf16.vlgmr.msra.gmra.mxu0 %v1098_v11  ;;  %v2106_v11 = vld [vmem:[%s3285_s5 + $0x2] ss:$0 sm:$0xff] }
 0x1fc   : > { %v3128_v17 = vadd.f32 %v2720_v15, %v3064_v36  ;;  %2543 = vmatpush3.bf16.msra.mxu0 %v2699_v30 }
 0x1fd   : > { %v2722_v18 = vpop.eup %2721  ;;  %2544 = vmatprep.subr.bf16.mxu0 %v2700_v4 }
 0x1fe   : > { %v3134_v20 = vadd.f32 %v2722_v18, %v3068_v38  ;;  %v1100_v21 = vpack.c.bf16 %v3128_v17, %v3125_v16 }
 0x200   : > { %v1099_v22 = vpack.c.bf16 %v3134_v20, %v3131_v19  ;;  %2293 = vst [vmem:[%s3120_s21 + $0x18] sm:$0xff] %v1100_v21   ;;  %2545 = vmatpush3.bf16.msra.mxu0 %v2700_v4 }
 0x201   : > { %2546 = vmatprep.subr.bf16.mxu0 %v2701_v5 }
 0x202   : > { %2292 = vst [vmem:[%s3120_s21 + $0x10] sm:$0xff] %v1099_v22   ;;  %2514 = vmatprep.mubr.bf16.mxu0 %v1099_v22 }
 0x203   : > { %2515 = vmatmul.mubr.bf16.gmra.mxu0 %v1100_v21 }
 0x204   : > { %2547 = vmatpush3.bf16.msra.mxu0 %v2701_v5 }
 0x2bb   : > { %v2512_v32 = vpop.f32.mrf.mxu0 }
 0x2bc   : > { %v1253_v33 = vadd.f32 %v2512_v32, %v2064_v31 }
 0x2bd   : > { %v1244_v34 = vpop.f32.mrf.mxu0 }
 0x2be   : > { %v1245_v35 = vadd.f32 %v2064_v31, %v1244_v34  ;;  %2723 = vtanh.f32 %v1253_v33 }
 0x2bf   : > { %v2513_v36 = vpop.f32.mrf.mxu0 }
 0x2c0   : > { %v1256_v37 = vadd.f32 %v2513_v36, %v2064_v31  ;;  %2725 = vtanh.f32 %v1245_v35 }
 0x2c1   : > { %v1247_v38 = vpop.f32.mrf.mxu0 }
 0x2c2   : > { %2727 = vtanh.f32 %v1256_v37  ;;  %v1248_v39 = vadd.f32 %v2064_v31, %v1247_v38 }
 0x2c3   : > { %v2516_v40 = vpop.f32.mrf.mxu0 }
 0x2c4   : > { %2729 = vtanh.f32 %v1248_v39  ;;  %v1269_v41 = vadd.f32 %v2516_v40, %v2064_v31 }
 0x2c5   : > { %v1260_v42 = vpop.f32.mrf.mxu0 }
 0x2c6   : > { %v1261_v43 = vadd.f32 %v2064_v31, %v1260_v42  ;;  %2731 = vtanh.f32 %v1269_v41 }
 0x2c7   : > { %v2517_v44 = vpop.f32.mrf.mxu0 }
 0x2c8   : > { %v1272_v45 = vadd.f32 %v2517_v44, %v2064_v31  ;;  %2733 = vtanh.f32 %v1261_v43 }
 0x2c9   : > { %v1263_v46 = vpop.f32.mrf.mxu0 }
 0x2ca   : > { %2735 = vtanh.f32 %v1272_v45  ;;  %v1264_v47 = vadd.f32 %v2064_v31, %v1263_v46 }
 0x2cb   : > { %v2724_v48 = vpop.eup %2723 }
 0x2cc   : > { %2737 = vtanh.f32 %v1264_v47  ;;  %v3170_v51 = vadd.f32 %v2724_v48, %v3105_v6  ;;  %v2702_v6 = vld [vmem:[%s3284_s4 + $0xe0] sm:$0xff]  }
 0x2cd   : > { %v2726_v49 = vpop.eup %2725  ;;  %2548 = vmatprep.subr.bf16.mxu0 %v2702_v6  ;;  %v2148_v48 = vld [vmem:[%s3285_s5 + $0x3] ss:$0 sm:$0xff] }
 0x2ce   : > { %v3176_v54 = vadd.f32 %v2726_v49, %v3111_v9  ;;  %2549 = vmatpush3.bf16.msra.mxu0 %v2702_v6  ;;  %v2705_v9 = vld [vmem:[%s3284_s4 + $0xc8] sm:$0xff]  }
 0x2cf   : > { %v2728_v50 = vpop.eup %2727 }
 0x2d0   : > { %v3173_v52 = vadd.f32 %v2728_v50, %v3108_v7  ;;  %v2703_v7 = vld [vmem:[%s3284_s4 + $0xd8] sm:$0xff]  }
 0x2d1   : > { %v2730_v53 = vpop.eup %2729  ;;  %2550 = vmatprep.subr.bf16.mxu0 %v2703_v7 }
 0x2d2   : > { %v3179_v55 = vadd.f32 %v2730_v53, %v3114_v10  ;;  %v1292_v56 = vpack.c.bf16 %v3173_v52, %v3170_v51  ;;  %2551 = vmatpush3.bf16.msra.mxu0 %v2703_v7  ;;  %v2706_v10 = vld [vmem:[%s3284_s4 + $0xc0] sm:$0xff]  }
 0x2d3   : > { %v2732_v58 = vpop.eup %2731  ;;  %2552 = vmatprep.subr.bf16.mxu0 %v2704_v8 }
 0x2d4   : > { %v1291_v57 = vpack.c.bf16 %v3179_v55, %v3176_v54  ;;  %2295 = vst [vmem:[%s3120_s21 + $0x28] sm:$0xff] %v1292_v56   ;;  %v3188_v61 = vadd.f32 %v2732_v58, %v3125_v16 }
 0x2d5   : > { %v2734_v59 = vpop.eup %2733 }
 0x2d6   : > { %2294 = vst [vmem:[%s3120_s21 + $0x20] sm:$0xff] %v1291_v57   ;;  %2534 = vmatprep.mubr.bf16.mxu1 %v1291_v57  ;;  %v3194_v0 = vadd.f32 %v2734_v59, %v3131_v19  ;;  %2553 = vmatpush3.bf16.msra.mxu0 %v2704_v8 }
 0x2d7   : > { %v2736_v60 = vpop.eup %2735  ;;  %2535 = vmatmul.mubr.bf16.vlgmr.msra.gmra.mxu1 %v1292_v56  ;;  %2554 = vmatprep.subr.bf16.mxu0 %v2705_v9 }
 0x2d8   : > { %v3191_v62 = vadd.f32 %v2736_v60, %v3128_v17  ;;  %2574 = vmatpush3.bf16.msra.mxu1 %v2699_v30 }
 0x2d9   : > { %v2738_v63 = vpop.eup %2737  ;;  %2567 = vmatprep.subr.bf16.mxu1 %v2700_v4 }
 0x2da   : > { %v3197_v1 = vadd.f32 %v2738_v63, %v3134_v20  ;;  %v1294_v2 = vpack.c.bf16 %v3191_v62, %v3188_v61  ;;  %2555 = vmatpush3.bf16.msra.mxu0 %v2705_v9 }
 0x2db   : > { %2556 = vmatprep.subr.bf16.mxu0 %v2706_v10 }
 0x2dc   : > { %v1293_v3 = vpack.c.bf16 %v3197_v1, %v3194_v0  ;;  %2297 = vst [vmem:[%s3120_s21 + $0x38] sm:$0xff] %v1294_v2   ;;  %2575 = vmatpush3.bf16.msra.mxu1 %v2700_v4 }
 0x2dd   : > { %2568 = vmatprep.subr.bf16.mxu1 %v2701_v5 }
 0x2de   : > { %2296 = vst [vmem:[%s3120_s21 + $0x30] sm:$0xff] %v1293_v3   ;;  %2538 = vmatprep.mubr.bf16.mxu1 %v1293_v3  ;;  %2557 = vmatpush3.bf16.msra.mxu0 %v2706_v10 }
 0x2df   : > { %2539 = vmatmul.mubr.bf16.gmra.mxu1 %v1294_v2 }
 0x2e0   : > { %2576 = vmatpush3.bf16.msra.mxu1 %v2701_v5 }
 0x2e1   : > { %2569 = vmatprep.subr.bf16.mxu1 %v2702_v6 }
 0x2e4   : > { %2577 = vmatpush3.bf16.msra.mxu1 %v2702_v6 }
 0x2e5   : > { %2570 = vmatprep.subr.bf16.mxu1 %v2703_v7 }
 0x2e8   : > { %2578 = vmatpush3.bf16.msra.mxu1 %v2703_v7 }
 0x2e9   : > { %2571 = vmatprep.subr.bf16.mxu1 %v2704_v8 }
 0x2ec   : > { %2579 = vmatpush3.bf16.msra.mxu1 %v2704_v8 }
 0x2ed   : > { %2572 = vmatprep.subr.bf16.mxu1 %v2705_v9 }
 0x2f0   : > { %2580 = vmatpush3.bf16.msra.mxu1 %v2705_v9 }
 0x2f1   : > { %2573 = vmatprep.subr.bf16.mxu1 %v2706_v10 }
 0x2f4   : > { %2581 = vmatpush3.bf16.msra.mxu1 %v2706_v10 }
 0x397   : > { %v2536_v13 = vpop.f32.mrf.mxu1 }
 0x398   : > { %v1448_v12 = vadd.f32 %v2536_v13, %v2106_v11 }
 0x399   : > { %v1439_v14 = vpop.f32.mrf.mxu1 }
 0x39a   : > { %v1440_v15 = vadd.f32 %v2106_v11, %v1439_v14  ;;  %2739 = vtanh.f32 %v1448_v12 }
 0x39b   : > { %v2537_v16 = vpop.f32.mrf.mxu1 }
 0x39c   : > { %v1451_v17 = vadd.f32 %v2537_v16, %v2106_v11  ;;  %2741 = vtanh.f32 %v1440_v15 }
 0x39d   : > { %v1442_v18 = vpop.f32.mrf.mxu1 }
 0x39e   : > { %2743 = vtanh.f32 %v1451_v17  ;;  %v1443_v19 = vadd.f32 %v2106_v11, %v1442_v18 }
 0x39f   : > { %v2540_v20 = vpop.f32.mrf.mxu1 }
 0x3a0   : > { %2745 = vtanh.f32 %v1443_v19  ;;  %v1464_v21 = vadd.f32 %v2540_v20, %v2106_v11 }
 0x3a1   : > { %v1455_v22 = vpop.f32.mrf.mxu1 }
 0x3a2   : > { %v1456_v23 = vadd.f32 %v2106_v11, %v1455_v22  ;;  %2747 = vtanh.f32 %v1464_v21  ;;  %v1748_v21 = vld [vmem:[%s3120_s21] sm:$0xff] (%p2855_p4)   ;;  %v1752_v22 = vld [vmem:[%s3120_s21 + $0x8] sm:$0xff] (%p2855_p4)  }
 0x3a3   : > { %v2541_v24 = vpop.f32.mrf.mxu1  ;;  %1749 = vst [vmem:[%s1731_s17] sm:$0xff] (%p2855_p4), %v1748_v21   ;;  %1753 = vst [vmem:[%s1731_s17 + $0x8] sm:$0xff] (%p2855_p4), %v1752_v22  }
 0x3a4   : > { %v1467_v25 = vadd.f32 %v2541_v24, %v2106_v11  ;;  %2749 = vtanh.f32 %v1456_v23  ;;  %v1756_v23 = vld [vmem:[%s3120_s21 + $0x10] sm:$0xff] (%p2855_p4)   ;;  %v1760_v24 = vld [vmem:[%s3120_s21 + $0x18] sm:$0xff] (%p2855_p4)  }
 0x3a5   : > { %v1458_v26 = vpop.f32.mrf.mxu1  ;;  %1757 = vst [vmem:[%s1731_s17 + $0x10] sm:$0xff] (%p2855_p4), %v1756_v23   ;;  %1761 = vst [vmem:[%s1731_s17 + $0x18] sm:$0xff] (%p2855_p4), %v1760_v24  }
 0x3a6   : > { %2751 = vtanh.f32 %v1467_v25  ;;  %v1459_v27 = vadd.f32 %v2106_v11, %v1458_v26  ;;  %v1764_v25 = vld [vmem:[%s3120_s21 + $0x20] sm:$0xff] (%p2855_p4)   ;;  %v1768_v26 = vld [vmem:[%s3120_s21 + $0x28] sm:$0xff] (%p2855_p4)  }
 0x3a7   : > { %v2740_v28 = vpop.eup %2739  ;;  %1765 = vst [vmem:[%s1731_s17 + $0x40] sm:$0xff] (%p2855_p4), %v1764_v25   ;;  %1769 = vst [vmem:[%s1731_s17 + $0x48] sm:$0xff] (%p2855_p4), %v1768_v26  }
 0x3a8   : > { %2753 = vtanh.f32 %v1459_v27  ;;  %v1480_v31 = vadd.f32 %v2740_v28, %v3170_v51  ;;  %v1772_v27 = vld [vmem:[%s3120_s21 + $0x30] sm:$0xff] (%p2855_p4)   ;;  %v1776_v28 = vld [vmem:[%s3120_s21 + $0x38] sm:$0xff] (%p2855_p4)  }
 0x3a9   : > { %v2742_v29 = vpop.eup %2741  ;;  %1773 = vst [vmem:[%s1731_s17 + $0x50] sm:$0xff] (%p2855_p4), %v1772_v27   ;;  %1777 = vst [vmem:[%s1731_s17 + $0x58] sm:$0xff] (%p2855_p4), %v1776_v28  }
 0x3aa   : > { %v1478_v34 = vadd.f32 %v2742_v29, %v3176_v54 }
 0x3ab   : > { %v2744_v30 = vpop.eup %2743 }
 0x3ac   : > { %v1481_v32 = vadd.f32 %v2744_v30, %v3173_v52 }
 0x3ad   : > { %v2746_v33 = vpop.eup %2745 }
 0x3ae   : > { %v1479_v35 = vadd.f32 %v2746_v33, %v3179_v55  ;;  %v1487_v36 = vpack.c.bf16 %v1481_v32, %v1480_v31 }
 0x3af   : > { %v2748_v38 = vpop.eup %2747 }
 0x3b0   : > { %v1486_v37 = vpack.c.bf16 %v1479_v35, %v1478_v34  ;;  %2299 = vst [vmem:[%s3120_s21 + $0x48] sm:$0xff] %v1487_v36   ;;  %v1484_v41 = vadd.f32 %v2748_v38, %v3188_v61 }
 0x3b1   : > { %v2750_v39 = vpop.eup %2749 }
 0x3b2   : > { %2298 = vst [vmem:[%s3120_s21 + $0x40] sm:$0xff] %v1486_v37   ;;  %2558 = vmatprep.mubr.bf16.mxu0 %v1486_v37  ;;  %v1482_v44 = vadd.f32 %v2750_v39, %v3194_v0 }
 0x3b3   : > { %v2752_v40 = vpop.eup %2751  ;;  %2559 = vmatmul.mubr.bf16.vlgmr.msra.gmra.mxu0 %v1487_v36 }
 0x3b4   : > { %v1485_v42 = vadd.f32 %v2752_v40, %v3191_v62 }
 0x3b5   : > { %v2754_v43 = vpop.eup %2753 }
 0x3b6   : > { %v1483_v45 = vadd.f32 %v2754_v43, %v3197_v1  ;;  %v1489_v46 = vpack.c.bf16 %v1485_v42, %v1484_v41 }
 0x3b7   : > { %v1784_v30 = vld [vmem:[%s3120_s21 + $0x48] sm:$0xff] (%p2855_p4)  }
 0x3b8   : > { %v1488_v47 = vpack.c.bf16 %v1483_v45, %v1482_v44  ;;  %2301 = vst [vmem:[%s3120_s21 + $0x58] sm:$0xff] %v1489_v46   ;;  %1785 = vst [vmem:[%s1731_s17 + $0x88] sm:$0xff] (%p2855_p4), %v1784_v30  }
 0x3b9   : > { %v1780_v29 = vld [vmem:[%s3120_s21 + $0x40] sm:$0xff] (%p2855_p4)  }
 0x3ba   : > { %2300 = vst [vmem:[%s3120_s21 + $0x50] sm:$0xff] %v1488_v47   ;;  %2562 = vmatprep.mubr.bf16.mxu1 %v1488_v47  ;;  %1781 = vst [vmem:[%s1731_s17 + $0x80] sm:$0xff] (%p2855_p4), %v1780_v29  }
 0x3bb   : > { %2563 = vmatmul.mubr.bf16.vlgmr.msra.gmra.mxu1 %v1489_v46 }
 0x473   : > { %v2560_v49 = vpop.f32.mrf.mxu0 }
 0x474   : > { %v1643_v50 = vadd.f32 %v2560_v49, %v2148_v48 }
 0x475   : > { %v1634_v51 = vpop.f32.mrf.mxu0 }
 0x476   : > { %v1635_v52 = vadd.f32 %v2148_v48, %v1634_v51  ;;  %2755 = vtanh.f32 %v1643_v50 }
 0x477   : > { %v2561_v53 = vpop.f32.mrf.mxu0 }
 0x478   : > { %v1646_v54 = vadd.f32 %v2561_v53, %v2148_v48  ;;  %2757 = vtanh.f32 %v1635_v52 }
 0x479   : > { %v1637_v55 = vpop.f32.mrf.mxu0 }
 0x47a   : > { %2759 = vtanh.f32 %v1646_v54  ;;  %v1638_v56 = vadd.f32 %v2148_v48, %v1637_v55 }
 0x47b   : > { %v2564_v57 = vpop.f32.mrf.mxu1 }
 0x47c   : > { %2761 = vtanh.f32 %v1638_v56  ;;  %v1659_v58 = vadd.f32 %v2564_v57, %v2148_v48 }
 0x47d   : > { %v1650_v59 = vpop.f32.mrf.mxu1 }
 0x47e   : > { %v1651_v60 = vadd.f32 %v2148_v48, %v1650_v59  ;;  %2763 = vtanh.f32 %v1659_v58 }
 0x47f   : > { %v2565_v61 = vpop.f32.mrf.mxu1 }
 0x480   : > { %v1662_v62 = vadd.f32 %v2565_v61, %v2148_v48  ;;  %2765 = vtanh.f32 %v1651_v60 }
 0x481   : > { %v1653_v63 = vpop.f32.mrf.mxu1 }
 0x482   : > { %2767 = vtanh.f32 %v1662_v62  ;;  %v1654_v0 = vadd.f32 %v2148_v48, %v1653_v63 }
 0x483   : > { %v2756_v1 = vpop.eup %2755 }
 0x484   : > { %2769 = vtanh.f32 %v1654_v0  ;;  %v1675_v4 = vadd.f32 %v2756_v1, %v1480_v31  ;;  %v1788_v31 = vld [vmem:[%s3120_s21 + $0x50] sm:$0xff] (%p2855_p4)  }
 0x485   : > { %v2758_v2 = vpop.eup %2757  ;;  %1789 = vst [vmem:[%s1731_s17 + $0x90] sm:$0xff] (%p2855_p4), %v1788_v31  }
 0x486   : > { %v1673_v7 = vadd.f32 %v2758_v2, %v1478_v34 }
 0x487   : > { %v2760_v3 = vpop.eup %2759 }
 0x488   : > { %v1676_v5 = vadd.f32 %v2760_v3, %v1481_v32  ;;  %v1792_v32 = vld [vmem:[%s3120_s21 + $0x58] sm:$0xff] (%p2855_p4)  }
 0x489   : > { %v2762_v6 = vpop.eup %2761  ;;  %1793 = vst [vmem:[%s1731_s17 + $0x98] sm:$0xff] (%p2855_p4), %v1792_v32  }
 0x48a   : > { %v2279_v8 = vpack.c.bf16 %v1676_v5, %v1675_v4  ;;  %v1674_v9 = vadd.f32 %v2762_v6, %v1479_v35 }
 0x48b   : > { %v2764_v11 = vpop.eup %2763 }
 0x48c   : > { %2303 = vst [vmem:[%s3120_s21 + $0x68] sm:$0xff] %v2279_v8   ;;  %v2274_v10 = vpack.c.bf16 %v1674_v9, %v1673_v7  ;;  %v1679_v14 = vadd.f32 %v2764_v11, %v1484_v41 }
 0x48d   : > { %v2766_v13 = vpop.eup %2765 }
 0x48e   : > { %2302 = vst [vmem:[%s3120_s21 + $0x60] sm:$0xff] %v2274_v10   ;;  %v1677_v17 = vadd.f32 %v2766_v13, %v1482_v44 }
 0x48f   : > { %v2768_v12 = vpop.eup %2767 }
 0x490   : > { %v1680_v15 = vadd.f32 %v2768_v12, %v1485_v42 }
 0x491   : > { %v2770_v16 = vpop.eup %2769 }
 0x492   : > { %v2289_v18 = vpack.c.bf16 %v1680_v15, %v1679_v14  ;;  %v1678_v19 = vadd.f32 %v2770_v16, %v1483_v45  ;;  %1728 = sbr.rel (!%p2855_p4) target bundleno = 1183 (0x49f), region = 48 }
 0x493   : > { %v1800_v34 = vld [vmem:[%s3120_s21 + $0x68] sm:$0xff] (%p2855_p4)  }
 0x494   : > { %2305 = vst [vmem:[%s3120_s21 + $0x78] sm:$0xff] %v2289_v18   ;;  %v2284_v20 = vpack.c.bf16 %v1678_v19, %v1677_v17  ;;  %1801 = vst [vmem:[%s1731_s17 + $0xc8] sm:$0xff] (%p2855_p4), %v1800_v34  }
 0x495   : > { %v1796_v33 = vld [vmem:[%s3120_s21 + $0x60] sm:$0xff] (%p2855_p4)  }
 0x496   : > { %2304 = vst [vmem:[%s3120_s21 + $0x70] sm:$0xff] %v2284_v20   ;;  %1797 = vst [vmem:[%s1731_s17 + $0xc0] sm:$0xff] (%p2855_p4), %v1796_v33  }
 0x49b   : > { %v1808_v36 = vld [vmem:[%s3120_s21 + $0x78] sm:$0xff]  }
 0x49c   : > { %1809 = vst [vmem:[%s1731_s17 + $0xd8] sm:$0xff] %v1808_v36  }
 0x49d   : > { %v1804_v35 = vld [vmem:[%s3120_s21 + $0x70] sm:$0xff]  }
 0x49e   : > { %1805 = vst [vmem:[%s1731_s17 + $0xd0] sm:$0xff] %v1804_v35  }
 0x49f PF: > { %p13_p8 = scmp.ge.s32.totalorder %s2845_s25, 4   ;;  %s3288_s21 = smov %s2789_s22 }
 0x4a0   : > { %s3289_s22 = smov %s2853_s28  ;;  %s3290_s23 = smov %s2845_s25 }
 0x4a1   :  { %15 = sbr.rel (!%p13_p8) target bundleno = 2 (0x2), region = 127 }

// kernel: forward.6
= control target key start
LH: loop header
LB: loop body
LE: loop exit
PB: predicated region body
PF: predicated region fallthrough
CT: control target
= control target key end

     0   :  { %8 = vsyncpa [#allocation3], 0  ;;  %s867_s0 = inlined_call_operand.vmem [shape: bf16[128,128], index: 0, kind: input, shape index: {}]   ;;  %s868_s1 = inlined_call_operand.vmem [shape: bf16[128,256], index: 1, kind: input, shape index: {}]   ;;  %s869_s2 = inlined_call_operand.vmem [shape: f32[1,256], index: 2, kind: input, shape index: {}]   ;;  %s870_s3 = inlined_call_operand.hbm [shape: f32[128,256], index: 3, kind: output, shape index: {}]  }
   0x1   :  { %10 = vsyncpa [#allocation3 + $0x1], 0  ;;  %s686_s12 = smov 0   ;;  %s688_s13 = smov 0  }
   0x2   :  { %s690_s14 = smov 0   ;;  %s692_s15 = smov 0  }
   0x3 LB: > { %s707_s16 = sadd.s32 4294967295, %s660_s15   ;;  %s479_s17 = sadd.s32 4294967294, %s660_s15   ;;  %s660_s15 = sphi %s692_s15, %s876_s15   ;;  %s656_s14 = sphi %s690_s14, %s875_s14   ;;  %s652_s13 = sphi %s688_s13, %s874_s13   ;;  %s648_s12 = sphi %s686_s12, %s873_s12  }
   0x4   : > { %s711_s18 = sadd.s32 1, %s660_s15   ;;  %s91_s19 = sadd.s32 1, %s656_s14 }
   0x5   : > { %s88_s20 = ssub.s32 %s660_s15, %s711_s18  ;;  %p101_p0 = scmp.ne.s32.totalorder %s656_s14, %s652_s13 }
   0x6   : > { %p89_p1 = scmp.eq.s32.totalorder %s88_s20, 0  ;;  %p102_p2 = scmp.eq.s32.totalorder %s707_s16, 1 }
   0x7   : > { %p107_p3 = scmp.ne.s32.totalorder %s652_s13, %s648_s12  ;;  %p108_p4 = scmp.eq.s32.totalorder %s479_s17, 1 }
   0x8   : > { %s722_s21 = scalar_select %p89_p1, %s656_s14, %s91_s19  }
   0x9   : > { %p724_p5 = por %p102_p2, %p101_p0  ;;  %p728_p6 = por %p108_p4, %p107_p3 }
   0xa   : > { %p482_p7 = scmp.ge.s32.totalorder %s660_s15, 1  ;;  %p141_p8 = scmp.lt.s32.totalorder %s660_s15, 3 }
   0xc   : > { %p142_p9 = pnand %p482_p7, %p141_p8 }
   0xd   : > { %s484_s26 = sshll.u32 (!%p142_p9), %s707_s16, 3  ;;  %s513_s30 = sshll.u32 (!%p142_p9), %s707_s16, 11 }
   0xe   : > { %145 = sbr.rel (%p142_p9) target bundleno = 276 (0x114), region = 32  ;;  %p166_p10 = scmp.lt.s32.totalorder (!%p142_p9), %s484_s26, 15 }
   0xf   : > { %s817_s7 = scalar_lea.hbm (!%p142_p9), %s870_s3, %s513_s30  ;;  %s663_s9 = smov (!%p142_p9), [#allocation2]  }
  0x10   : > { %s604_s10 = sshll.u32 (!%p142_p9), %s663_s9, 4  ;;  %s605_s10 = int_to_ptr.vmem [resolvable:$false] %s604_s10 }
  0x11   : > { %s606_s11 = scalar_lea.vmem (!%p142_p9), %s605_s10, 4096 }
  0x13   : > { %v572_v0 = vld [vmem:[%s868_s1 + $0x74] ss:$8 sps:$4 sm:$0xff]   ;;  %v574_v1 = vld [vmem:[%s868_s1 + $0x70] ss:$8 sps:$4 sm:$0xff]   ;;  %v662_v2 = vmov 0   ;;  %s878_s26 = smov (!%p166_p10, %s484_s26), 15  ;;  %v199_v21 = vlaneseq }
  0x14   : > { %345 = vmatprep.mubr.bf16.mxu0 %v662_v2  ;;  %365 = vmatprep.mubr.bf16.mxu1 %v662_v2  ;;  %v575_v3 = vld [vmem:[%s868_s1 + $0x64] ss:$8 sps:$4 sm:$0xff]   ;;  %v577_v4 = vld [vmem:[%s868_s1 + $0x60] ss:$8 sps:$4 sm:$0xff]   ;;  %v578_v5 = vld [vmem:[%s868_s1 + $0x54] ss:$8 sps:$4 sm:$0xff]  }
  0x15   : > { %313 = vmatprep.subr.bf16.mxu0 %v572_v0  ;;  %514 = vmatprep.subr.bf16.mxu1 %v572_v0  ;;  %s485_s8 = sshll.u32 %s878_s26, 2  ;;  %v580_v6 = vld [vmem:[%s868_s1 + $0x50] ss:$8 sps:$4 sm:$0xff]   ;;  %v581_v7 = vld [vmem:[%s868_s1 + $0x44] ss:$8 sps:$4 sm:$0xff]   ;;  %v200_v22 = vshrl.u32 %v199_v21, 7 }
  0x16   : > { %314 = vmatpush1.bf16.msra.mxu0 %v574_v1  ;;  %522 = vmatpush1.bf16.msra.mxu1 %v574_v1  ;;  %s759_s24 = scalar_lea.vmem %s867_s0, %s485_s8  ;;  %v583_v8 = vld [vmem:[%s868_s1 + $0x40] ss:$8 sps:$4 sm:$0xff]   ;;  %v584_v9 = vld [vmem:[%s868_s1 + $0x34] ss:$8 sps:$4 sm:$0xff]   ;;  %v586_v10 = vld [vmem:[%s868_s1 + $0x30] ss:$8 sps:$4 sm:$0xff]  }
  0x17   : > { %315 = vmatprep.subr.bf16.mxu0 %v575_v3  ;;  %515 = vmatprep.subr.bf16.mxu1 %v575_v3  ;;  %v587_v11 = vld [vmem:[%s868_s1 + $0x24] ss:$8 sps:$4 sm:$0xff]   ;;  %v589_v12 = vld [vmem:[%s868_s1 + $0x20] ss:$8 sps:$4 sm:$0xff]   ;;  %v590_v13 = vld [vmem:[%s868_s1 + $0x14] ss:$8 sps:$4 sm:$0xff]  }
  0x18   : > { %v592_v14 = vld [vmem:[%s868_s1 + $0x10] ss:$8 sps:$4 sm:$0xff]   ;;  %v593_v15 = vld [vmem:[%s868_s1 + $0x4] ss:$8 sps:$4 sm:$0xff]   ;;  %v595_v16 = vld [vmem:[%s868_s1] ss:$8 sps:$4 sm:$0xff]  }
  0x19   : > { %v596_v17 = vld [vmem:[%s759_s24] sm:$0xff]   ;;  %v597_v18 = vld [vmem:[%s759_s24 + $0x10] sm:$0xff]   ;;  %v598_v19 = vld [vmem:[%s759_s24 + $0x8] sm:$0xff]   ;;  %v201_v23 = vsub.s32 0, %v200_v22  ;;  %s162_s26 = sand.u32 1, %s652_s13   ;;  %v205_v25 = vsub.s32 1, %v200_v22 }
  0x1a   : > { %316 = vmatpush1.bf16.msra.mxu0 %v577_v4  ;;  %523 = vmatpush1.bf16.msra.mxu1 %v577_v4  ;;  %v599_v20 = vld [vmem:[%s759_s24 + $0x18] sm:$0xff]   ;;  %v197_v24 = vld [vmem:[%s869_s2] sm:$0x3]  ;;  %s483_s29 = sshll.u32 %s162_s26, 7  ;;  %s827_s16 = scalar_lea.sflag [#allocation3], %s162_s26 }
  0x1b   : > { %317 = vmatprep.subr.bf16.mxu0 %v578_v5  ;;  %516 = vmatprep.subr.bf16.mxu1 %v578_v5  ;;  %v202_v26 = vrot.slane %v197_v24, %v201_v23  ;;  %v206_v27 = vrot.slane %v197_v24, %v205_v25  ;;  %s798_s24 = scalar_lea.vmem [#allocation2], %s483_s29 }
  0x1c   : > { %s417_s4 = sshll.u32 %s798_s24, 4  ;;  %s819_s4 = int_to_ptr.vmem [resolvable:$true] %s417_s4 }
  0x1d   : > { %s600_s8 = scalar_lea.vmem %s819_s4, 2048  ;;  %p607_p0 = scmp.lt.s32.totalorder %s819_s4, %s605_s10 }
  0x1e   : > { %318 = vmatpush1.bf16.msra.mxu0 %v580_v6  ;;  %524 = vmatpush1.bf16.msra.mxu1 %v580_v6  ;;  %p601_p11 = scmp.ne.s32.totalorder %s819_s4, %s600_s8  ;;  %p608_p1 = scmp.lt.s32.totalorder %s606_s11, %s600_s8 }
  0x1f   : > { %319 = vmatprep.subr.bf16.mxu0 %v581_v7  ;;  %517 = vmatprep.subr.bf16.mxu1 %v581_v7 }
  0x20   : > { %p602_p12 = pnand %p601_p11, %p724_p5  ;;  %p609_p2 = por %p608_p1, %p607_p0 }
  0x22   : > { %320 = vmatpush1.bf16.msra.mxu0 %v583_v8  ;;  %525 = vmatpush1.bf16.msra.mxu1 %v583_v8  ;;  %p603_p13 = pneg %p602_p12 }
  0x23   : > { %321 = vmatprep.subr.bf16.mxu0 %v584_v9  ;;  %518 = vmatprep.subr.bf16.mxu1 %v584_v9 }
  0x24   : > { %p610_p3 = pnand %p609_p2, %p603_p13 }
  0x26   : > { %322 = vmatpush1.bf16.msra.mxu0 %v586_v10  ;;  %526 = vmatpush1.bf16.msra.mxu1 %v586_v10 }
  0x27   : > { %323 = vmatprep.subr.bf16.mxu0 %v587_v11  ;;  %519 = vmatprep.subr.bf16.mxu1 %v587_v11 }
  0x2a   : > { %324 = vmatpush1.bf16.msra.mxu0 %v589_v12  ;;  %527 = vmatpush1.bf16.msra.mxu1 %v589_v12 }
  0x2b   : > { %325 = vmatprep.subr.bf16.mxu0 %v590_v13  ;;  %520 = vmatprep.subr.bf16.mxu1 %v590_v13 }
  0x2e   : > { %326 = vmatpush1.bf16.msra.mxu0 %v592_v14  ;;  %528 = vmatpush1.bf16.msra.mxu1 %v592_v14 }
  0x2f   : > { %327 = vmatprep.subr.bf16.mxu0 %v593_v15  ;;  %521 = vmatprep.subr.bf16.mxu1 %v593_v15 }
  0x32   : > { %328 = vmatpush1.bf16.msra.mxu0 %v595_v16  ;;  %529 = vmatpush1.bf16.msra.mxu1 %v595_v16 }
  0x35   : > { %346 = vmatmul.mubr.bf16.vlgmr.msra.gmra.mxu0 %v596_v17  ;;  %366 = vmatmul.mubr.bf16.vlgmr.msra.gmra.mxu1 %v597_v18 }
  0x36   : > { %355 = vmatprep.mubr.bf16.mxu0 %v662_v2  ;;  %375 = vmatprep.mubr.bf16.mxu1 %v662_v2 }
  0x3d   : > { %356 = vmatmul.mubr.bf16.gmra.mxu0 %v598_v19  ;;  %376 = vmatmul.mubr.bf16.gmra.mxu1 %v599_v20 }
  0xf5   : > { %v347_v28 = vpop.f32.mrf.mxu0  ;;  %v367_v29 = vpop.f32.mrf.mxu1 }
  0xf6   : > { %v348_v30 = vadd.f32 %v347_v28, %v202_v26  ;;  %v368_v31 = vadd.f32 %v367_v29, %v202_v26 }
  0xf7   : > { %v349_v32 = vpop.f32.mrf.mxu0  ;;  %v369_v33 = vpop.f32.mrf.mxu1 }
  0xf8   : > { %386 = vst [vmem:[%s798_s24] sm:$0xff] %v348_v30  ;;  %394 = vst [vmem:[%s798_s24 + $0x40] sm:$0xff] %v368_v31  ;;  %v350_v34 = vadd.f32 %v349_v32, %v206_v27  ;;  %v370_v35 = vadd.f32 %v369_v33, %v206_v27 }
  0xf9   : > { %v351_v36 = vpop.f32.mrf.mxu0  ;;  %v371_v37 = vpop.f32.mrf.mxu1 }
  0xfa   : > { %387 = vst [vmem:[%s798_s24 + $0x8] sm:$0xff] %v350_v34  ;;  %395 = vst [vmem:[%s798_s24 + $0x48] sm:$0xff] %v370_v35  ;;  %v352_v38 = vadd.f32 %v351_v36, %v202_v26  ;;  %v372_v39 = vadd.f32 %v371_v37, %v202_v26 }
  0xfb   : > { %v353_v40 = vpop.f32.mrf.mxu0  ;;  %v373_v41 = vpop.f32.mrf.mxu1 }
  0xfc   : > { %388 = vst [vmem:[%s798_s24 + $0x10] sm:$0xff] %v352_v38  ;;  %396 = vst [vmem:[%s798_s24 + $0x50] sm:$0xff] %v372_v39  ;;  %v354_v42 = vadd.f32 %v353_v40, %v206_v27  ;;  %v374_v43 = vadd.f32 %v373_v41, %v206_v27 }
  0xfd   : > { %v357_v44 = vpop.f32.mrf.mxu0  ;;  %v377_v45 = vpop.f32.mrf.mxu1 }
  0xfe   : > { %389 = vst [vmem:[%s798_s24 + $0x18] sm:$0xff] %v354_v42  ;;  %397 = vst [vmem:[%s798_s24 + $0x58] sm:$0xff] %v374_v43  ;;  %v358_v46 = vadd.f32 %v357_v44, %v202_v26  ;;  %v378_v47 = vadd.f32 %v377_v45, %v202_v26 }
  0xff   : > { %v359_v48 = vpop.f32.mrf.mxu0  ;;  %v379_v49 = vpop.f32.mrf.mxu1 }
 0x100   : > { %390 = vst [vmem:[%s798_s24 + $0x20] sm:$0xff] %v358_v46  ;;  %398 = vst [vmem:[%s798_s24 + $0x60] sm:$0xff] %v378_v47  ;;  %v360_v50 = vadd.f32 %v359_v48, %v206_v27  ;;  %v380_v51 = vadd.f32 %v379_v49, %v206_v27 }
 0x101   : > { %v361_v52 = vpop.f32.mrf.mxu0  ;;  %v381_v53 = vpop.f32.mrf.mxu1 }
 0x102   : > { %391 = vst [vmem:[%s798_s24 + $0x28] sm:$0xff] %v360_v50  ;;  %399 = vst [vmem:[%s798_s24 + $0x68] sm:$0xff] %v380_v51  ;;  %v362_v54 = vadd.f32 %v361_v52, %v202_v26  ;;  %v382_v55 = vadd.f32 %v381_v53, %v202_v26 }
 0x103   : > { %v363_v56 = vpop.f32.mrf.mxu0  ;;  %v383_v57 = vpop.f32.mrf.mxu1 }
 0x104   : > { %392 = vst [vmem:[%s798_s24 + $0x30] sm:$0xff] %v362_v54  ;;  %400 = vst [vmem:[%s798_s24 + $0x70] sm:$0xff] %v382_v55  ;;  %v364_v58 = vadd.f32 %v363_v56, %v206_v27  ;;  %v384_v59 = vadd.f32 %v383_v57, %v206_v27 }
 0x106   : > { %393 = vst [vmem:[%s798_s24 + $0x38] sm:$0xff] %v364_v58  ;;  %401 = vst [vmem:[%s798_s24 + $0x78] sm:$0xff] %v384_v59 }
 0x107   : > { %613 = shalt.err (!%p610_p3)
}
 0x108   : > { %s614_s17 = scalar_lea.hbm %s817_s7, 2048  ;;  %s618_s25 = scalar_lea.hbm %s870_s3, 4096 }
 0x109   : > { %p615_p4 = scmp.ne.s32.totalorder %s817_s7, %s614_s17  ;;  %p619_p9 = scmp.lt.s32.totalorder %s817_s7, %s870_s3 }
 0x10a   : > { %p620_p10 = scmp.lt.s32.totalorder %s618_s25, %s614_s17 }
 0x10b   : > { %p616_p7 = pnand %p615_p4, %p724_p5 }
 0x10c   : > { %p621_p11 = por %p620_p10, %p619_p9 }
 0x10d   : > { %p617_p8 = pneg %p616_p7 }
 0x10f   : > { %p622_p12 = pnand %p621_p11, %p617_p8 }
 0x111   : > { %625 = shalt.err (!%p622_p12)
}
 0x112   : > { %s664_s28 = smov 256   ;;  %s665_s29 = smov 16  }
 0x113   : > { %530 = dma.vmem_to_hbm [thread:$0]  (%p724_p5), %s819_s4, 2048, %s817_s7, %s827_s16, %s664_s28, %s664_s28, %s665_s29  }
 0x114 PF: > { %p536_p13 = scmp.ge.s32.totalorder %s660_s15, 2  ;;  %s432_s24 = sand.u32 1, %s648_s12  }
 0x115   : > { %s433_s30 = scalar_lea.sflag [#allocation3], %s432_s24 }
 0x116   : > { %p533_p0 = pnand %p536_p13, %p728_p6 }
 0x118   : > { %p534_p1 = pneg %p533_p0 }
 0x11a   : > { %643 = dma.done.wait (%p534_p1), %s433_s30, 2048  }
 0x11b   : > { %645 = vsyncadd (%p534_p1), %s433_s30, 4294965248  ;;  %p13_p2 = scmp.ge.s32.totalorder %s711_s18, 4   ;;  %s873_s12 = smov %s652_s13 }
 0x11c   : > { %s874_s13 = smov %s656_s14  ;;  %s875_s14 = smov %s722_s21 }
 0x11d   : > { %s876_s15 = smov %s711_s18  ;;  %15 = sbr.rel (!%p13_p2) target bundleno = 3 (0x3), region = 67 }
 0x122   :  { %438 = vsyncpa [#allocation3], 1 }
 0x123   :  { %440 = vsyncpa [#allocation3 + $0x1], 1 }

// kernel: forward.7
= control target key start
LH: loop header
LB: loop body
LE: loop exit
PB: predicated region body
PF: predicated region fallthrough
CT: control target
= control target key end

     0   :  { %v4009_v1 = vmov 0   ;;  %vm929_vm0 = vsmask.f32 7424  ;;  %vm2450_vm1 = vsmask.f32 6400  ;;  %vm3255_vm2 = vcmask 1045504   ;;  %s6107_s1 = inlined_call_operand.vmem [shape: bf16[3,3,128,256], index: 1, kind: input, shape index: {}]   ;;  %s6108_s0 = inlined_call_operand.vmem [shape: bf16[4,4,22,128], index: 0, kind: input, shape index: {}]   ;;  %s6109_s2 = inlined_call_operand.vmem [shape: f32[1,256], index: 2, kind: input, shape index: {}]   ;;  %s6110_s3 = inlined_call_operand.vmem [shape: f32[18,256], index: 3, kind: output, shape index: {}]  }
   0x1   :  { %v4033_v0 = vld [vmem:[%s6107_s1 + $0xf4] ss:$8 sps:$4 sm:$0xff]   ;;  %246 = vmatprep.mubr.bf16.mxu0 %v4009_v1  ;;  %387 = vmatprep.mubr.bf16.mxu1 %v4009_v1  ;;  %v4046_v3 = vld [vmem:[%s6107_s1 + $0xf0] ss:$8 sps:$4 sm:$0xff]   ;;  %v4057_v5 = vld [vmem:[%s6107_s1 + $0xe4] ss:$8 sps:$4 sm:$0xff]  }
   0x2   :  { %v4040_v2 = vld [vmem:[%s6107_s1 + $0x74] ss:$8 sps:$4 sm:$0xff]   ;;  %214 = vmatprep.subr.bf16.mxu0 %v4033_v0  ;;  %v4051_v4 = vld [vmem:[%s6107_s1 + $0x70] ss:$8 sps:$4 sm:$0xff]   ;;  %v4064_v6 = vld [vmem:[%s6107_s1 + $0x64] ss:$8 sps:$4 sm:$0xff]  }
   0x3   :  { %355 = vmatprep.subr.bf16.mxu1 %v4040_v2  ;;  %215 = vmatpush1.bf16.msra.mxu0 %v4046_v3  ;;  %v4069_v7 = vld [vmem:[%s6107_s1 + $0xe0] ss:$8 sps:$4 sm:$0xff]   ;;  %v4081_v9 = vld [vmem:[%s6107_s1 + $0xd4] ss:$8 sps:$4 sm:$0xff]   ;;  %v4091_v11 = vld [vmem:[%s6107_s1 + $0xd0] ss:$8 sps:$4 sm:$0xff]  }
   0x4   :  { %356 = vmatpush1.bf16.msra.mxu1 %v4051_v4  ;;  %216 = vmatprep.subr.bf16.mxu0 %v4057_v5  ;;  %v4075_v8 = vld [vmem:[%s6107_s1 + $0x60] ss:$8 sps:$4 sm:$0xff]   ;;  %v4086_v10 = vld [vmem:[%s6107_s1 + $0x54] ss:$8 sps:$4 sm:$0xff]   ;;  %v4096_v12 = vld [vmem:[%s6107_s1 + $0x50] ss:$8 sps:$4 sm:$0xff]  }
   0x5   :  { %357 = vmatprep.subr.bf16.mxu1 %v4064_v6  ;;  %v4103_v13 = vld [vmem:[%s6107_s1 + $0xc4] ss:$8 sps:$4 sm:$0xff]   ;;  %v4115_v15 = vld [vmem:[%s6107_s1 + $0xc0] ss:$8 sps:$4 sm:$0xff]   ;;  %v4127_v17 = vld [vmem:[%s6107_s1 + $0xb4] ss:$8 sps:$4 sm:$0xff]  }
   0x6   :  { %v4110_v14 = vld [vmem:[%s6107_s1 + $0x44] ss:$8 sps:$4 sm:$0xff]   ;;  %v4122_v16 = vld [vmem:[%s6107_s1 + $0x40] ss:$8 sps:$4 sm:$0xff]   ;;  %v4134_v18 = vld [vmem:[%s6107_s1 + $0x34] ss:$8 sps:$4 sm:$0xff]  }
   0x7   :  { %217 = vmatpush1.bf16.msra.mxu0 %v4069_v7  ;;  %v4139_v19 = vld [vmem:[%s6107_s1 + $0xb0] ss:$8 sps:$4 sm:$0xff]   ;;  %v4151_v21 = vld [vmem:[%s6107_s1 + $0xa4] ss:$8 sps:$4 sm:$0xff]   ;;  %v4165_v23 = vld [vmem:[%s6107_s1 + $0xa0] ss:$8 sps:$4 sm:$0xff]  }
   0x8   :  { %358 = vmatpush1.bf16.msra.mxu1 %v4075_v8  ;;  %218 = vmatprep.subr.bf16.mxu0 %v4081_v9  ;;  %v4144_v20 = vld [vmem:[%s6107_s1 + $0x30] ss:$8 sps:$4 sm:$0xff]   ;;  %v4158_v22 = vld [vmem:[%s6107_s1 + $0x24] ss:$8 sps:$4 sm:$0xff]   ;;  %v4170_v24 = vld [vmem:[%s6107_s1 + $0x20] ss:$8 sps:$4 sm:$0xff]  }
   0x9   :  { %359 = vmatprep.subr.bf16.mxu1 %v4086_v10  ;;  %v4177_v25 = vld [vmem:[%s6107_s1 + $0x94] ss:$8 sps:$4 sm:$0xff]   ;;  %v4189_v27 = vld [vmem:[%s6107_s1 + $0x90] ss:$8 sps:$4 sm:$0xff]   ;;  %v4201_v29 = vld [vmem:[%s6107_s1 + $0x84] ss:$8 sps:$4 sm:$0xff]  }
   0xa   :  { %v4182_v26 = vld [vmem:[%s6107_s1 + $0x14] ss:$8 sps:$4 sm:$0xff]   ;;  %v4194_v28 = vld [vmem:[%s6107_s1 + $0x10] ss:$8 sps:$4 sm:$0xff]   ;;  %v4206_v30 = vld [vmem:[%s6107_s1 + $0x4] ss:$8 sps:$4 sm:$0xff]  }
   0xb   :  { %219 = vmatpush1.bf16.msra.mxu0 %v4091_v11  ;;  %v4211_v31 = vld [vmem:[%s6107_s1 + $0x80] ss:$8 sps:$4 sm:$0xff]   ;;  %v3364_v33 = vld [vmem:[%s6108_s0 + $0xc] sm:$0xf]  ;;  %v3365_v34 = vld [vmem:[%s6108_s0 + $0x10] sm:$0xf] }
   0xc   :  { %360 = vmatpush1.bf16.msra.mxu1 %v4096_v12  ;;  %220 = vmatprep.subr.bf16.mxu0 %v4103_v13  ;;  %v4216_v32 = vld [vmem:[%s6107_s1] ss:$8 sps:$4 sm:$0xff]   ;;  %v16_v36 = vld [vmem:[%s6108_s0 + $0x4] sm:$0xf]  ;;  %v3434_v37 = vcombine.low %v3364_v33, %v3365_v34  ;;  %v3367_v43 = vld [vmem:[%s6108_s0 + $0x18] sm:$0xf] }
   0xd   :  { %361 = vmatprep.subr.bf16.mxu1 %v4110_v14  ;;  %v15_v35 = vld [vmem:[%s6108_s0] sm:$0xf]  ;;  %v3789_v39 = vld [vmem:[%s6108_s0 + $0x14] ss:$0 sps:$4 sm:$0x11]   ;;  %v3797_v49 = vld [vmem:[%s6108_s0 + $0x6c] sm:$0xff]  }
   0xe   :  { %v4234_v38 = vcombine.low %v15_v35, %v16_v36  ;;  %v3790_v40 = vld [vmem:[%s6108_s0 + $0x8] ss:$0 sps:$4 sm:$0x11]   ;;  %v3370_v41 = vld [vmem:[%s6108_s0 + $0x24] sm:$0xf]  ;;  %v4401_v55 = vld [vmem:[%s6108_s0 + $0x78] sm:$0xff]  }
   0xf   :  { %221 = vmatpush1.bf16.msra.mxu0 %v4115_v15  ;;  %v3371_v42 = vld [vmem:[%s6108_s0 + $0x28] sm:$0xf]  ;;  %v3368_v44 = vld [vmem:[%s6108_s0 + $0x1c] sm:$0xf]  ;;  %v4345_v50 = vld [vmem:[%s6108_s0 + $0x60] sm:$0xff]  }
  0x10   :  { %362 = vmatpush1.bf16.msra.mxu1 %v4122_v16  ;;  %222 = vmatprep.subr.bf16.mxu0 %v4127_v17  ;;  %v3470_v45 = vcombine.low %v3370_v41, %v3371_v42  ;;  %v4291_v46 = vcombine.low %v3367_v43, %v3368_v44  ;;  %v3795_v47 = vld [vmem:[%s6108_s0 + $0x2c] ss:$0 sps:$4 sm:$0x11]   ;;  %v4308_v48 = vld [vmem:[%s6108_s0 + $0x20] ss:$0 sps:$4 sm:$0x11]  }
  0x11   :  { %363 = vmatprep.subr.bf16.mxu1 %v4134_v18  ;;  %v3799_v51 = vld [vmem:[%s6108_s0 + $0x74] ss:$0 sps:$4 sm:$0x11]   ;;  %v3800_v52 = vld [vmem:[%s6108_s0 + $0x68] ss:$0 sps:$4 sm:$0x11]  }
  0x12   :  { %v4393_v53 = vld [vmem:[%s6107_s1 + $0x174] ss:$8 sps:$4 sm:$0xff]   ;;  %v3801_v54 = vld [vmem:[%s6108_s0 + $0x84] sm:$0xff]   ;;  %v4408_v56 = vld [vmem:[%s6107_s1 + $0x170] ss:$8 sps:$4 sm:$0xff]  }
  0x13   :  { %223 = vmatpush1.bf16.msra.mxu0 %v4139_v19  ;;  %v4415_v57 = vld [vmem:[%s6107_s1 + $0x164] ss:$8 sps:$4 sm:$0xff]   ;;  %v4423_v58 = vld [vmem:[%s6107_s1 + $0x160] ss:$8 sps:$4 sm:$0xff]   ;;  %v4430_v59 = vld [vmem:[%s6107_s1 + $0x154] ss:$8 sps:$4 sm:$0xff]  }
  0x14   :  { %364 = vmatpush1.bf16.msra.mxu1 %v4144_v20  ;;  %224 = vmatprep.subr.bf16.mxu0 %v4151_v21  ;;  %v3818_v60 = vld [vmem:[%s6108_s0 + $0x8c] ss:$0 sps:$4 sm:$0x11]   ;;  %v4440_v61 = vld [vmem:[%s6108_s0 + $0x80] ss:$0 sps:$4 sm:$0x11]  }
  0x15   :  { %365 = vmatprep.subr.bf16.mxu1 %v4158_v22  ;;  %v4447_v62 = vld [vmem:[%s6107_s1 + $0x150] ss:$8 sps:$4 sm:$0xff]   ;;  %v4454_v63 = vld [vmem:[%s6107_s1 + $0x144] ss:$8 sps:$4 sm:$0xff]   ;;  %v4567_v33 = vld [vmem:[%s6107_s1 + $0x1d4] ss:$8 sps:$4 sm:$0xff]  }
  0x16   :  { %v4578_v35 = vld [vmem:[%s6107_s1 + $0x1d0] ss:$8 sps:$4 sm:$0xff]   ;;  %v4585_v36 = vld [vmem:[%s6107_s1 + $0x1c4] ss:$8 sps:$4 sm:$0xff]   ;;  %v4624_v41 = vld [vmem:[%s6107_s1 + $0x1a0] ss:$8 sps:$4 sm:$0xff]  }
  0x17   :  { %225 = vmatpush1.bf16.msra.mxu0 %v4165_v23  ;;  %v4631_v42 = vld [vmem:[%s6107_s1 + $0x194] ss:$8 sps:$4 sm:$0xff]   ;;  %v4638_v43 = vld [vmem:[%s6107_s1 + $0x190] ss:$8 sps:$4 sm:$0xff]   ;;  %v4645_v44 = vld [vmem:[%s6107_s1 + $0x184] ss:$8 sps:$4 sm:$0xff]  }
  0x18   :  { %366 = vmatpush1.bf16.msra.mxu1 %v4170_v24  ;;  %226 = vmatprep.subr.bf16.mxu0 %v4177_v25 }
  0x19   :  { %367 = vmatprep.subr.bf16.mxu1 %v4182_v26 }
  0x1b   :  { %227 = vmatpush1.bf16.msra.mxu0 %v4189_v27 }
  0x1c   :  { %368 = vmatpush1.bf16.msra.mxu1 %v4194_v28  ;;  %228 = vmatprep.subr.bf16.mxu0 %v4201_v29 }
  0x1d   :  { %369 = vmatprep.subr.bf16.mxu1 %v4206_v30 }
  0x1f   :  { %229 = vmatpush1.bf16.msra.mxu0 %v4211_v31 }
  0x20   :  { %370 = vmatpush1.bf16.msra.mxu1 %v4216_v32  ;;  %416 = vmatprep.subr.bf16.mxu0 %v4033_v0 }
  0x21   :  { %477 = vmatprep.subr.bf16.mxu1 %v4040_v2 }
  0x22   :  { %247 = vmatmul.mubr.bf16.vlgmr.msra.gmra.mxu0 %v3434_v37  ;;  %v4594_v37 = vld [vmem:[%s6107_s1 + $0x1c0] ss:$8 sps:$4 sm:$0xff]  }
  0x23   :  { %388 = vmatmul.mubr.bf16.vlgmr.msra.gmra.mxu1 %v4234_v38  ;;  %417 = vmatpush1.bf16.msra.mxu0 %v4046_v3 }
  0x24   :  { %478 = vmatpush1.bf16.msra.mxu1 %v4051_v4  ;;  %418 = vmatprep.subr.bf16.mxu0 %v4057_v5 }
  0x25   :  { %479 = vmatprep.subr.bf16.mxu1 %v4064_v6  ;;  %256 = vmatprep.mubr.bf16.mxu0 %v4009_v1 }
  0x26   :  { %397 = vmatprep.mubr.bf16.mxu1 %v4009_v1 }
  0x27   :  { %419 = vmatpush1.bf16.msra.mxu0 %v4069_v7 }
  0x28   :  { %480 = vmatpush1.bf16.msra.mxu1 %v4075_v8  ;;  %420 = vmatprep.subr.bf16.mxu0 %v4081_v9 }
  0x29   :  { %481 = vmatprep.subr.bf16.mxu1 %v4086_v10 }
  0x2a   :  { %257 = vmatmul.mubr.bf16.gmra.mxu0 %v3789_v39  ;;  %v4610_v39 = vld [vmem:[%s6107_s1 + $0x1b0] ss:$8 sps:$4 sm:$0xff]  }
  0x2b   :  { %398 = vmatmul.mubr.bf16.gmra.mxu1 %v3790_v40  ;;  %421 = vmatpush1.bf16.msra.mxu0 %v4091_v11  ;;  %v4617_v40 = vld [vmem:[%s6107_s1 + $0x1a4] ss:$8 sps:$4 sm:$0xff]  }
  0x2c   :  { %482 = vmatpush1.bf16.msra.mxu1 %v4096_v12  ;;  %422 = vmatprep.subr.bf16.mxu0 %v4103_v13 }
  0x2d   :  { %483 = vmatprep.subr.bf16.mxu1 %v4110_v14  ;;  %448 = vmatprep.mubr.bf16.mxu0 %v4009_v1 }
  0x2e   :  { %509 = vmatprep.mubr.bf16.mxu1 %v4009_v1 }
  0x2f   :  { %423 = vmatpush1.bf16.msra.mxu0 %v4115_v15 }
  0x30   :  { %484 = vmatpush1.bf16.msra.mxu1 %v4122_v16  ;;  %424 = vmatprep.subr.bf16.mxu0 %v4127_v17 }
  0x31   :  { %485 = vmatprep.subr.bf16.mxu1 %v4134_v18 }
  0x33   :  { %425 = vmatpush1.bf16.msra.mxu0 %v4139_v19 }
  0x34   :  { %486 = vmatpush1.bf16.msra.mxu1 %v4144_v20  ;;  %426 = vmatprep.subr.bf16.mxu0 %v4151_v21 }
  0x35   :  { %487 = vmatprep.subr.bf16.mxu1 %v4158_v22 }
  0x37   :  { %427 = vmatpush1.bf16.msra.mxu0 %v4165_v23 }
  0x38   :  { %488 = vmatpush1.bf16.msra.mxu1 %v4170_v24  ;;  %428 = vmatprep.subr.bf16.mxu0 %v4177_v25 }
  0x39   :  { %489 = vmatprep.subr.bf16.mxu1 %v4182_v26 }
  0x3b   :  { %429 = vmatpush1.bf16.msra.mxu0 %v4189_v27 }
  0x3c   :  { %490 = vmatpush1.bf16.msra.mxu1 %v4194_v28  ;;  %430 = vmatprep.subr.bf16.mxu0 %v4201_v29 }
  0x3d   :  { %491 = vmatprep.subr.bf16.mxu1 %v4206_v30 }
  0x3f   :  { %431 = vmatpush1.bf16.msra.mxu0 %v4211_v31 }
  0x40   :  { %492 = vmatpush1.bf16.msra.mxu1 %v4216_v32  ;;  %538 = vmatprep.subr.bf16.mxu0 %v4033_v0 }
  0x41   :  { %599 = vmatprep.subr.bf16.mxu1 %v4040_v2 }
  0x42   :  { %449 = vmatmul.mubr.bf16.vlgmr.msra.gmra.mxu0 %v3470_v45  ;;  %v4652_v45 = vld [vmem:[%s6107_s1 + $0x180] ss:$8 sps:$4 sm:$0xff]  }
  0x43   :  { %510 = vmatmul.mubr.bf16.vlgmr.msra.gmra.mxu1 %v4291_v46  ;;  %539 = vmatpush1.bf16.msra.mxu0 %v4046_v3 }
  0x44   :  { %600 = vmatpush1.bf16.msra.mxu1 %v4051_v4  ;;  %540 = vmatprep.subr.bf16.mxu0 %v4057_v5 }
  0x45   :  { %601 = vmatprep.subr.bf16.mxu1 %v4064_v6  ;;  %458 = vmatprep.mubr.bf16.mxu0 %v4009_v1 }
  0x46   :  { %519 = vmatprep.mubr.bf16.mxu1 %v4009_v1 }
  0x47   :  { %541 = vmatpush1.bf16.msra.mxu0 %v4069_v7 }
  0x48   :  { %602 = vmatpush1.bf16.msra.mxu1 %v4075_v8  ;;  %542 = vmatprep.subr.bf16.mxu0 %v4081_v9 }
  0x49   :  { %603 = vmatprep.subr.bf16.mxu1 %v4086_v10 }
  0x4a   :  { %459 = vmatmul.mubr.bf16.gmra.mxu0 %v3795_v47  ;;  %v4664_v47 = vld [vmem:[%s6108_s0 + $0x48] sm:$0xff]  }
  0x4b   :  { %520 = vmatmul.mubr.bf16.gmra.mxu1 %v4308_v48  ;;  %543 = vmatpush1.bf16.msra.mxu0 %v4091_v11 }
  0x4c   :  { %604 = vmatpush1.bf16.msra.mxu1 %v4096_v12  ;;  %544 = vmatprep.subr.bf16.mxu0 %v4103_v13 }
  0x4d   :  { %605 = vmatprep.subr.bf16.mxu1 %v4110_v14  ;;  %570 = vmatprep.mubr.bf16.mxu0 %v4009_v1 }
  0x4e   :  { %631 = vmatprep.mubr.bf16.mxu1 %v4009_v1 }
  0x4f   :  { %545 = vmatpush1.bf16.msra.mxu0 %v4115_v15 }
  0x50   :  { %606 = vmatpush1.bf16.msra.mxu1 %v4122_v16  ;;  %546 = vmatprep.subr.bf16.mxu0 %v4127_v17 }
  0x51   :  { %607 = vmatprep.subr.bf16.mxu1 %v4134_v18 }
  0x53   :  { %547 = vmatpush1.bf16.msra.mxu0 %v4139_v19 }
  0x54   :  { %608 = vmatpush1.bf16.msra.mxu1 %v4144_v20  ;;  %548 = vmatprep.subr.bf16.mxu0 %v4151_v21 }
  0x55   :  { %609 = vmatprep.subr.bf16.mxu1 %v4158_v22 }
  0x57   :  { %549 = vmatpush1.bf16.msra.mxu0 %v4165_v23 }
  0x58   :  { %610 = vmatpush1.bf16.msra.mxu1 %v4170_v24  ;;  %550 = vmatprep.subr.bf16.mxu0 %v4177_v25 }
  0x59   :  { %611 = vmatprep.subr.bf16.mxu1 %v4182_v26 }
  0x5b   :  { %551 = vmatpush1.bf16.msra.mxu0 %v4189_v27 }
  0x5c   :  { %612 = vmatpush1.bf16.msra.mxu1 %v4194_v28  ;;  %552 = vmatprep.subr.bf16.mxu0 %v4201_v29 }
  0x5d   :  { %613 = vmatprep.subr.bf16.mxu1 %v4206_v30 }
  0x5f   :  { %553 = vmatpush1.bf16.msra.mxu0 %v4211_v31 }
  0x60   :  { %614 = vmatpush1.bf16.msra.mxu1 %v4216_v32  ;;  %660 = vmatprep.subr.bf16.mxu0 %v4033_v0  ;;  %v4462_v0 = vld [vmem:[%s6107_s1 + $0x140] ss:$8 sps:$4 sm:$0xff]  }
  0x61   :  { %721 = vmatprep.subr.bf16.mxu1 %v4040_v2  ;;  %v4469_v2 = vld [vmem:[%s6107_s1 + $0x134] ss:$8 sps:$4 sm:$0xff]  }
  0x62   :  { %571 = vmatmul.mubr.bf16.vlgmr.msra.gmra.mxu0 %v3797_v49 }
  0x63   :  { %632 = vmatmul.mubr.bf16.vlgmr.msra.gmra.mxu1 %v4345_v50  ;;  %661 = vmatpush1.bf16.msra.mxu0 %v4046_v3  ;;  %v3817_v3 = vld [vmem:[%s6107_s1 + $0x130] ss:$8 sps:$4 sm:$0xff]  }
  0x64   :  { %722 = vmatpush1.bf16.msra.mxu1 %v4051_v4  ;;  %662 = vmatprep.subr.bf16.mxu0 %v4057_v5  ;;  %v3820_v4 = vld [vmem:[%s6107_s1 + $0x124] ss:$8 sps:$4 sm:$0xff]   ;;  %v933_v5 = vshll.u32 %v4234_v38, 16 }
  0x65   :  { %723 = vmatprep.subr.bf16.mxu1 %v4064_v6  ;;  %580 = vmatprep.mubr.bf16.mxu0 %v4009_v1  ;;  %v3822_v6 = vld [vmem:[%s6107_s1 + $0x120] ss:$8 sps:$4 sm:$0xff]  }
  0x66   :  { %641 = vmatprep.mubr.bf16.mxu1 %v4009_v1 }
  0x67   :  { %663 = vmatpush1.bf16.msra.mxu0 %v4069_v7  ;;  %v3829_v7 = vld [vmem:[%s6108_s0 + $0x8] ss:$0 sps:$4 sm:$0x33]  }
  0x68   :  { %724 = vmatpush1.bf16.msra.mxu1 %v4075_v8  ;;  %664 = vmatprep.subr.bf16.mxu0 %v4081_v9  ;;  %v3823_v8 = vld [vmem:[%s6107_s1 + $0x114] ss:$8 sps:$4 sm:$0xff]   ;;  %v931_v9 = vshrl.u32 %v4234_v38, 16 }
  0x69   :  { %725 = vmatprep.subr.bf16.mxu1 %v4086_v10  ;;  %v935_v10 = vrot.slane %v933_v5, 1  ;;  %v4601_v38 = vld [vmem:[%s6107_s1 + $0x1b4] ss:$8 sps:$4 sm:$0xff]  }
  0x6a   :  { %581 = vmatmul.mubr.bf16.gmra.mxu0 %v3799_v51 }
  0x6b   :  { %642 = vmatmul.mubr.bf16.gmra.mxu1 %v3800_v52  ;;  %665 = vmatpush1.bf16.msra.mxu0 %v4091_v11  ;;  %v3825_v11 = vld [vmem:[%s6107_s1 + $0x110] ss:$8 sps:$4 sm:$0xff]  }
  0x6c   :  { %726 = vmatpush1.bf16.msra.mxu1 %v4096_v12  ;;  %666 = vmatprep.subr.bf16.mxu0 %v4103_v13  ;;  %v938_v12 = vshll.u32 %v3829_v7, 16  ;;  %v3826_v13 = vld [vmem:[%s6107_s1 + $0x104] ss:$8 sps:$4 sm:$0xff]  }
  0x6d   :  { %727 = vmatprep.subr.bf16.mxu1 %v4110_v14  ;;  %692 = vmatprep.mubr.bf16.mxu0 %v4009_v1  ;;  %v3828_v14 = vld [vmem:[%s6107_s1 + $0x100] ss:$8 sps:$4 sm:$0xff]  }
  0x6e   :  { %753 = vmatprep.mubr.bf16.mxu1 %v4009_v1 }
  0x6f   :  { %667 = vmatpush1.bf16.msra.mxu0 %v4115_v15  ;;  %v936_v15 = vor.u32 %v935_v10, %v931_v9  ;;  %v4735_v9 = vld [vmem:[%s6108_s0 + $0x90] sm:$0xff]   ;;  %v4740_v10 = vld [vmem:[%s6108_s0 + $0xa8] sm:$0xff]  }
  0x70   :  { %728 = vmatpush1.bf16.msra.mxu1 %v4122_v16  ;;  %668 = vmatprep.subr.bf16.mxu0 %v4127_v17  ;;  %v940_v16 = vrot.slane %v938_v12, 1  ;;  %v4754_v12 = vld [vmem:[%s6107_s1 + $0x264] ss:$8 sps:$4 sm:$0xff]  }
  0x71   :  { %729 = vmatprep.subr.bf16.mxu1 %v4134_v18  ;;  %v942_v18 = vshrl.u32 %v3829_v7, 16 }
  0x72   :  { %v941_v17 = vsel %vm929_vm0, %v936_v15, %v940_v16 }
  0x73   :  { %669 = vmatpush1.bf16.msra.mxu0 %v4139_v19  ;;  %v944_v19 = vor.u32 %v942_v18, %v940_v16  ;;  %v4765_v16 = vld [vmem:[%s6107_s1 + $0x260] ss:$8 sps:$4 sm:$0xff]  }
  0x74   :  { %730 = vmatpush1.bf16.msra.mxu1 %v4144_v20  ;;  %670 = vmatprep.subr.bf16.mxu0 %v4151_v21  ;;  %v3830_v20 = vld [vmem:[%s6108_s0 + $0x68] ss:$0 sps:$4 sm:$0x33]   ;;  %v1067_v21 = vshll.u32 %v4345_v50, 16 }
  0x75   :  { %731 = vmatprep.subr.bf16.mxu1 %v4158_v22  ;;  %v1065_v22 = vshrl.u32 %v4345_v50, 16 }
  0x77   :  { %671 = vmatpush1.bf16.msra.mxu0 %v4165_v23  ;;  %v1069_v23 = vrot.slane %v1067_v21, 1 }
  0x78   :  { %732 = vmatpush1.bf16.msra.mxu1 %v4170_v24  ;;  %672 = vmatprep.subr.bf16.mxu0 %v4177_v25  ;;  %v1072_v24 = vshll.u32 %v3830_v20, 16 }
  0x79   :  { %733 = vmatprep.subr.bf16.mxu1 %v4182_v26  ;;  %v1070_v25 = vor.u32 %v1069_v23, %v1065_v22  ;;  %v3867_v23 = vld [vmem:[%s6108_s0 + $0x98] ss:$0 sps:$4 sm:$0x11]  }
  0x7a   :  { %v1074_v26 = vrot.slane %v1072_v24, 1  ;;  %v4784_v24 = vld [vmem:[%s6108_s0 + $0xb0] ss:$0 sps:$4 sm:$0x11]  }
  0x7b   :  { %673 = vmatpush1.bf16.msra.mxu0 %v4189_v27  ;;  %v4536_v27 = vld [vmem:[%s6107_s1 + $0x1f4] ss:$8 sps:$4 sm:$0xff]  }
  0x7c   :  { %734 = vmatpush1.bf16.msra.mxu1 %v4194_v28  ;;  %674 = vmatprep.subr.bf16.mxu0 %v4201_v29  ;;  %v4539_v28 = vsel %vm929_vm0, %v1070_v25, %v1074_v26  ;;  %v4544_v29 = vld [vmem:[%s6107_s1 + $0x1f0] ss:$8 sps:$4 sm:$0xff]  }
  0x7d   :  { %735 = vmatprep.subr.bf16.mxu1 %v4206_v30  ;;  %v4551_v30 = vld [vmem:[%s6107_s1 + $0x1e4] ss:$8 sps:$4 sm:$0xff]  }
  0x7f   :  { %675 = vmatpush1.bf16.msra.mxu0 %v4211_v31  ;;  %v1076_v31 = vshrl.u32 %v3830_v20, 16 }
  0x80   :  { %736 = vmatpush1.bf16.msra.mxu1 %v4216_v32  ;;  %869 = vmatprep.subr.bf16.mxu0 %v4393_v53  ;;  %v4560_v32 = vld [vmem:[%s6107_s1 + $0x1e0] ss:$8 sps:$4 sm:$0xff]  }
  0x81   :  { %947 = vmatprep.subr.bf16.mxu1 %v4393_v53  ;;  %v4571_v34 = vor.u32 %v1076_v31, %v1074_v26  ;;  %v4793_v26 = vld [vmem:[%s6107_s1 + $0x250] ss:$8 sps:$4 sm:$0xff]  }
  0x82   :  { %693 = vmatmul.mubr.bf16.vlgmr.msra.gmra.mxu0 %v3801_v54 }
  0x83   :  { %754 = vmatmul.mubr.bf16.vlgmr.msra.gmra.mxu1 %v4401_v55  ;;  %870 = vmatpush1.bf16.msra.mxu0 %v4408_v56 }
  0x84   :  { %948 = vmatpush1.bf16.msra.mxu1 %v4408_v56  ;;  %871 = vmatprep.subr.bf16.mxu0 %v4415_v57 }
  0x85   :  { %949 = vmatprep.subr.bf16.mxu1 %v4415_v57  ;;  %702 = vmatprep.mubr.bf16.mxu0 %v4009_v1 }
  0x86   :  { %763 = vmatprep.mubr.bf16.mxu1 %v4009_v1 }
  0x87   :  { %872 = vmatpush1.bf16.msra.mxu0 %v4423_v58 }
  0x88   :  { %950 = vmatpush1.bf16.msra.mxu1 %v4423_v58  ;;  %873 = vmatprep.subr.bf16.mxu0 %v4430_v59 }
  0x89   :  { %951 = vmatprep.subr.bf16.mxu1 %v4430_v59 }
  0x8a   :  { %703 = vmatmul.mubr.bf16.gmra.mxu0 %v3818_v60 }
  0x8b   :  { %764 = vmatmul.mubr.bf16.gmra.mxu1 %v4440_v61  ;;  %874 = vmatpush1.bf16.msra.mxu0 %v4447_v62 }
  0x8c   :  { %952 = vmatpush1.bf16.msra.mxu1 %v4447_v62  ;;  %875 = vmatprep.subr.bf16.mxu0 %v4454_v63 }
  0x8d   :  { %953 = vmatprep.subr.bf16.mxu1 %v4454_v63  ;;  %901 = vmatprep.mubr.bf16.mxu0 %v4009_v1 }
  0x8e   :  { %979 = vmatprep.mubr.bf16.mxu1 %v4009_v1 }
  0x8f   :  { %876 = vmatpush1.bf16.msra.mxu0 %v4462_v0 }
  0x90   :  { %954 = vmatpush1.bf16.msra.mxu1 %v4462_v0  ;;  %877 = vmatprep.subr.bf16.mxu0 %v4469_v2 }
  0x91   :  { %955 = vmatprep.subr.bf16.mxu1 %v4469_v2 }
  0x93   :  { %878 = vmatpush1.bf16.msra.mxu0 %v3817_v3 }
  0x94   :  { %956 = vmatpush1.bf16.msra.mxu1 %v3817_v3  ;;  %879 = vmatprep.subr.bf16.mxu0 %v3820_v4 }
  0x95   :  { %957 = vmatprep.subr.bf16.mxu1 %v3820_v4 }
  0x97   :  { %880 = vmatpush1.bf16.msra.mxu0 %v3822_v6 }
  0x98   :  { %958 = vmatpush1.bf16.msra.mxu1 %v3822_v6  ;;  %881 = vmatprep.subr.bf16.mxu0 %v3823_v8 }
  0x99   :  { %959 = vmatprep.subr.bf16.mxu1 %v3823_v8 }
  0x9b   :  { %882 = vmatpush1.bf16.msra.mxu0 %v3825_v11 }
  0x9c   :  { %960 = vmatpush1.bf16.msra.mxu1 %v3825_v11  ;;  %883 = vmatprep.subr.bf16.mxu0 %v3826_v13 }
  0x9d   :  { %961 = vmatprep.subr.bf16.mxu1 %v3826_v13 }
  0x9f   :  { %884 = vmatpush1.bf16.msra.mxu0 %v3828_v14 }
  0xa0   :  { %962 = vmatpush1.bf16.msra.mxu1 %v3828_v14  ;;  %1004 = vmatprep.subr.bf16.mxu0 %v4393_v53 }
  0xa1   :  { %1081 = vmatprep.subr.bf16.mxu1 %v4393_v53 }
  0xa2   :  { %902 = vmatmul.mubr.bf16.vlgmr.msra.gmra.mxu0 %v4291_v46  ;;  %v4659_v46 = vld [vmem:[%s6108_s0 + $0x30] sm:$0xff]  }
  0xa3   :  { %980 = vmatmul.mubr.bf16.vlgmr.msra.gmra.mxu1 %v941_v17  ;;  %1005 = vmatpush1.bf16.msra.mxu0 %v4408_v56 }
  0xa4   :  { %1082 = vmatpush1.bf16.msra.mxu1 %v4408_v56  ;;  %1006 = vmatprep.subr.bf16.mxu0 %v4415_v57  ;;  %v3857_v56 = vld [vmem:[%s6108_s0 + $0x38] ss:$0 sps:$4 sm:$0x11]  }
  0xa5   :  { %1083 = vmatprep.subr.bf16.mxu1 %v4415_v57  ;;  %911 = vmatprep.mubr.bf16.mxu0 %v4009_v1  ;;  %v4688_v57 = vld [vmem:[%s6108_s0 + $0x50] ss:$0 sps:$4 sm:$0x11]  }
  0xa6   :  { %989 = vmatprep.mubr.bf16.mxu1 %v4009_v1 }
  0xa7   :  { %1007 = vmatpush1.bf16.msra.mxu0 %v4423_v58 }
  0xa8   :  { %1084 = vmatpush1.bf16.msra.mxu1 %v4423_v58  ;;  %1008 = vmatprep.subr.bf16.mxu0 %v4430_v59 }
  0xa9   :  { %1085 = vmatprep.subr.bf16.mxu1 %v4430_v59 }
  0xaa   :  { %912 = vmatmul.mubr.bf16.gmra.mxu0 %v4308_v48 }
  0xab   :  { %990 = vmatmul.mubr.bf16.gmra.mxu1 %v944_v19  ;;  %1009 = vmatpush1.bf16.msra.mxu0 %v4447_v62  ;;  %v4772_v19 = vld [vmem:[%s6107_s1 + $0x254] ss:$8 sps:$4 sm:$0xff]  }
  0xac   :  { %1086 = vmatpush1.bf16.msra.mxu1 %v4447_v62  ;;  %1010 = vmatprep.subr.bf16.mxu0 %v4454_v63 }
  0xad   :  { %1087 = vmatprep.subr.bf16.mxu1 %v4454_v63  ;;  %1036 = vmatprep.mubr.bf16.mxu0 %v4009_v1 }
  0xae   :  { %1113 = vmatprep.mubr.bf16.mxu1 %v4009_v1 }
  0xaf   :  { %1011 = vmatpush1.bf16.msra.mxu0 %v4462_v0 }
  0xb0   :  { %1088 = vmatpush1.bf16.msra.mxu1 %v4462_v0  ;;  %1012 = vmatprep.subr.bf16.mxu0 %v4469_v2 }
  0xb1   :  { %1089 = vmatprep.subr.bf16.mxu1 %v4469_v2 }
  0xb3   :  { %1013 = vmatpush1.bf16.msra.mxu0 %v3817_v3 }
  0xb4   :  { %1090 = vmatpush1.bf16.msra.mxu1 %v3817_v3  ;;  %1014 = vmatprep.subr.bf16.mxu0 %v3820_v4 }
  0xb5   :  { %1091 = vmatprep.subr.bf16.mxu1 %v3820_v4 }
  0xb7   :  { %1015 = vmatpush1.bf16.msra.mxu0 %v3822_v6 }
  0xb8   :  { %1092 = vmatpush1.bf16.msra.mxu1 %v3822_v6  ;;  %1016 = vmatprep.subr.bf16.mxu0 %v3823_v8 }
  0xb9   :  { %1093 = vmatprep.subr.bf16.mxu1 %v3823_v8  ;;  %v4730_v8 = vld [vmem:[%s6107_s1 + $0x274] ss:$8 sps:$4 sm:$0xff]  }
  0xbb   :  { %1017 = vmatpush1.bf16.msra.mxu0 %v3825_v11 }
  0xbc   :  { %1094 = vmatpush1.bf16.msra.mxu1 %v3825_v11  ;;  %1018 = vmatprep.subr.bf16.mxu0 %v3826_v13  ;;  %v4747_v11 = vld [vmem:[%s6107_s1 + $0x270] ss:$8 sps:$4 sm:$0xff]  }
  0xbd   :  { %1095 = vmatprep.subr.bf16.mxu1 %v3826_v13 }
  0xbf   :  { %1019 = vmatpush1.bf16.msra.mxu0 %v3828_v14 }
  0xc0   :  { %1096 = vmatpush1.bf16.msra.mxu1 %v3828_v14  ;;  %1245 = vmatprep.subr.bf16.mxu0 %v4536_v27 }
  0xc1   :  { %1312 = vmatprep.subr.bf16.mxu1 %v4536_v27 }
  0xc2   :  { %1037 = vmatmul.mubr.bf16.vlgmr.msra.gmra.mxu0 %v4401_v55 }
  0xc3   :  { %1114 = vmatmul.mubr.bf16.vlgmr.msra.gmra.mxu1 %v4539_v28  ;;  %1246 = vmatpush1.bf16.msra.mxu0 %v4544_v29 }
  0xc4   :  { %1313 = vmatpush1.bf16.msra.mxu1 %v4544_v29  ;;  %1247 = vmatprep.subr.bf16.mxu0 %v4551_v30 }
  0xc5   :  { %1314 = vmatprep.subr.bf16.mxu1 %v4551_v30  ;;  %1046 = vmatprep.mubr.bf16.mxu0 %v4009_v1 }
  0xc6   :  { %1123 = vmatprep.mubr.bf16.mxu1 %v4009_v1 }
  0xc7   :  { %1248 = vmatpush1.bf16.msra.mxu0 %v4560_v32 }
  0xc8   :  { %1315 = vmatpush1.bf16.msra.mxu1 %v4560_v32  ;;  %1249 = vmatprep.subr.bf16.mxu0 %v4567_v33 }
  0xc9   :  { %1316 = vmatprep.subr.bf16.mxu1 %v4567_v33 }
  0xca   :  { %1047 = vmatmul.mubr.bf16.gmra.mxu0 %v4440_v61 }
  0xcb   :  { %1124 = vmatmul.mubr.bf16.gmra.mxu1 %v4571_v34  ;;  %1250 = vmatpush1.bf16.msra.mxu0 %v4578_v35 }
  0xcc   :  { %1317 = vmatpush1.bf16.msra.mxu1 %v4578_v35  ;;  %1251 = vmatprep.subr.bf16.mxu0 %v4585_v36 }
  0xcd   :  { %1318 = vmatprep.subr.bf16.mxu1 %v4585_v36  ;;  %1277 = vmatprep.mubr.bf16.mxu0 %v4009_v1 }
  0xce   :  { %1344 = vmatprep.mubr.bf16.mxu1 %v4009_v1 }
  0xcf   :  { %1252 = vmatpush1.bf16.msra.mxu0 %v4594_v37 }
  0xd0   :  { %1319 = vmatpush1.bf16.msra.mxu1 %v4594_v37  ;;  %1253 = vmatprep.subr.bf16.mxu0 %v4601_v38 }
  0xd1   :  { %1320 = vmatprep.subr.bf16.mxu1 %v4601_v38 }
  0xd3   :  { %1254 = vmatpush1.bf16.msra.mxu0 %v4610_v39 }
  0xd4   :  { %1321 = vmatpush1.bf16.msra.mxu1 %v4610_v39  ;;  %1255 = vmatprep.subr.bf16.mxu0 %v4617_v40 }
  0xd5   :  { %1322 = vmatprep.subr.bf16.mxu1 %v4617_v40 }
  0xd7   :  { %1256 = vmatpush1.bf16.msra.mxu0 %v4624_v41 }
  0xd8   :  { %1323 = vmatpush1.bf16.msra.mxu1 %v4624_v41  ;;  %1257 = vmatprep.subr.bf16.mxu0 %v4631_v42 }
  0xd9   :  { %1324 = vmatprep.subr.bf16.mxu1 %v4631_v42 }
  0xdb   :  { %1258 = vmatpush1.bf16.msra.mxu0 %v4638_v43 }
  0xdc   :  { %1325 = vmatpush1.bf16.msra.mxu1 %v4638_v43  ;;  %1259 = vmatprep.subr.bf16.mxu0 %v4645_v44 }
  0xdd   :  { %1326 = vmatprep.subr.bf16.mxu1 %v4645_v44 }
  0xdf   :  { %1260 = vmatpush1.bf16.msra.mxu0 %v4652_v45 }
  0xe0   :  { %1327 = vmatpush1.bf16.msra.mxu1 %v4652_v45  ;;  %1379 = vmatprep.subr.bf16.mxu0 %v4536_v27 }
  0xe1   :  { %1446 = vmatprep.subr.bf16.mxu1 %v4536_v27 }
  0xe2   :  { %v248_v48 = vpop.f32.mrf.mxu0  ;;  %1278 = vmatmul.mubr.bf16.vlgmr.msra.gmra.mxu0 %v4659_v46 }
  0xe3   :  { %v389_v49 = vpop.f32.mrf.mxu1  ;;  %1345 = vmatmul.mubr.bf16.vlgmr.msra.gmra.mxu1 %v4664_v47  ;;  %1380 = vmatpush1.bf16.msra.mxu0 %v4544_v29 }
  0xe4   :  { %v4672_v50 = vadd.f32 %v389_v49, %v248_v48  ;;  %1447 = vmatpush1.bf16.msra.mxu1 %v4544_v29  ;;  %v250_v51 = vpop.f32.mrf.mxu0  ;;  %1381 = vmatprep.subr.bf16.mxu0 %v4551_v30  ;;  %v4846_v48 = vld [vmem:[%s6107_s1 + $0x220] ss:$8 sps:$4 sm:$0xff]   ;;  %v4853_v49 = vld [vmem:[%s6107_s1 + $0x214] ss:$8 sps:$4 sm:$0xff]  }
  0xe5   :  { %v391_v52 = vpop.f32.mrf.mxu1  ;;  %1448 = vmatprep.subr.bf16.mxu1 %v4551_v30  ;;  %1287 = vmatprep.mubr.bf16.mxu0 %v4009_v1  ;;  %v4804_v30 = vld [vmem:[%s6107_s1 + $0x244] ss:$8 sps:$4 sm:$0xff]  }
  0xe6   :  { %v4678_v53 = vadd.f32 %v391_v52, %v250_v51  ;;  %1354 = vmatprep.mubr.bf16.mxu1 %v4009_v1  ;;  %v252_v54 = vpop.f32.mrf.mxu0  ;;  %v4860_v51 = vld [vmem:[%s6107_s1 + $0x210] ss:$8 sps:$4 sm:$0xff]   ;;  %v4867_v52 = vld [vmem:[%s6107_s1 + $0x204] ss:$8 sps:$4 sm:$0xff]  }
  0xe7   :  { %v393_v55 = vpop.f32.mrf.mxu1  ;;  %1382 = vmatpush1.bf16.msra.mxu0 %v4560_v32 }
  0xe8   :  { %v4690_v58 = vadd.f32 %v393_v55, %v252_v54  ;;  %1449 = vmatpush1.bf16.msra.mxu1 %v4560_v32  ;;  %v4694_v59 = vpop.f32.mrf.mxu0  ;;  %1383 = vmatprep.subr.bf16.mxu0 %v4567_v33  ;;  %v4874_v54 = vld [vmem:[%s6107_s1 + $0x200] ss:$8 sps:$4 sm:$0xff]  }
  0xe9   :  { %v4696_v60 = vpop.f32.mrf.mxu1  ;;  %1450 = vmatprep.subr.bf16.mxu1 %v4567_v33  ;;  %v4812_v33 = vld [vmem:[%s6107_s1 + $0x240] ss:$8 sps:$4 sm:$0xff]  }
  0xea   :  { %1288 = vmatmul.mubr.bf16.gmra.mxu0 %v3857_v56  ;;  %v258_v61 = vpop.f32.mrf.mxu0  ;;  %v3887_v55 = vld [vmem:[%s6108_s0 + $0x3c] sm:$0xff]   ;;  %v3888_v56 = vld [vmem:[%s6108_s0 + $0x54] sm:$0xff]  }
  0xeb   :  { %1355 = vmatmul.mubr.bf16.gmra.mxu1 %v4688_v57  ;;  %v399_v62 = vpop.f32.mrf.mxu1  ;;  %1384 = vmatpush1.bf16.msra.mxu0 %v4578_v35 }
  0xec   :  { %1451 = vmatpush1.bf16.msra.mxu1 %v4578_v35  ;;  %v4703_v63 = vadd.f32 %v399_v62, %v258_v61  ;;  %1385 = vmatprep.subr.bf16.mxu0 %v4585_v36  ;;  %v260_v0 = vpop.f32.mrf.mxu0 }
  0xed   :  { %1452 = vmatprep.subr.bf16.mxu1 %v4585_v36  ;;  %v401_v2 = vpop.f32.mrf.mxu1  ;;  %1411 = vmatprep.mubr.bf16.mxu0 %v4009_v1  ;;  %v4821_v36 = vld [vmem:[%s6107_s1 + $0x234] ss:$8 sps:$4 sm:$0xff]  }
  0xee   :  { %v4707_v3 = vadd.f32 %v401_v2, %v260_v0  ;;  %1478 = vmatprep.mubr.bf16.mxu1 %v4009_v1  ;;  %v262_v4 = vpop.f32.mrf.mxu0 }
  0xef   :  { %v403_v5 = vpop.f32.mrf.mxu1  ;;  %1386 = vmatpush1.bf16.msra.mxu0 %v4594_v37 }
  0xf0   :  { %1453 = vmatpush1.bf16.msra.mxu1 %v4594_v37  ;;  %1387 = vmatprep.subr.bf16.mxu0 %v4601_v38  ;;  %v263_v6 = vpop.f32.mrf.mxu0 }
  0xf1   :  { %1454 = vmatprep.subr.bf16.mxu1 %v4601_v38  ;;  %v404_v7 = vpop.f32.mrf.mxu1 }
  0xf3   :  { %1388 = vmatpush1.bf16.msra.mxu0 %v4610_v39 }
  0xf4   :  { %1455 = vmatpush1.bf16.msra.mxu1 %v4610_v39  ;;  %1389 = vmatprep.subr.bf16.mxu0 %v4617_v40 }
  0xf5   :  { %1456 = vmatprep.subr.bf16.mxu1 %v4617_v40 }
  0xf7   :  { %1390 = vmatpush1.bf16.msra.mxu0 %v4624_v41 }
  0xf8   :  { %1457 = vmatpush1.bf16.msra.mxu1 %v4624_v41  ;;  %1391 = vmatprep.subr.bf16.mxu0 %v4631_v42 }
  0xf9   :  { %1458 = vmatprep.subr.bf16.mxu1 %v4631_v42  ;;  %v4832_v42 = vld [vmem:[%s6107_s1 + $0x230] ss:$8 sps:$4 sm:$0xff]  }
  0xfb   :  { %1392 = vmatpush1.bf16.msra.mxu0 %v4638_v43 }
  0xfc   :  { %1459 = vmatpush1.bf16.msra.mxu1 %v4638_v43  ;;  %1393 = vmatprep.subr.bf16.mxu0 %v4645_v44  ;;  %v4839_v43 = vld [vmem:[%s6107_s1 + $0x224] ss:$8 sps:$4 sm:$0xff]  }
  0xfd   :  { %1460 = vmatprep.subr.bf16.mxu1 %v4645_v44 }
  0xff   :  { %1394 = vmatpush1.bf16.msra.mxu0 %v4652_v45 }
 0x100   :  { %1461 = vmatpush1.bf16.msra.mxu1 %v4652_v45  ;;  %1610 = vmatprep.subr.bf16.mxu0 %v4730_v8 }
 0x101   :  { %1677 = vmatprep.subr.bf16.mxu1 %v4730_v8 }
 0x102   :  { %v450_v13 = vpop.f32.mrf.mxu0  ;;  %1412 = vmatmul.mubr.bf16.vlgmr.msra.gmra.mxu0 %v4735_v9 }
 0x103   :  { %v511_v14 = vpop.f32.mrf.mxu1  ;;  %1479 = vmatmul.mubr.bf16.vlgmr.msra.gmra.mxu1 %v4740_v10  ;;  %1611 = vmatpush1.bf16.msra.mxu0 %v4747_v11 }
 0x104   :  { %v4758_v15 = vadd.f32 %v511_v14, %v450_v13  ;;  %1678 = vmatpush1.bf16.msra.mxu1 %v4747_v11  ;;  %v452_v17 = vpop.f32.mrf.mxu0  ;;  %1612 = vmatprep.subr.bf16.mxu0 %v4754_v12 }
 0x105   :  { %v513_v18 = vpop.f32.mrf.mxu1  ;;  %1679 = vmatprep.subr.bf16.mxu1 %v4754_v12  ;;  %1421 = vmatprep.mubr.bf16.mxu0 %v4009_v1 }
 0x106   :  { %v4774_v20 = vadd.f32 %v513_v18, %v452_v17  ;;  %1488 = vmatprep.mubr.bf16.mxu1 %v4009_v1  ;;  %v454_v21 = vpop.f32.mrf.mxu0 }
 0x107   :  { %v515_v22 = vpop.f32.mrf.mxu1  ;;  %1613 = vmatpush1.bf16.msra.mxu0 %v4765_v16 }
 0x108   :  { %v4786_v25 = vadd.f32 %v515_v22, %v454_v21  ;;  %1680 = vmatpush1.bf16.msra.mxu1 %v4765_v16  ;;  %v4795_v27 = vpop.f32.mrf.mxu0  ;;  %1614 = vmatprep.subr.bf16.mxu0 %v4772_v19 }
 0x109   :  { %v4797_v29 = vpop.f32.mrf.mxu1  ;;  %1681 = vmatprep.subr.bf16.mxu1 %v4772_v19 }
 0x10a   :  { %1422 = vmatmul.mubr.bf16.gmra.mxu0 %v3867_v23  ;;  %v460_v31 = vpop.f32.mrf.mxu0 }
 0x10b   :  { %1489 = vmatmul.mubr.bf16.gmra.mxu1 %v4784_v24  ;;  %v521_v32 = vpop.f32.mrf.mxu1  ;;  %1615 = vmatpush1.bf16.msra.mxu0 %v4793_v26 }
 0x10c   :  { %1682 = vmatpush1.bf16.msra.mxu1 %v4793_v26  ;;  %v4814_v35 = vadd.f32 %v521_v32, %v460_v31  ;;  %1616 = vmatprep.subr.bf16.mxu0 %v4804_v30  ;;  %v462_v37 = vpop.f32.mrf.mxu0  ;;  %v4943_v32 = vld [vmem:[%s6107_s1 + $0x2f4] ss:$8 sps:$4 sm:$0xff]  }
 0x10d   :  { %1683 = vmatprep.subr.bf16.mxu1 %v4804_v30  ;;  %v523_v38 = vpop.f32.mrf.mxu1  ;;  %1642 = vmatprep.mubr.bf16.mxu0 %v4009_v1 }
 0x10e   :  { %v4823_v39 = vadd.f32 %v523_v38, %v462_v37  ;;  %1709 = vmatprep.mubr.bf16.mxu1 %v4009_v1  ;;  %v464_v40 = vpop.f32.mrf.mxu0  ;;  %v4956_v37 = vld [vmem:[%s6107_s1 + $0x2f0] ss:$8 sps:$4 sm:$0xff]   ;;  %v4963_v38 = vld [vmem:[%s6107_s1 + $0x2e4] ss:$8 sps:$4 sm:$0xff]  }
 0x10f   :  { %v525_v41 = vpop.f32.mrf.mxu1  ;;  %1617 = vmatpush1.bf16.msra.mxu0 %v4812_v33 }
 0x110   :  { %1684 = vmatpush1.bf16.msra.mxu1 %v4812_v33  ;;  %1618 = vmatprep.subr.bf16.mxu0 %v4821_v36  ;;  %v465_v44 = vpop.f32.mrf.mxu0 }
 0x111   :  { %1685 = vmatprep.subr.bf16.mxu1 %v4821_v36  ;;  %v526_v45 = vpop.f32.mrf.mxu1 }
 0x113   :  { %1619 = vmatpush1.bf16.msra.mxu0 %v4832_v42 }
 0x114   :  { %1686 = vmatpush1.bf16.msra.mxu1 %v4832_v42  ;;  %1620 = vmatprep.subr.bf16.mxu0 %v4839_v43 }
 0x115   :  { %1687 = vmatprep.subr.bf16.mxu1 %v4839_v43 }
 0x117   :  { %1621 = vmatpush1.bf16.msra.mxu0 %v4846_v48 }
 0x118   :  { %1688 = vmatpush1.bf16.msra.mxu1 %v4846_v48  ;;  %1622 = vmatprep.subr.bf16.mxu0 %v4853_v49 }
 0x119   :  { %1689 = vmatprep.subr.bf16.mxu1 %v4853_v49 }
 0x11b   :  { %1623 = vmatpush1.bf16.msra.mxu0 %v4860_v51 }
 0x11c   :  { %1690 = vmatpush1.bf16.msra.mxu1 %v4860_v51  ;;  %1624 = vmatprep.subr.bf16.mxu0 %v4867_v52 }
 0x11d   :  { %1691 = vmatprep.subr.bf16.mxu1 %v4867_v52 }
 0x11f   :  { %1625 = vmatpush1.bf16.msra.mxu0 %v4874_v54 }
 0x120   :  { %1692 = vmatpush1.bf16.msra.mxu1 %v4874_v54  ;;  %1744 = vmatprep.subr.bf16.mxu0 %v4730_v8 }
 0x121   :  { %1811 = vmatprep.subr.bf16.mxu1 %v4730_v8  ;;  %v3889_v8 = vld [vmem:[%s6108_s0 + $0x44] ss:$0 sps:$4 sm:$0x11]  }
 0x122   :  { %v572_v61 = vpop.f32.mrf.mxu0  ;;  %1643 = vmatmul.mubr.bf16.vlgmr.msra.gmra.mxu0 %v3887_v55  ;;  %v3900_v55 = vld [vmem:[%s6108_s0 + $0xbc] ss:$0 sps:$4 sm:$0x11]  }
 0x123   :  { %v633_v62 = vpop.f32.mrf.mxu1  ;;  %1710 = vmatmul.mubr.bf16.vlgmr.msra.gmra.mxu1 %v3888_v56  ;;  %1745 = vmatpush1.bf16.msra.mxu0 %v4747_v11 }
 0x124   :  { %v4888_v0 = vadd.f32 %v633_v62, %v572_v61  ;;  %1812 = vmatpush1.bf16.msra.mxu1 %v4747_v11  ;;  %v574_v2 = vpop.f32.mrf.mxu0  ;;  %1746 = vmatprep.subr.bf16.mxu0 %v4754_v12  ;;  %v3890_v11 = vld [vmem:[%s6108_s0 + $0x5c] ss:$0 sps:$4 sm:$0x11]   ;;  %v4998_v61 = vld [vmem:[%s6107_s1 + $0x2d0] ss:$8 sps:$4 sm:$0xff]  }
 0x125   :  { %v635_v4 = vpop.f32.mrf.mxu1  ;;  %1813 = vmatprep.subr.bf16.mxu1 %v4754_v12  ;;  %1652 = vmatprep.mubr.bf16.mxu0 %v4009_v1 }
 0x126   :  { %v4894_v5 = vadd.f32 %v635_v4, %v574_v2  ;;  %1719 = vmatprep.mubr.bf16.mxu1 %v4009_v1  ;;  %v576_v6 = vpop.f32.mrf.mxu0  ;;  %v5009_v4 = vld [vmem:[%s6107_s1 + $0x2c4] ss:$8 sps:$4 sm:$0xff]  }
 0x127   :  { %v637_v7 = vpop.f32.mrf.mxu1  ;;  %1747 = vmatpush1.bf16.msra.mxu0 %v4765_v16 }
 0x128   :  { %v4904_v13 = vadd.f32 %v637_v7, %v576_v6  ;;  %1814 = vmatpush1.bf16.msra.mxu1 %v4765_v16  ;;  %v4908_v12 = vpop.f32.mrf.mxu0  ;;  %1748 = vmatprep.subr.bf16.mxu0 %v4772_v19 }
 0x129   :  { %v4910_v14 = vpop.f32.mrf.mxu1  ;;  %1815 = vmatprep.subr.bf16.mxu1 %v4772_v19 }
 0x12a   :  { %1653 = vmatmul.mubr.bf16.gmra.mxu0 %v3889_v8  ;;  %v582_v17 = vpop.f32.mrf.mxu0  ;;  %v5016_v8 = vld [vmem:[%s6107_s1 + $0x2c0] ss:$8 sps:$4 sm:$0xff]  }
 0x12b   :  { %1720 = vmatmul.mubr.bf16.gmra.mxu1 %v3890_v11  ;;  %v643_v18 = vpop.f32.mrf.mxu1  ;;  %1749 = vmatpush1.bf16.msra.mxu0 %v4793_v26 }
 0x12c   :  { %1816 = vmatpush1.bf16.msra.mxu1 %v4793_v26  ;;  %v4916_v21 = vadd.f32 %v643_v18, %v582_v17  ;;  %1750 = vmatprep.subr.bf16.mxu0 %v4804_v30  ;;  %v584_v16 = vpop.f32.mrf.mxu0  ;;  %v5025_v17 = vld [vmem:[%s6107_s1 + $0x2b4] ss:$8 sps:$4 sm:$0xff]  }
 0x12d   :  { %1817 = vmatprep.subr.bf16.mxu1 %v4804_v30  ;;  %v645_v22 = vpop.f32.mrf.mxu1  ;;  %1776 = vmatprep.mubr.bf16.mxu0 %v4009_v1 }
 0x12e   :  { %v4920_v23 = vadd.f32 %v645_v22, %v584_v16  ;;  %1843 = vmatprep.mubr.bf16.mxu1 %v4009_v1  ;;  %v586_v19 = vpop.f32.mrf.mxu0 }
 0x12f   :  { %v647_v31 = vpop.f32.mrf.mxu1  ;;  %1751 = vmatpush1.bf16.msra.mxu0 %v4812_v33 }
 0x130   :  { %1818 = vmatpush1.bf16.msra.mxu1 %v4812_v33  ;;  %1752 = vmatprep.subr.bf16.mxu0 %v4821_v36  ;;  %v587_v26 = vpop.f32.mrf.mxu0  ;;  %v3891_v33 = vld [vmem:[%s6108_s0 + $0x9c] sm:$0xff]  }
 0x131   :  { %1819 = vmatprep.subr.bf16.mxu1 %v4821_v36  ;;  %v648_v30 = vpop.f32.mrf.mxu1  ;;  %v3892_v36 = vld [vmem:[%s6108_s0 + $0xb4] sm:$0xff]  }
 0x132   :  { %v5036_v26 = vld [vmem:[%s6107_s1 + $0x2b0] ss:$8 sps:$4 sm:$0xff]   ;;  %v5043_v30 = vld [vmem:[%s6107_s1 + $0x2a4] ss:$8 sps:$4 sm:$0xff]  }
 0x133   :  { %1753 = vmatpush1.bf16.msra.mxu0 %v4832_v42 }
 0x134   :  { %1820 = vmatpush1.bf16.msra.mxu1 %v4832_v42  ;;  %1754 = vmatprep.subr.bf16.mxu0 %v4839_v43 }
 0x135   :  { %1821 = vmatprep.subr.bf16.mxu1 %v4839_v43  ;;  %v4972_v43 = vld [vmem:[%s6107_s1 + $0x2e0] ss:$8 sps:$4 sm:$0xff]  }
 0x137   :  { %1755 = vmatpush1.bf16.msra.mxu0 %v4846_v48 }
 0x138   :  { %1822 = vmatpush1.bf16.msra.mxu1 %v4846_v48  ;;  %1756 = vmatprep.subr.bf16.mxu0 %v4853_v49  ;;  %v4979_v48 = vld [vmem:[%s6107_s1 + $0x2d4] ss:$8 sps:$4 sm:$0xff]  }
 0x139   :  { %1823 = vmatprep.subr.bf16.mxu1 %v4853_v49 }
 0x13b   :  { %1757 = vmatpush1.bf16.msra.mxu0 %v4860_v51 }
 0x13c   :  { %1824 = vmatpush1.bf16.msra.mxu1 %v4860_v51  ;;  %1758 = vmatprep.subr.bf16.mxu0 %v4867_v52 }
 0x13d   :  { %1825 = vmatprep.subr.bf16.mxu1 %v4867_v52 }
 0x13f   :  { %1759 = vmatpush1.bf16.msra.mxu0 %v4874_v54 }
 0x140   :  { %1826 = vmatpush1.bf16.msra.mxu1 %v4874_v54  ;;  %1965 = vmatprep.subr.bf16.mxu0 %v4943_v32  ;;  %v3899_v54 = vld [vmem:[%s6108_s0 + $0xa4] ss:$0 sps:$4 sm:$0x11]  }
 0x141   :  { %2042 = vmatprep.subr.bf16.mxu1 %v4943_v32 }
 0x142   :  { %v694_v40 = vpop.f32.mrf.mxu0  ;;  %1777 = vmatmul.mubr.bf16.vlgmr.msra.gmra.mxu0 %v3891_v33 }
 0x143   :  { %v755_v41 = vpop.f32.mrf.mxu1  ;;  %1844 = vmatmul.mubr.bf16.vlgmr.msra.gmra.mxu1 %v3892_v36  ;;  %1966 = vmatpush1.bf16.msra.mxu0 %v4956_v37 }
 0x144   :  { %v4965_v42 = vadd.f32 %v755_v41, %v694_v40  ;;  %2043 = vmatpush1.bf16.msra.mxu1 %v4956_v37  ;;  %v696_v44 = vpop.f32.mrf.mxu0  ;;  %1967 = vmatprep.subr.bf16.mxu0 %v4963_v38  ;;  %v5050_v40 = vld [vmem:[%s6107_s1 + $0x2a0] ss:$8 sps:$4 sm:$0xff]   ;;  %v3919_v41 = vld [vmem:[%s6108_s0 + $0x38] ss:$0 sps:$4 sm:$0x33]  }
 0x145   :  { %v757_v45 = vpop.f32.mrf.mxu1  ;;  %2044 = vmatprep.subr.bf16.mxu1 %v4963_v38  ;;  %1786 = vmatprep.mubr.bf16.mxu0 %v4009_v1 }
 0x146   :  { %v4981_v49 = vadd.f32 %v757_v45, %v696_v44  ;;  %1853 = vmatprep.mubr.bf16.mxu1 %v4009_v1  ;;  %v698_v51 = vpop.f32.mrf.mxu0  ;;  %v2028_v44 = vshll.u32 %v4659_v46, 16  ;;  %v5061_v45 = vld [vmem:[%s6107_s1 + $0x294] ss:$8 sps:$4 sm:$0xff]  }
 0x147   :  { %v759_v52 = vpop.f32.mrf.mxu1  ;;  %1968 = vmatpush1.bf16.msra.mxu0 %v4972_v43 }
 0x148   :  { %v4991_v56 = vadd.f32 %v759_v52, %v698_v51  ;;  %2045 = vmatpush1.bf16.msra.mxu1 %v4972_v43  ;;  %v5000_v62 = vpop.f32.mrf.mxu0  ;;  %1969 = vmatprep.subr.bf16.mxu0 %v4979_v48  ;;  %v5068_v51 = vld [vmem:[%s6107_s1 + $0x290] ss:$8 sps:$4 sm:$0xff]   ;;  %v2026_v52 = vshrl.u32 %v4659_v46, 16 }
 0x149   :  { %v5002_v2 = vpop.f32.mrf.mxu1  ;;  %2046 = vmatprep.subr.bf16.mxu1 %v4979_v48 }
 0x14a   :  { %1787 = vmatmul.mubr.bf16.gmra.mxu0 %v3899_v54  ;;  %v704_v6 = vpop.f32.mrf.mxu0  ;;  %v2030_v54 = vrot.slane %v2028_v44, 1 }
 0x14b   :  { %1854 = vmatmul.mubr.bf16.gmra.mxu1 %v3900_v55  ;;  %v765_v7 = vpop.f32.mrf.mxu1  ;;  %1970 = vmatpush1.bf16.msra.mxu0 %v4998_v61  ;;  %v2033_v55 = vshll.u32 %v3919_v41, 16 }
 0x14c   :  { %2047 = vmatpush1.bf16.msra.mxu1 %v4998_v61  ;;  %v5018_v11 = vadd.f32 %v765_v7, %v704_v6  ;;  %1971 = vmatprep.subr.bf16.mxu0 %v5009_v4  ;;  %v706_v18 = vpop.f32.mrf.mxu0  ;;  %v5076_v6 = vld [vmem:[%s6107_s1 + $0x284] ss:$8 sps:$4 sm:$0xff]   ;;  %v5083_v7 = vld [vmem:[%s6107_s1 + $0x280] ss:$8 sps:$4 sm:$0xff]   ;;  %v2031_v46 = vor.u32 %v2030_v54, %v2026_v52 }
 0x14d   :  { %2048 = vmatprep.subr.bf16.mxu1 %v5009_v4  ;;  %v767_v16 = vpop.f32.mrf.mxu1  ;;  %1997 = vmatprep.mubr.bf16.mxu0 %v4009_v1 }
 0x14e   :  { %v5027_v22 = vadd.f32 %v767_v16, %v706_v18  ;;  %2074 = vmatprep.mubr.bf16.mxu1 %v4009_v1  ;;  %v708_v19 = vpop.f32.mrf.mxu0  ;;  %v2035_v18 = vrot.slane %v2033_v55, 1 }
 0x14f   :  { %v769_v31 = vpop.f32.mrf.mxu1  ;;  %1972 = vmatpush1.bf16.msra.mxu0 %v5016_v8 }
 0x150   :  { %2049 = vmatpush1.bf16.msra.mxu1 %v5016_v8  ;;  %1973 = vmatprep.subr.bf16.mxu0 %v5025_v17  ;;  %v709_v33 = vpop.f32.mrf.mxu0  ;;  %v2036_v16 = vsel %vm929_vm0, %v2031_v46, %v2035_v18 }
 0x151   :  { %2050 = vmatprep.subr.bf16.mxu1 %v5025_v17  ;;  %v770_v36 = vpop.f32.mrf.mxu1  ;;  %v2037_v33 = vshrl.u32 %v3919_v41, 16 }
 0x153   :  { %1974 = vmatpush1.bf16.msra.mxu0 %v5036_v26  ;;  %v2039_v41 = vor.u32 %v2037_v33, %v2035_v18 }
 0x154   :  { %2051 = vmatpush1.bf16.msra.mxu1 %v5036_v26  ;;  %1975 = vmatprep.subr.bf16.mxu0 %v5043_v30 }
 0x155   :  { %2052 = vmatprep.subr.bf16.mxu1 %v5043_v30 }
 0x157   :  { %1976 = vmatpush1.bf16.msra.mxu0 %v5050_v40 }
 0x158   :  { %2053 = vmatpush1.bf16.msra.mxu1 %v5050_v40  ;;  %1977 = vmatprep.subr.bf16.mxu0 %v5061_v45 }
 0x159   :  { %2054 = vmatprep.subr.bf16.mxu1 %v5061_v45 }
 0x15b   :  { %1978 = vmatpush1.bf16.msra.mxu0 %v5068_v51 }
 0x15c   :  { %2055 = vmatpush1.bf16.msra.mxu1 %v5068_v51  ;;  %1979 = vmatprep.subr.bf16.mxu0 %v5076_v6 }
 0x15d   :  { %2056 = vmatprep.subr.bf16.mxu1 %v5076_v6 }
 0x15f   :  { %1980 = vmatpush1.bf16.msra.mxu0 %v5083_v7 }
 0x160   :  { %2057 = vmatpush1.bf16.msra.mxu1 %v5083_v7  ;;  %2099 = vmatprep.subr.bf16.mxu0 %v4943_v32 }
 0x161   :  { %2176 = vmatprep.subr.bf16.mxu1 %v4943_v32 }
 0x162   :  { %v903_v19 = vpop.f32.mrf.mxu0  ;;  %1998 = vmatmul.mubr.bf16.vlgmr.msra.gmra.mxu0 %v4664_v47 }
 0x163   :  { %v981_v31 = vpop.f32.mrf.mxu1  ;;  %2075 = vmatmul.mubr.bf16.vlgmr.msra.gmra.mxu1 %v2036_v16  ;;  %v5094_v36 = vadd.f32 %v903_v19, %v4672_v50  ;;  %2100 = vmatpush1.bf16.msra.mxu0 %v4956_v37  ;;  %v5157_v19 = vld [vmem:[%s6108_s0 + $0x98] ss:$0 sps:$4 sm:$0x33]  }
 0x164   :  { %v5097_v44 = vadd.f32 %v981_v31, %v4758_v15  ;;  %2177 = vmatpush1.bf16.msra.mxu1 %v4956_v37  ;;  %v905_v52 = vpop.f32.mrf.mxu0  ;;  %2101 = vmatprep.subr.bf16.mxu0 %v4963_v38  ;;  %v2162_v31 = vshll.u32 %v4735_v9, 16 }
 0x165   :  { %v983_v54 = vpop.f32.mrf.mxu1  ;;  %2178 = vmatprep.subr.bf16.mxu1 %v4963_v38  ;;  %v5104_v47 = vadd.f32 %v905_v52, %v4678_v53  ;;  %2007 = vmatprep.mubr.bf16.mxu0 %v4009_v1  ;;  %v3416_v52 = vld [vmem:[%s6108_s0 + $0x24] sm:$0xe] }
 0x166   :  { %v5107_v32 = vadd.f32 %v983_v54, %v4774_v20  ;;  %2084 = vmatprep.mubr.bf16.mxu1 %v4009_v1  ;;  %v907_v50 = vpop.f32.mrf.mxu0  ;;  %v2164_v54 = vrot.slane %v2162_v31, 1 }
 0x167   :  { %v985_v15 = vpop.f32.mrf.mxu1  ;;  %v5112_v37 = vadd.f32 %v907_v50, %v4690_v58  ;;  %2102 = vmatpush1.bf16.msra.mxu0 %v4972_v43  ;;  %v2167_v50 = vshll.u32 %v5157_v19, 16 }
 0x168   :  { %v5115_v55 = vadd.f32 %v985_v15, %v4786_v25  ;;  %2179 = vmatpush1.bf16.msra.mxu1 %v4972_v43  ;;  %v5119_v53 = vpop.f32.mrf.mxu0  ;;  %2103 = vmatprep.subr.bf16.mxu0 %v4979_v48  ;;  %v3998_v15 = vld [vmem:[%s6108_s0 + $0x28] sm:$0xf] }
 0x169   :  { %v5121_v20 = vpop.f32.mrf.mxu1  ;;  %2180 = vmatprep.subr.bf16.mxu1 %v4979_v48 }
 0x16a   :  { %v913_v38 = vpop.f32.mrf.mxu0  ;;  %2008 = vmatmul.mubr.bf16.gmra.mxu0 %v4688_v57  ;;  %v3412_v57 = vld [vmem:[%s6108_s0 + $0xc] sm:$0xe] }
 0x16b   :  { %v991_v46 = vpop.f32.mrf.mxu1  ;;  %2085 = vmatmul.mubr.bf16.gmra.mxu1 %v2039_v41  ;;  %v5127_v58 = vadd.f32 %v913_v38, %v4703_v63  ;;  %2104 = vmatpush1.bf16.msra.mxu0 %v4998_v61 }
 0x16c   :  { %v5130_v25 = vadd.f32 %v991_v46, %v4814_v35  ;;  %2181 = vmatpush1.bf16.msra.mxu1 %v4998_v61  ;;  %v915_v43 = vpop.f32.mrf.mxu0  ;;  %2105 = vmatprep.subr.bf16.mxu0 %v5009_v4 }
 0x16d   :  { %v993_v18 = vpop.f32.mrf.mxu1  ;;  %2182 = vmatprep.subr.bf16.mxu1 %v5009_v4  ;;  %v5140_v63 = vadd.f32 %v915_v43, %v4707_v3  ;;  %2131 = vmatprep.mubr.bf16.mxu0 %v4009_v1  ;;  %v3997_v4 = vld [vmem:[%s6108_s0 + $0x10] sm:$0xf]  ;;  %v2169_v43 = vrot.slane %v2167_v50, 1  ;;  %v5206_v50 = vld [vmem:[%s6107_s1 + $0x364] ss:$8 sps:$4 sm:$0xff]  }
 0x16e   :  { %v5143_v35 = vadd.f32 %v993_v18, %v4823_v39  ;;  %2208 = vmatprep.mubr.bf16.mxu1 %v4009_v1  ;;  %v917_v48 = vpop.f32.mrf.mxu0  ;;  %v3698_v16 = vcombine.low %v3412_v57, %v3997_v4 }
 0x16f   :  { %v995_v61 = vpop.f32.mrf.mxu1  ;;  %2106 = vmatpush1.bf16.msra.mxu0 %v5016_v8 }
 0x170   :  { %2183 = vmatpush1.bf16.msra.mxu1 %v5016_v8  ;;  %2107 = vmatprep.subr.bf16.mxu0 %v5025_v17  ;;  %v918_v3 = vpop.f32.mrf.mxu0  ;;  %v2827_v8 = vshrl.u32 %v3698_v16, 16  ;;  %v2830_v33 = vshll.u32 %v3698_v16, 16 }
 0x171   :  { %2184 = vmatprep.subr.bf16.mxu1 %v5025_v17  ;;  %v996_v39 = vpop.f32.mrf.mxu1  ;;  %v2160_v17 = vshrl.u32 %v4735_v9, 16  ;;  %v3971_v9 = vld [vmem:[%s6108_s0 + $0x14] ss:$0 sps:$4 sm:$0x77]  }
 0x172   :  { %v2829_v41 = vrot.slane %v2827_v8, 1  ;;  %v2832_v38 = vrot.slane %v2830_v33, 2  ;;  %v2838_v18 = vshll.u32 %v3971_v9, 16 }
 0x173   :  { %2108 = vmatpush1.bf16.msra.mxu0 %v5036_v26  ;;  %v2165_v46 = vor.u32 %v2164_v54, %v2160_v17 }
 0x174   :  { %2185 = vmatpush1.bf16.msra.mxu1 %v5036_v26  ;;  %2109 = vmatprep.subr.bf16.mxu0 %v5043_v30  ;;  %v3700_v26 = vcombine.low %v3416_v52, %v3998_v15  ;;  %v2833_v61 = vor.u32 %v2832_v38, %v2829_v41  ;;  %v2840_v39 = vrot.slane %v2838_v18, 2  ;;  %v2171_v38 = vshrl.u32 %v5157_v19, 16 }
 0x175   :  { %2186 = vmatprep.subr.bf16.mxu1 %v5043_v30  ;;  %v3972_v30 = vld [vmem:[%s6108_s0 + $0x2c] ss:$0 sps:$4 sm:$0x77]   ;;  %v2170_v52 = vsel %vm929_vm0, %v2165_v46, %v2169_v43 }
 0x176   :  { %v2909_v57 = vshrl.u32 %v3700_v26, 16  ;;  %v2912_v48 = vshll.u32 %v3700_v26, 16  ;;  %v2917_v4 = vshrl.u32 %v3972_v30, 16  ;;  %v2920_v16 = vshll.u32 %v3972_v30, 16 }
 0x177   :  { %2110 = vmatpush1.bf16.msra.mxu0 %v5050_v40 }
 0x178   :  { %2187 = vmatpush1.bf16.msra.mxu1 %v5050_v40  ;;  %2111 = vmatprep.subr.bf16.mxu0 %v5061_v45  ;;  %v2835_v40 = vshrl.u32 %v3971_v9, 16  ;;  %v2911_v31 = vrot.slane %v2909_v57, 1  ;;  %v2919_v8 = vrot.slane %v2917_v4, 1  ;;  %v2922_v33 = vrot.slane %v2920_v16, 2 }
 0x179   :  { %2188 = vmatprep.subr.bf16.mxu1 %v5061_v45  ;;  %v5189_v45 = vld [vmem:[%s6107_s1 + $0x374] ss:$8 sps:$4 sm:$0xff]  }
 0x17a   :  { %v2837_v3 = vrot.slane %v2835_v40, 1 }
 0x17b   :  { %2112 = vmatpush1.bf16.msra.mxu0 %v5068_v51 }
 0x17c   :  { %2189 = vmatpush1.bf16.msra.mxu1 %v5068_v51  ;;  %2113 = vmatprep.subr.bf16.mxu0 %v5076_v6  ;;  %v2914_v51 = vrot.slane %v2912_v48, 2  ;;  %v5199_v17 = vor.u32 %v2840_v39, %v2837_v3 }
 0x17d   :  { %2190 = vmatprep.subr.bf16.mxu1 %v5076_v6  ;;  %v5197_v6 = vld [vmem:[%s6107_s1 + $0x370] ss:$8 sps:$4 sm:$0xff]  }
 0x17e   :  { %v2915_v54 = vor.u32 %v2914_v51, %v2911_v31  ;;  %v5212_v15 = vsel %vm2450_vm1, %v2833_v61, %v5199_v17  ;;  %v2173_v61 = vor.u32 %v2171_v38, %v2169_v43  ;;  %v5284_v51 = vld [vmem:[%s6107_s1 + $0x340] ss:$8 sps:$4 sm:$0xff]  }
 0x17f   :  { %2114 = vmatpush1.bf16.msra.mxu0 %v5083_v7  ;;  %v5320_v38 = vld [vmem:[%s6107_s1 + $0x320] ss:$8 sps:$4 sm:$0xff]  }
 0x180   :  { %2191 = vmatpush1.bf16.msra.mxu1 %v5083_v7  ;;  %2330 = vmatprep.subr.bf16.mxu0 %v5189_v45  ;;  %v5208_v7 = vor.u32 %v2922_v33, %v2919_v8 }
 0x181   :  { %2387 = vmatprep.subr.bf16.mxu1 %v5189_v45 }
 0x182   :  { %v1038_v26 = vpop.f32.mrf.mxu0  ;;  %2132 = vmatmul.mubr.bf16.vlgmr.msra.gmra.mxu0 %v4740_v10  ;;  %v5218_v9 = vsel %vm2450_vm1, %v2915_v54, %v5208_v7  ;;  %v5231_v10 = vld [vmem:[%s6107_s1 + $0x360] ss:$8 sps:$4 sm:$0xff]  }
 0x183   :  { %v1115_v41 = vpop.f32.mrf.mxu1  ;;  %2209 = vmatmul.mubr.bf16.vlgmr.msra.gmra.mxu1 %v2170_v52  ;;  %v5221_v30 = vadd.f32 %v1038_v26, %v4888_v0  ;;  %2331 = vmatpush1.bf16.msra.mxu0 %v5197_v6  ;;  %v5238_v0 = vld [vmem:[%s6107_s1 + $0x354] ss:$8 sps:$4 sm:$0xff]   ;;  %v5306_v26 = vld [vmem:[%s6107_s1 + $0x330] ss:$8 sps:$4 sm:$0xff]  }
 0x184   :  { %v5224_v46 = vadd.f32 %v1115_v41, %v4965_v42  ;;  %2388 = vmatpush1.bf16.msra.mxu1 %v5197_v6  ;;  %v1040_v19 = vpop.f32.mrf.mxu0  ;;  %2332 = vmatprep.subr.bf16.mxu0 %v5206_v50 }
 0x185   :  { %v1117_v40 = vpop.f32.mrf.mxu1  ;;  %2389 = vmatprep.subr.bf16.mxu1 %v5206_v50  ;;  %v5241_v42 = vadd.f32 %v1040_v19, %v4894_v5  ;;  %2141 = vmatprep.mubr.bf16.mxu0 %v4009_v1  ;;  %v5259_v5 = vld [vmem:[%s6107_s1 + $0x350] ss:$8 sps:$4 sm:$0xff]   ;;  %v5327_v19 = vld [vmem:[%s6107_s1 + $0x314] ss:$8 sps:$4 sm:$0xff]  }
 0x186   :  { %v5244_v18 = vadd.f32 %v1117_v40, %v4981_v49  ;;  %2218 = vmatprep.mubr.bf16.mxu1 %v4009_v1  ;;  %v1042_v57 = vpop.f32.mrf.mxu0  ;;  %v5334_v40 = vld [vmem:[%s6107_s1 + $0x310] ss:$8 sps:$4 sm:$0xff]  }
 0x187   :  { %v1119_v48 = vpop.f32.mrf.mxu1  ;;  %v5249_v4 = vadd.f32 %v1042_v57, %v4904_v13  ;;  %2333 = vmatpush1.bf16.msra.mxu0 %v5231_v10  ;;  %v5270_v13 = vld [vmem:[%s6107_s1 + $0x344] ss:$8 sps:$4 sm:$0xff]  }
 0x188   :  { %v5252_v16 = vadd.f32 %v1119_v48, %v4991_v56  ;;  %2390 = vmatpush1.bf16.msra.mxu1 %v5231_v10  ;;  %v5261_v49 = vpop.f32.mrf.mxu0  ;;  %2334 = vmatprep.subr.bf16.mxu0 %v5238_v0  ;;  %v5341_v57 = vld [vmem:[%s6107_s1 + $0x304] ss:$8 sps:$4 sm:$0xff]   ;;  %v5348_v48 = vld [vmem:[%s6107_s1 + $0x300] ss:$8 sps:$4 sm:$0xff]  }
 0x189   :  { %v5263_v3 = vpop.f32.mrf.mxu1  ;;  %2391 = vmatprep.subr.bf16.mxu1 %v5238_v0 }
 0x18a   :  { %v1048_v56 = vpop.f32.mrf.mxu0  ;;  %2142 = vmatmul.mubr.bf16.gmra.mxu0 %v4784_v24  ;;  %v5291_v24 = vld [vmem:[%s6107_s1 + $0x334] ss:$8 sps:$4 sm:$0xff]  }
 0x18b   :  { %v1125_v43 = vpop.f32.mrf.mxu1  ;;  %2219 = vmatmul.mubr.bf16.gmra.mxu1 %v2173_v61  ;;  %v5274_v39 = vadd.f32 %v1048_v56, %v4916_v21  ;;  %2335 = vmatpush1.bf16.msra.mxu0 %v5259_v5 }
 0x18c   :  { %v5277_v31 = vadd.f32 %v1125_v43, %v5018_v11  ;;  %2392 = vmatpush1.bf16.msra.mxu1 %v5259_v5  ;;  %v1050_v8 = vpop.f32.mrf.mxu0  ;;  %2336 = vmatprep.subr.bf16.mxu0 %v5270_v13  ;;  %v3999_v43 = vld [vmem:[%s6108_s0 + $0x60] sm:$0xff]  }
 0x18d   :  { %v1127_v33 = vpop.f32.mrf.mxu1  ;;  %2393 = vmatprep.subr.bf16.mxu1 %v5270_v13  ;;  %v5294_v21 = vadd.f32 %v1050_v8, %v4920_v23  ;;  %2362 = vmatprep.mubr.bf16.mxu0 %v4009_v1  ;;  %v5313_v23 = vld [vmem:[%s6107_s1 + $0x324] ss:$8 sps:$4 sm:$0xff]   ;;  %v5362_v8 = vld [vmem:[%s6108_s0 + $0x78] sm:$0xff]  }
 0x18e   :  { %v5297_v11 = vadd.f32 %v1127_v33, %v5027_v22  ;;  %2419 = vmatprep.mubr.bf16.mxu1 %v4009_v1  ;;  %v1052_v52 = vpop.f32.mrf.mxu0 }
 0x18f   :  { %v1129_v54 = vpop.f32.mrf.mxu1  ;;  %2337 = vmatpush1.bf16.msra.mxu0 %v5284_v51 }
 0x190   :  { %2394 = vmatpush1.bf16.msra.mxu1 %v5284_v51  ;;  %2338 = vmatprep.subr.bf16.mxu0 %v5291_v24  ;;  %v1053_v22 = vpop.f32.mrf.mxu0 }
 0x191   :  { %2395 = vmatprep.subr.bf16.mxu1 %v5291_v24  ;;  %v1130_v41 = vpop.f32.mrf.mxu1 }
 0x193   :  { %2339 = vmatpush1.bf16.msra.mxu0 %v5306_v26 }
 0x194   :  { %2396 = vmatpush1.bf16.msra.mxu1 %v5306_v26  ;;  %2340 = vmatprep.subr.bf16.mxu0 %v5313_v23 }
 0x195   :  { %2397 = vmatprep.subr.bf16.mxu1 %v5313_v23 }
 0x197   :  { %2341 = vmatpush1.bf16.msra.mxu0 %v5320_v38 }
 0x198   :  { %2398 = vmatpush1.bf16.msra.mxu1 %v5320_v38  ;;  %2342 = vmatprep.subr.bf16.mxu0 %v5327_v19 }
 0x199   :  { %2399 = vmatprep.subr.bf16.mxu1 %v5327_v19 }
 0x19b   :  { %2343 = vmatpush1.bf16.msra.mxu0 %v5334_v40 }
 0x19c   :  { %2400 = vmatpush1.bf16.msra.mxu1 %v5334_v40  ;;  %2344 = vmatprep.subr.bf16.mxu0 %v5341_v57 }
 0x19d   :  { %2401 = vmatprep.subr.bf16.mxu1 %v5341_v57 }
 0x19f   :  { %2345 = vmatpush1.bf16.msra.mxu0 %v5348_v48 }
 0x1a0   :  { %2402 = vmatpush1.bf16.msra.mxu1 %v5348_v48  ;;  %2470 = vmatprep.subr.bf16.mxu0 %v5189_v45 }
 0x1a1   :  { %2552 = vmatprep.subr.bf16.mxu1 %v5189_v45  ;;  %v396_v45 = vadd.f32 %v4696_v60, %v4694_v59 }
 0x1a2   :  { %v1279_v61 = vpop.f32.mrf.mxu0  ;;  %2363 = vmatmul.mubr.bf16.vlgmr.msra.gmra.mxu0 %v3999_v43 }
 0x1a3   :  { %v1346_v56 = vpop.f32.mrf.mxu1  ;;  %2420 = vmatmul.mubr.bf16.vlgmr.msra.gmra.mxu1 %v5362_v8  ;;  %v5366_v33 = vadd.f32 %v1279_v61, %v5094_v36  ;;  %2471 = vmatpush1.bf16.msra.mxu0 %v5197_v6  ;;  %v518_v36 = vadd.f32 %v4797_v29, %v4795_v27  ;;  %v923_v59 = vadd.f32 %v5119_v53, %v396_v45  ;;  %v3414_v45 = vld [vmem:[%s6108_s0 + $0x18] sm:$0xe] }
 0x1a4   :  { %v5369_v52 = vadd.f32 %v1346_v56, %v5097_v44  ;;  %2553 = vmatpush1.bf16.msra.mxu1 %v5197_v6  ;;  %v1281_v54 = vpop.f32.mrf.mxu0  ;;  %2472 = vmatprep.subr.bf16.mxu0 %v5206_v50 }
 0x1a5   :  { %v1348_v22 = vpop.f32.mrf.mxu1  ;;  %2554 = vmatprep.subr.bf16.mxu1 %v5206_v50  ;;  %v5380_v41 = vadd.f32 %v1281_v54, %v5104_v47  ;;  %2372 = vmatprep.mubr.bf16.mxu0 %v4009_v1  ;;  %v1001_v61 = vadd.f32 %v5121_v20, %v518_v36 }
 0x1a6   :  { %v5383_v44 = vadd.f32 %v1348_v22, %v5107_v32  ;;  %2429 = vmatprep.mubr.bf16.mxu1 %v4009_v1  ;;  %v1283_v60 = vpop.f32.mrf.mxu0 }
 0x1a7   :  { %v1350_v6 = vpop.f32.mrf.mxu1  ;;  %v5390_v50 = vadd.f32 %v1283_v60, %v5112_v37  ;;  %2473 = vmatpush1.bf16.msra.mxu0 %v5231_v10 }
 0x1a8   :  { %v5393_v27 = vadd.f32 %v1350_v6, %v5115_v55  ;;  %2555 = vmatpush1.bf16.msra.mxu1 %v5231_v10  ;;  %v1285_v29 = vpop.f32.mrf.mxu0  ;;  %2474 = vmatprep.subr.bf16.mxu0 %v5238_v0  ;;  %v4001_v55 = vld [vmem:[%s6108_s0 + $0x68] ss:$0 sps:$4 sm:$0x11]   ;;  %v5409_v10 = vld [vmem:[%s6108_s0 + $0x80] ss:$0 sps:$4 sm:$0x11]  }
 0x1a9   :  { %v1352_v47 = vpop.f32.mrf.mxu1  ;;  %2556 = vmatprep.subr.bf16.mxu1 %v5238_v0  ;;  %v5399_v32 = vadd.f32 %v1285_v29, %v923_v59  ;;  %v82_v0 = vld [vmem:[%s6108_s0] sm:$0xe]  ;;  %v3946_v6 = vld [vmem:[%s6108_s0 + $0x20] ss:$0 sps:$4 sm:$0x77]  }
 0x1aa   :  { %v5401_v53 = vadd.f32 %v1352_v47, %v1001_v61  ;;  %v1289_v20 = vpop.f32.mrf.mxu0  ;;  %2373 = vmatmul.mubr.bf16.gmra.mxu0 %v4001_v55 }
 0x1ab   :  { %v1356_v37 = vpop.f32.mrf.mxu1  ;;  %2430 = vmatmul.mubr.bf16.gmra.mxu1 %v5409_v10  ;;  %v5416_v56 = vadd.f32 %v1289_v20, %v5127_v58  ;;  %2475 = vmatpush1.bf16.msra.mxu0 %v5259_v5 }
 0x1ac   :  { %v5419_v43 = vadd.f32 %v1356_v37, %v5130_v25  ;;  %2557 = vmatpush1.bf16.msra.mxu1 %v5259_v5  ;;  %v1291_v54 = vpop.f32.mrf.mxu0  ;;  %2476 = vmatprep.subr.bf16.mxu0 %v5270_v13  ;;  %v5439_v5 = vld [vmem:[%s6108_s0 + $0x4] sm:$0xf] }
 0x1ad   :  { %v1358_v22 = vpop.f32.mrf.mxu1  ;;  %2558 = vmatprep.subr.bf16.mxu1 %v5270_v13  ;;  %v5429_v58 = vadd.f32 %v1291_v54, %v5140_v63  ;;  %2502 = vmatprep.mubr.bf16.mxu0 %v4009_v1  ;;  %v3662_v36 = vcombine.low %v82_v0, %v5439_v5  ;;  %v5445_v63 = vld [vmem:[%s6108_s0 + $0x8] ss:$0 sps:$4 sm:$0x77]   ;;  %v2545_v54 = vshll.u32 %v3946_v6, 16 }
 0x1ae   :  { %v5432_v25 = vadd.f32 %v1358_v22, %v5143_v35  ;;  %2584 = vmatprep.mubr.bf16.mxu1 %v4009_v1  ;;  %v1293_v59 = vpop.f32.mrf.mxu0  ;;  %v4004_v35 = vld [vmem:[%s6108_s0 + $0x1c] sm:$0xf]  ;;  %v2460_v37 = vshrl.u32 %v5445_v63, 16  ;;  %v2463_v55 = vshll.u32 %v5445_v63, 16 }
 0x1af   :  { %v1360_v60 = vpop.f32.mrf.mxu1  ;;  %v3664_v13 = vcombine.low %v3414_v45, %v4004_v35  ;;  %2477 = vmatpush1.bf16.msra.mxu0 %v5284_v51  ;;  %v2452_v47 = vshrl.u32 %v3662_v36, 16  ;;  %v2455_v20 = vshll.u32 %v3662_v36, 16  ;;  %v2542_v45 = vshrl.u32 %v3946_v6, 16 }
 0x1b0   :  { %2559 = vmatpush1.bf16.msra.mxu1 %v5284_v51  ;;  %2478 = vmatprep.subr.bf16.mxu0 %v5291_v24  ;;  %v1294_v61 = vpop.f32.mrf.mxu0  ;;  %v2462_v59 = vrot.slane %v2460_v37, 1  ;;  %v2465_v36 = vrot.slane %v2463_v55, 2 }
 0x1b1   :  { %2560 = vmatprep.subr.bf16.mxu1 %v5291_v24  ;;  %v1361_v29 = vpop.f32.mrf.mxu1  ;;  %v2534_v51 = vshrl.u32 %v3664_v13, 16  ;;  %v2537_v0 = vshll.u32 %v3664_v13, 16  ;;  %v2454_v24 = vrot.slane %v2452_v47, 1  ;;  %v2457_v22 = vrot.slane %v2455_v20, 2  ;;  %v5488_v47 = vld [vmem:[%s6107_s1 + $0x3f0] ss:$8 sps:$4 sm:$0xff]  }
 0x1b2   :  { %v2544_v61 = vrot.slane %v2542_v45, 1 }
 0x1b3   :  { %2479 = vmatpush1.bf16.msra.mxu0 %v5306_v26  ;;  %v2536_v60 = vrot.slane %v2534_v51, 1  ;;  %v2539_v35 = vrot.slane %v2537_v0, 2  ;;  %v2458_v13 = vor.u32 %v2457_v22, %v2454_v24  ;;  %v5509_v51 = vld [vmem:[%s6107_s1 + $0x3e0] ss:$8 sps:$4 sm:$0xff]   ;;  %v640_v0 = vadd.f32 %v4910_v14, %v4908_v12 }
 0x1b4   :  { %2561 = vmatpush1.bf16.msra.mxu1 %v5306_v26  ;;  %2480 = vmatprep.subr.bf16.mxu0 %v5313_v23  ;;  %v2547_v26 = vrot.slane %v2545_v54, 2 }
 0x1b5   :  { %2562 = vmatprep.subr.bf16.mxu1 %v5313_v23  ;;  %v2466_v23 = vor.u32 %v2465_v36, %v2462_v59  ;;  %v2540_v6 = vor.u32 %v2539_v35, %v2536_v60  ;;  %v1058_v12 = vadd.f32 %v5261_v49, %v640_v0  ;;  %v5590_v0 = vld [vmem:[%s6107_s1 + $0x3b0] ss:$8 sps:$4 sm:$0xff]  }
 0x1b6   :  { %v5469_v29 = vor.u32 %v2547_v26, %v2544_v61 }
 0x1b7   :  { %2481 = vmatpush1.bf16.msra.mxu0 %v5320_v38 }
 0x1b8   :  { %2563 = vmatpush1.bf16.msra.mxu1 %v5320_v38  ;;  %2482 = vmatprep.subr.bf16.mxu0 %v5327_v19  ;;  %v5476_v38 = vld [vmem:[%s6107_s1 + $0x3f4] ss:$8 sps:$4 sm:$0xff]  }
 0x1b9   :  { %2564 = vmatprep.subr.bf16.mxu1 %v5327_v19  ;;  %v2467_v19 = vsel %vm2450_vm1, %v2458_v13, %v2466_v23  ;;  %v5568_v13 = vld [vmem:[%s6107_s1 + $0x3c0] ss:$8 sps:$4 sm:$0xff]  }
 0x1bb   :  { %2483 = vmatpush1.bf16.msra.mxu0 %v5334_v40 }
 0x1bc   :  { %2565 = vmatpush1.bf16.msra.mxu1 %v5334_v40  ;;  %2484 = vmatprep.subr.bf16.mxu0 %v5341_v57  ;;  %v5483_v40 = vsel %vm2450_vm1, %v2540_v6, %v5469_v29 }
 0x1bd   :  { %2566 = vmatprep.subr.bf16.mxu1 %v5341_v57  ;;  %v5495_v57 = vld [vmem:[%s6107_s1 + $0x3e4] ss:$8 sps:$4 sm:$0xff]  }
 0x1bf   :  { %2485 = vmatpush1.bf16.msra.mxu0 %v5348_v48 }
 0x1c0   :  { %2567 = vmatpush1.bf16.msra.mxu1 %v5348_v48  ;;  %2706 = vmatprep.subr.bf16.mxu0 %v5476_v38 }
 0x1c1   :  { %2763 = vmatprep.subr.bf16.mxu1 %v5476_v38 }
 0x1c2   :  { %v1413_v48 = vpop.f32.mrf.mxu0  ;;  %2503 = vmatmul.mubr.bf16.vlgmr.msra.gmra.mxu0 %v2467_v19 }
 0x1c3   :  { %v1480_v20 = vpop.f32.mrf.mxu1  ;;  %2585 = vmatmul.mubr.bf16.vlgmr.msra.gmra.mxu1 %v5483_v40  ;;  %v5499_v37 = vadd.f32 %v1413_v48, %v5221_v30  ;;  %2707 = vmatpush1.bf16.msra.mxu0 %v5488_v47  ;;  %v5518_v30 = vld [vmem:[%s6107_s1 + $0x3d4] ss:$8 sps:$4 sm:$0xff]  }
 0x1c4   :  { %v5502_v55 = vadd.f32 %v1480_v20, %v5224_v46  ;;  %2764 = vmatpush1.bf16.msra.mxu1 %v5488_v47  ;;  %v1415_v45 = vpop.f32.mrf.mxu0  ;;  %2708 = vmatprep.subr.bf16.mxu0 %v5495_v57  ;;  %v762_v46 = vadd.f32 %v5002_v2, %v5000_v62  ;;  %v5543_v2 = vld [vmem:[%s6107_s1 + $0x3d0] ss:$8 sps:$4 sm:$0xff]  }
 0x1c5   :  { %v1482_v54 = vpop.f32.mrf.mxu1  ;;  %2765 = vmatprep.subr.bf16.mxu1 %v5495_v57  ;;  %v5523_v24 = vadd.f32 %v1415_v45, %v5241_v42  ;;  %2512 = vmatprep.mubr.bf16.mxu0 %v4009_v1 }
 0x1c6   :  { %v5526_v22 = vadd.f32 %v1482_v54, %v5244_v18  ;;  %2594 = vmatprep.mubr.bf16.mxu1 %v4009_v1  ;;  %v1417_v14 = vpop.f32.mrf.mxu0  ;;  %v1135_v36 = vadd.f32 %v5263_v3, %v762_v46  ;;  %v5604_v54 = vld [vmem:[%s6107_s1 + $0x3a0] ss:$8 sps:$4 sm:$0xff]   ;;  %v5611_v46 = vld [vmem:[%s6107_s1 + $0x394] ss:$8 sps:$4 sm:$0xff]  }
 0x1c7   :  { %v1484_v59 = vpop.f32.mrf.mxu1  ;;  %v5533_v60 = vadd.f32 %v1417_v14, %v5249_v4  ;;  %2709 = vmatpush1.bf16.msra.mxu0 %v5509_v51  ;;  %v5550_v4 = vld [vmem:[%s6107_s1 + $0x3c4] ss:$8 sps:$4 sm:$0xff]  }
 0x1c8   :  { %v5536_v62 = vadd.f32 %v1484_v59, %v5252_v16  ;;  %2766 = vmatpush1.bf16.msra.mxu1 %v5509_v51  ;;  %v1419_v42 = vpop.f32.mrf.mxu0  ;;  %2710 = vmatprep.subr.bf16.mxu0 %v5518_v30  ;;  %v5625_v14 = vld [vmem:[%s6107_s1 + $0x384] ss:$8 sps:$4 sm:$0xff]   ;;  %v5632_v59 = vld [vmem:[%s6107_s1 + $0x380] ss:$8 sps:$4 sm:$0xff]  }
 0x1c9   :  { %v1486_v18 = vpop.f32.mrf.mxu1  ;;  %2767 = vmatprep.subr.bf16.mxu1 %v5518_v30  ;;  %v5552_v16 = vadd.f32 %v1419_v42, %v1058_v12  ;;  %v5618_v12 = vld [vmem:[%s6107_s1 + $0x390] ss:$8 sps:$4 sm:$0xff]  }
 0x1ca   :  { %v5554_v49 = vadd.f32 %v1486_v18, %v1135_v36  ;;  %v1423_v3 = vpop.f32.mrf.mxu0  ;;  %2513 = vmatmul.mubr.bf16.gmra.mxu0 %v2466_v23  ;;  %v4005_v18 = vld [vmem:[%s6108_s0 + $0x6c] sm:$0xff]  }
 0x1cb   :  { %v1490_v35 = vpop.f32.mrf.mxu1  ;;  %2595 = vmatmul.mubr.bf16.gmra.mxu1 %v5469_v29  ;;  %v5558_v61 = vadd.f32 %v1423_v3, %v5274_v39  ;;  %2711 = vmatpush1.bf16.msra.mxu0 %v5543_v2  ;;  %v5575_v39 = vld [vmem:[%s6107_s1 + $0x3b4] ss:$8 sps:$4 sm:$0xff]   ;;  %v4006_v3 = vld [vmem:[%s6108_s0 + $0x84] sm:$0xff]  }
 0x1cc   :  { %v5561_v26 = vadd.f32 %v1490_v35, %v5277_v31  ;;  %2768 = vmatpush1.bf16.msra.mxu1 %v5543_v2  ;;  %v1425_v6 = vpop.f32.mrf.mxu0  ;;  %2712 = vmatprep.subr.bf16.mxu0 %v5550_v4 }
 0x1cd   :  { %v1492_v19 = vpop.f32.mrf.mxu1  ;;  %2769 = vmatprep.subr.bf16.mxu1 %v5550_v4  ;;  %v5578_v31 = vadd.f32 %v1425_v6, %v5294_v21  ;;  %2738 = vmatprep.mubr.bf16.mxu0 %v4009_v1  ;;  %v5597_v21 = vld [vmem:[%s6107_s1 + $0x3a4] ss:$8 sps:$4 sm:$0xff]  }
 0x1ce   :  { %v5581_v23 = vadd.f32 %v1492_v19, %v5297_v11  ;;  %2795 = vmatprep.mubr.bf16.mxu1 %v4009_v1  ;;  %v1427_v48 = vpop.f32.mrf.mxu0 }
 0x1cf   :  { %v1494_v20 = vpop.f32.mrf.mxu1  ;;  %2713 = vmatpush1.bf16.msra.mxu0 %v5568_v13 }
 0x1d0   :  { %2770 = vmatpush1.bf16.msra.mxu1 %v5568_v13  ;;  %2714 = vmatprep.subr.bf16.mxu0 %v5575_v39  ;;  %v1428_v11 = vpop.f32.mrf.mxu0 }
 0x1d1   :  { %2771 = vmatprep.subr.bf16.mxu1 %v5575_v39  ;;  %v1495_v45 = vpop.f32.mrf.mxu1 }
 0x1d3   :  { %2715 = vmatpush1.bf16.msra.mxu0 %v5590_v0 }
 0x1d4   :  { %2772 = vmatpush1.bf16.msra.mxu1 %v5590_v0  ;;  %2716 = vmatprep.subr.bf16.mxu0 %v5597_v21 }
 0x1d5   :  { %2773 = vmatprep.subr.bf16.mxu1 %v5597_v21 }
 0x1d7   :  { %2717 = vmatpush1.bf16.msra.mxu0 %v5604_v54 }
 0x1d8   :  { %2774 = vmatpush1.bf16.msra.mxu1 %v5604_v54  ;;  %2718 = vmatprep.subr.bf16.mxu0 %v5611_v46 }
 0x1d9   :  { %2775 = vmatprep.subr.bf16.mxu1 %v5611_v46 }
 0x1db   :  { %2719 = vmatpush1.bf16.msra.mxu0 %v5618_v12 }
 0x1dc   :  { %2776 = vmatpush1.bf16.msra.mxu1 %v5618_v12  ;;  %2720 = vmatprep.subr.bf16.mxu0 %v5625_v14 }
 0x1dd   :  { %2777 = vmatprep.subr.bf16.mxu1 %v5625_v14 }
 0x1df   :  { %2721 = vmatpush1.bf16.msra.mxu0 %v5632_v59 }
 0x1e0   :  { %2778 = vmatpush1.bf16.msra.mxu1 %v5632_v59  ;;  %2845 = vmatprep.subr.bf16.mxu0 %v5476_v38 }
 0x1e1   :  { %2927 = vmatprep.subr.bf16.mxu1 %v5476_v38 }
 0x1e2   :  { %v1644_v36 = vpop.f32.mrf.mxu0  ;;  %2739 = vmatmul.mubr.bf16.vlgmr.msra.gmra.mxu0 %v4005_v18 }
 0x1e3   :  { %v1711_v42 = vpop.f32.mrf.mxu1  ;;  %2796 = vmatmul.mubr.bf16.vlgmr.msra.gmra.mxu1 %v4006_v3  ;;  %v5647_v35 = vadd.f32 %v1644_v36, %v5366_v33  ;;  %2846 = vmatpush1.bf16.msra.mxu0 %v5488_v47 }
 0x1e4   :  { %v5650_v6 = vadd.f32 %v1711_v42, %v5369_v52  ;;  %2928 = vmatpush1.bf16.msra.mxu1 %v5488_v47  ;;  %v1646_v38 = vpop.f32.mrf.mxu0  ;;  %2847 = vmatprep.subr.bf16.mxu0 %v5495_v57 }
 0x1e5   :  { %v1713_v19 = vpop.f32.mrf.mxu1  ;;  %2929 = vmatprep.subr.bf16.mxu1 %v5495_v57  ;;  %v5657_v48 = vadd.f32 %v1646_v38, %v5380_v41  ;;  %2748 = vmatprep.mubr.bf16.mxu0 %v4009_v1 }
 0x1e6   :  { %v5660_v20 = vadd.f32 %v1713_v19, %v5383_v44  ;;  %2805 = vmatprep.mubr.bf16.mxu1 %v4009_v1  ;;  %v1648_v33 = vpop.f32.mrf.mxu0 }
 0x1e7   :  { %v1715_v52 = vpop.f32.mrf.mxu1  ;;  %v5665_v47 = vadd.f32 %v1648_v33, %v5390_v50  ;;  %2848 = vmatpush1.bf16.msra.mxu0 %v5509_v51 }
 0x1e8   :  { %v5668_v11 = vadd.f32 %v1715_v52, %v5393_v27  ;;  %2930 = vmatpush1.bf16.msra.mxu1 %v5509_v51  ;;  %v1650_v41 = vpop.f32.mrf.mxu0  ;;  %2849 = vmatprep.subr.bf16.mxu0 %v5518_v30  ;;  %v4007_v27 = vld [vmem:[%s6108_s0 + $0x74] ss:$0 sps:$4 sm:$0x11]   ;;  %v4008_v51 = vld [vmem:[%s6108_s0 + $0x8c] ss:$0 sps:$4 sm:$0x11]  }
 0x1e9   :  { %v1717_v57 = vpop.f32.mrf.mxu1  ;;  %2931 = vmatprep.subr.bf16.mxu1 %v5518_v30  ;;  %v5675_v44 = vadd.f32 %v1650_v41, %v5399_v32 }
 0x1ea   :  { %v5678_v45 = vadd.f32 %v1717_v57, %v5401_v53  ;;  %v1654_v50 = vpop.f32.mrf.mxu0  ;;  %2749 = vmatmul.mubr.bf16.gmra.mxu0 %v4007_v27 }
 0x1eb   :  { %v1721_v36 = vpop.f32.mrf.mxu1  ;;  %2806 = vmatmul.mubr.bf16.gmra.mxu1 %v4008_v51  ;;  %v5687_v30 = vadd.f32 %v1654_v50, %v5416_v56  ;;  %2850 = vmatpush1.bf16.msra.mxu0 %v5543_v2 }
 0x1ec   :  { %v5690_v32 = vadd.f32 %v1721_v36, %v5419_v43  ;;  %2932 = vmatpush1.bf16.msra.mxu1 %v5543_v2  ;;  %v1656_v53 = vpop.f32.mrf.mxu0  ;;  %2851 = vmatprep.subr.bf16.mxu0 %v5550_v4 }
 0x1ed   :  { %v1723_v42 = vpop.f32.mrf.mxu1  ;;  %2933 = vmatprep.subr.bf16.mxu1 %v5550_v4  ;;  %v5697_v18 = vadd.f32 %v1656_v53, %v5429_v58  ;;  %2877 = vmatprep.mubr.bf16.mxu0 %v4009_v1  ;;  %v5730_v4 = vld [vmem:[%s6107_s1 + $0x470] ss:$8 sps:$4 sm:$0xff]  }
 0x1ee   :  { %v5700_v3 = vadd.f32 %v1723_v42, %v5432_v25  ;;  %2959 = vmatprep.mubr.bf16.mxu1 %v4009_v1  ;;  %v1658_v56 = vpop.f32.mrf.mxu0  ;;  %v5723_v25 = vld [vmem:[%s6107_s1 + $0x474] ss:$8 sps:$4 sm:$0xff]   ;;  %v5830_v53 = vld [vmem:[%s6107_s1 + $0x430] ss:$8 sps:$4 sm:$0xff]  }
 0x1ef   :  { %v1725_v43 = vpop.f32.mrf.mxu1  ;;  %2852 = vmatpush1.bf16.msra.mxu0 %v5568_v13  ;;  %v5844_v56 = vld [vmem:[%s6107_s1 + $0x420] ss:$8 sps:$4 sm:$0xff]  }
 0x1f0   :  { %2934 = vmatpush1.bf16.msra.mxu1 %v5568_v13  ;;  %2853 = vmatprep.subr.bf16.mxu0 %v5575_v39  ;;  %v1659_v2 = vpop.f32.mrf.mxu0  ;;  %v5737_v13 = vld [vmem:[%s6107_s1 + $0x464] ss:$8 sps:$4 sm:$0xff]   ;;  %v5851_v43 = vld [vmem:[%s6107_s1 + $0x414] ss:$8 sps:$4 sm:$0xff]  }
 0x1f1   :  { %2935 = vmatprep.subr.bf16.mxu1 %v5575_v39  ;;  %v1726_v58 = vpop.f32.mrf.mxu1  ;;  %v5858_v2 = vld [vmem:[%s6107_s1 + $0x410] ss:$8 sps:$4 sm:$0xff]  }
 0x1f2   :  { %v5865_v58 = vld [vmem:[%s6107_s1 + $0x404] ss:$8 sps:$4 sm:$0xff]  }
 0x1f3   :  { %2854 = vmatpush1.bf16.msra.mxu0 %v5590_v0 }
 0x1f4   :  { %2936 = vmatpush1.bf16.msra.mxu1 %v5590_v0  ;;  %2855 = vmatprep.subr.bf16.mxu0 %v5597_v21 }
 0x1f5   :  { %2937 = vmatprep.subr.bf16.mxu1 %v5597_v21 }
 0x1f7   :  { %2856 = vmatpush1.bf16.msra.mxu0 %v5604_v54 }
 0x1f8   :  { %2938 = vmatpush1.bf16.msra.mxu1 %v5604_v54  ;;  %2857 = vmatprep.subr.bf16.mxu0 %v5611_v46 }
 0x1f9   :  { %2939 = vmatprep.subr.bf16.mxu1 %v5611_v46  ;;  %v5752_v46 = vld [vmem:[%s6107_s1 + $0x460] ss:$8 sps:$4 sm:$0xff]  }
 0x1fb   :  { %2858 = vmatpush1.bf16.msra.mxu0 %v5618_v12 }
 0x1fc   :  { %2940 = vmatpush1.bf16.msra.mxu1 %v5618_v12  ;;  %2859 = vmatprep.subr.bf16.mxu0 %v5625_v14 }
 0x1fd   :  { %2941 = vmatprep.subr.bf16.mxu1 %v5625_v14 }
 0x1ff   :  { %2860 = vmatpush1.bf16.msra.mxu0 %v5632_v59 }
 0x200   :  { %2942 = vmatpush1.bf16.msra.mxu1 %v5632_v59  ;;  %3081 = vmatprep.subr.bf16.mxu0 %v5723_v25 }
 0x201   :  { %3138 = vmatprep.subr.bf16.mxu1 %v5723_v25 }
 0x202   :  { %v1778_v39 = vpop.f32.mrf.mxu0  ;;  %2878 = vmatmul.mubr.bf16.vlgmr.msra.gmra.mxu0 %v5212_v15  ;;  %v5759_v15 = vld [vmem:[%s6107_s1 + $0x454] ss:$8 sps:$4 sm:$0xff]  }
 0x203   :  { %v1845_v0 = vpop.f32.mrf.mxu1  ;;  %2960 = vmatmul.mubr.bf16.vlgmr.msra.gmra.mxu1 %v5218_v9  ;;  %v5742_v21 = vadd.f32 %v1778_v39, %v5499_v37  ;;  %3082 = vmatpush1.bf16.msra.mxu0 %v5730_v4  ;;  %v5872_v39 = vld [vmem:[%s6107_s1 + $0x400] ss:$8 sps:$4 sm:$0xff]  }
 0x204   :  { %v5745_v54 = vadd.f32 %v1845_v0, %v5502_v55  ;;  %3139 = vmatpush1.bf16.msra.mxu1 %v5730_v4  ;;  %v1780_v12 = vpop.f32.mrf.mxu0  ;;  %3083 = vmatprep.subr.bf16.mxu0 %v5737_v13 }
 0x205   :  { %v1847_v14 = vpop.f32.mrf.mxu1  ;;  %3140 = vmatprep.subr.bf16.mxu1 %v5737_v13  ;;  %v5762_v9 = vadd.f32 %v1780_v12, %v5523_v24  ;;  %2887 = vmatprep.mubr.bf16.mxu0 %v4009_v1  ;;  %v5780_v24 = vld [vmem:[%s6107_s1 + $0x450] ss:$8 sps:$4 sm:$0xff]  }
 0x206   :  { %v5765_v37 = vadd.f32 %v1847_v14, %v5526_v22  ;;  %2969 = vmatprep.mubr.bf16.mxu1 %v4009_v1  ;;  %v1782_v55 = vpop.f32.mrf.mxu0 }
 0x207   :  { %v1849_v59 = vpop.f32.mrf.mxu1  ;;  %v5770_v38 = vadd.f32 %v1782_v55, %v5533_v60  ;;  %3084 = vmatpush1.bf16.msra.mxu0 %v5752_v46  ;;  %v5787_v60 = vld [vmem:[%s6107_s1 + $0x444] ss:$8 sps:$4 sm:$0xff]  }
 0x208   :  { %v5773_v19 = vadd.f32 %v1849_v59, %v5536_v62  ;;  %3141 = vmatpush1.bf16.msra.mxu1 %v5752_v46  ;;  %v1784_v22 = vpop.f32.mrf.mxu0  ;;  %3085 = vmatprep.subr.bf16.mxu0 %v5759_v15 }
 0x209   :  { %v1851_v33 = vpop.f32.mrf.mxu1  ;;  %3142 = vmatprep.subr.bf16.mxu1 %v5759_v15  ;;  %v5790_v62 = vadd.f32 %v1784_v22, %v5552_v16  ;;  %v5808_v16 = vld [vmem:[%s6107_s1 + $0x440] ss:$8 sps:$4 sm:$0xff]  }
 0x20a   :  { %v5793_v52 = vadd.f32 %v1851_v33, %v5554_v49  ;;  %v1788_v41 = vpop.f32.mrf.mxu0  ;;  %2888 = vmatmul.mubr.bf16.gmra.mxu0 %v5199_v17  ;;  %v5815_v17 = vld [vmem:[%s6107_s1 + $0x434] ss:$8 sps:$4 sm:$0xff]  }
 0x20b   :  { %v1855_v57 = vpop.f32.mrf.mxu1  ;;  %2970 = vmatmul.mubr.bf16.gmra.mxu1 %v5208_v7  ;;  %v5798_v50 = vadd.f32 %v1788_v41, %v5558_v61  ;;  %3086 = vmatpush1.bf16.msra.mxu0 %v5780_v24 }
 0x20c   :  { %v5801_v36 = vadd.f32 %v1855_v57, %v5561_v26  ;;  %3143 = vmatpush1.bf16.msra.mxu1 %v5780_v24  ;;  %v1790_v49 = vpop.f32.mrf.mxu0  ;;  %3087 = vmatprep.subr.bf16.mxu0 %v5787_v60  ;;  %v3257_v57 = vrot.slane %v5445_v63, 2 }
 0x20d   :  { %v1857_v27 = vpop.f32.mrf.mxu1  ;;  %3144 = vmatprep.subr.bf16.mxu1 %v5787_v60  ;;  %v5818_v7 = vadd.f32 %v1790_v49, %v5578_v31  ;;  %3113 = vmatprep.mubr.bf16.mxu0 %v4009_v1  ;;  %v5837_v31 = vld [vmem:[%s6107_s1 + $0x424] ss:$8 sps:$4 sm:$0xff]  }
 0x20e   :  { %v5821_v61 = vadd.f32 %v1857_v27, %v5581_v23  ;;  %3170 = vmatprep.mubr.bf16.mxu1 %v4009_v1  ;;  %v1792_v26 = vpop.f32.mrf.mxu0 }
 0x20f   :  { %v1859_v51 = vpop.f32.mrf.mxu1  ;;  %3088 = vmatpush1.bf16.msra.mxu0 %v5808_v16 }
 0x210   :  { %3145 = vmatpush1.bf16.msra.mxu1 %v5808_v16  ;;  %3089 = vmatprep.subr.bf16.mxu0 %v5815_v17  ;;  %v1793_v23 = vpop.f32.mrf.mxu0 }
 0x211   :  { %3146 = vmatprep.subr.bf16.mxu1 %v5815_v17  ;;  %v1860_v42 = vpop.f32.mrf.mxu1 }
 0x213   :  { %3090 = vmatpush1.bf16.msra.mxu0 %v5830_v53 }
 0x214   :  { %3147 = vmatpush1.bf16.msra.mxu1 %v5830_v53  ;;  %3091 = vmatprep.subr.bf16.mxu0 %v5837_v31 }
 0x215   :  { %3148 = vmatprep.subr.bf16.mxu1 %v5837_v31 }
 0x217   :  { %3092 = vmatpush1.bf16.msra.mxu0 %v5844_v56 }
 0x218   :  { %3149 = vmatpush1.bf16.msra.mxu1 %v5844_v56  ;;  %3093 = vmatprep.subr.bf16.mxu0 %v5851_v43 }
 0x219   :  { %3150 = vmatprep.subr.bf16.mxu1 %v5851_v43 }
 0x21b   :  { %3094 = vmatpush1.bf16.msra.mxu0 %v5858_v2 }
 0x21c   :  { %3151 = vmatpush1.bf16.msra.mxu1 %v5858_v2  ;;  %3095 = vmatprep.subr.bf16.mxu0 %v5865_v58 }
 0x21d   :  { %3152 = vmatprep.subr.bf16.mxu1 %v5865_v58 }
 0x21f   :  { %3096 = vmatpush1.bf16.msra.mxu0 %v5872_v39 }
 0x220   :  { %3153 = vmatpush1.bf16.msra.mxu1 %v5872_v39  ;;  %3195 = vmatprep.subr.bf16.mxu0 %v5723_v25 }
 0x221   :  { %3261 = vmatprep.subr.bf16.mxu1 %v5723_v25 }
 0x222   :  { %v1999_v0 = vpop.f32.mrf.mxu0  ;;  %3114 = vmatmul.mubr.bf16.vlgmr.msra.gmra.mxu0 %v5362_v8 }
 0x223   :  { %v2076_v12 = vpop.f32.mrf.mxu1  ;;  %3171 = vmatmul.mubr.bf16.vlgmr.msra.gmra.mxu1 %v4539_v28  ;;  %v5883_v14 = vadd.f32 %v1999_v0, %v5647_v35  ;;  %3196 = vmatpush1.bf16.msra.mxu0 %v5730_v4 }
 0x224   :  { %v5886_v55 = vadd.f32 %v2076_v12, %v5650_v6  ;;  %3262 = vmatpush1.bf16.msra.mxu1 %v5730_v4  ;;  %v2001_v59 = vpop.f32.mrf.mxu0  ;;  %3197 = vmatprep.subr.bf16.mxu0 %v5737_v13 }
 0x225   :  { %v2078_v22 = vpop.f32.mrf.mxu1  ;;  %3263 = vmatprep.subr.bf16.mxu1 %v5737_v13  ;;  %v5893_v8 = vadd.f32 %v2001_v59, %v5657_v48  ;;  %3123 = vmatprep.mubr.bf16.mxu0 %v4009_v1 }
 0x226   :  { %v5896_v28 = vadd.f32 %v2078_v22, %v5660_v20  ;;  %3180 = vmatprep.mubr.bf16.mxu1 %v4009_v1  ;;  %v2003_v35 = vpop.f32.mrf.mxu0 }
 0x227   :  { %v2080_v6 = vpop.f32.mrf.mxu1  ;;  %v5901_v25 = vadd.f32 %v2003_v35, %v5665_v47  ;;  %3198 = vmatpush1.bf16.msra.mxu0 %v5752_v46 }
 0x228   :  { %v5904_v4 = vadd.f32 %v2080_v6, %v5668_v11  ;;  %3264 = vmatpush1.bf16.msra.mxu1 %v5752_v46  ;;  %v2005_v48 = vpop.f32.mrf.mxu0  ;;  %3199 = vmatprep.subr.bf16.mxu0 %v5759_v15 }
 0x229   :  { %v2082_v13 = vpop.f32.mrf.mxu1  ;;  %3265 = vmatprep.subr.bf16.mxu1 %v5759_v15  ;;  %v5911_v20 = vadd.f32 %v2005_v48, %v5675_v44 }
 0x22a   :  { %v5914_v33 = vadd.f32 %v2082_v13, %v5678_v45  ;;  %v2009_v47 = vpop.f32.mrf.mxu0  ;;  %3124 = vmatmul.mubr.bf16.gmra.mxu0 %v5409_v10 }
 0x22b   :  { %v2086_v41 = vpop.f32.mrf.mxu1  ;;  %3181 = vmatmul.mubr.bf16.gmra.mxu1 %v4571_v34  ;;  %v5919_v11 = vadd.f32 %v2009_v47, %v5687_v30  ;;  %3200 = vmatpush1.bf16.msra.mxu0 %v5780_v24 }
 0x22c   :  { %v5922_v46 = vadd.f32 %v2086_v41, %v5690_v32  ;;  %3266 = vmatpush1.bf16.msra.mxu1 %v5780_v24  ;;  %v2011_v44 = vpop.f32.mrf.mxu0  ;;  %3201 = vmatprep.subr.bf16.mxu0 %v5787_v60 }
 0x22d   :  { %v2088_v15 = vpop.f32.mrf.mxu1  ;;  %3267 = vmatprep.subr.bf16.mxu1 %v5787_v60  ;;  %v5929_v10 = vadd.f32 %v2011_v44, %v5697_v18  ;;  %3227 = vmatprep.mubr.bf16.mxu0 %v4009_v1 }
 0x22e   :  { %v5932_v34 = vadd.f32 %v2088_v15, %v5700_v3  ;;  %3293 = vmatprep.mubr.bf16.mxu1 %v4009_v1  ;;  %v2013_v45 = vpop.f32.mrf.mxu0  ;;  %v90_v3 = vld [vmem:[%s6108_s0] sm:$0xc] }
 0x22f   :  { %v2090_v30 = vpop.f32.mrf.mxu1  ;;  %3202 = vmatpush1.bf16.msra.mxu0 %v5808_v16  ;;  %v3734_v24 = vcombine.low %v90_v3, %v5439_v5 }
 0x230   :  { %3268 = vmatpush1.bf16.msra.mxu1 %v5808_v16  ;;  %3203 = vmatprep.subr.bf16.mxu0 %v5815_v17  ;;  %v2014_v32 = vpop.f32.mrf.mxu0 }
 0x231   :  { %3269 = vmatprep.subr.bf16.mxu1 %v5815_v17  ;;  %v2091_v18 = vpop.f32.mrf.mxu1  ;;  %v3256_v60 = vrot.slane %v3734_v24, 2 }
 0x233   :  { %3204 = vmatpush1.bf16.msra.mxu0 %v5830_v53  ;;  %v3258_v5 = vsel %vm3255_vm2, %v3256_v60, %v3257_v57 }
 0x234   :  { %3270 = vmatpush1.bf16.msra.mxu1 %v5830_v53  ;;  %3205 = vmatprep.subr.bf16.mxu0 %v5837_v31 }
 0x235   :  { %3271 = vmatprep.subr.bf16.mxu1 %v5837_v31 }
 0x237   :  { %3206 = vmatpush1.bf16.msra.mxu0 %v5844_v56 }
 0x238   :  { %3272 = vmatpush1.bf16.msra.mxu1 %v5844_v56  ;;  %3207 = vmatprep.subr.bf16.mxu0 %v5851_v43 }
 0x239   :  { %3273 = vmatprep.subr.bf16.mxu1 %v5851_v43 }
 0x23b   :  { %3208 = vmatpush1.bf16.msra.mxu0 %v5858_v2 }
 0x23c   :  { %3274 = vmatpush1.bf16.msra.mxu1 %v5858_v2  ;;  %3209 = vmatprep.subr.bf16.mxu0 %v5865_v58 }
 0x23d   :  { %3275 = vmatprep.subr.bf16.mxu1 %v5865_v58 }
 0x23f   :  { %3210 = vmatpush1.bf16.msra.mxu0 %v5872_v39 }
 0x240   :  { %3276 = vmatpush1.bf16.msra.mxu1 %v5872_v39 }
 0x242   :  { %v2133_v16 = vpop.f32.mrf.mxu0  ;;  %3228 = vmatmul.mubr.bf16.vlgmr.msra.gmra.mxu0 %v5483_v40 }
 0x243   :  { %v2210_v49 = vpop.f32.mrf.mxu1  ;;  %3294 = vmatmul.mubr.bf16.vlgmr.msra.gmra.mxu1 %v3258_v5  ;;  %v2150_v27 = vadd.f32 %v2133_v16, %v5742_v21  ;;  %3237 = vmatprep.mubr.bf16.mxu0 %v4009_v1 }
 0x244   :  { %v2227_v17 = vadd.f32 %v2210_v49, %v5745_v54  ;;  %3303 = vmatprep.mubr.bf16.mxu1 %v4009_v1  ;;  %v2135_v63 = vpop.f32.mrf.mxu0 }
 0x245   :  { %v2212_v26 = vpop.f32.mrf.mxu1  ;;  %v2151_v51 = vadd.f32 %v2135_v63, %v5762_v9 }
 0x246   :  { %v2228_v53 = vadd.f32 %v2212_v26, %v5765_v37  ;;  %v2137_v31 = vpop.f32.mrf.mxu0 }
 0x247   :  { %v2214_v23 = vpop.f32.mrf.mxu1  ;;  %v2152_v42 = vadd.f32 %v2137_v31, %v5770_v38 }
 0x248   :  { %v2229_v40 = vadd.f32 %v2214_v23, %v5773_v19  ;;  %v2139_v56 = vpop.f32.mrf.mxu0 }
 0x249   :  { %v2216_v21 = vpop.f32.mrf.mxu1  ;;  %v2153_v54 = vadd.f32 %v2139_v56, %v5790_v62 }
 0x24a   :  { %v2230_v43 = vadd.f32 %v2216_v21, %v5793_v52  ;;  %v2143_v2 = vpop.f32.mrf.mxu0  ;;  %3238 = vmatmul.mubr.bf16.gmra.mxu0 %v5469_v29 }
 0x24b   :  { %v2220_v1 = vpop.f32.mrf.mxu1  ;;  %3304 = vmatmul.mubr.bf16.gmra.mxu1 %v3257_v57  ;;  %v2154_v9 = vadd.f32 %v2143_v2, %v5798_v50 }
 0x24c   :  { %v2231_v37 = vadd.f32 %v2220_v1, %v5801_v36  ;;  %v2145_v58 = vpop.f32.mrf.mxu0 }
 0x24d   :  { %v2222_v39 = vpop.f32.mrf.mxu1  ;;  %v2155_v38 = vadd.f32 %v2145_v58, %v5818_v7 }
 0x24e   :  { %v2232_v19 = vadd.f32 %v2222_v39, %v5821_v61  ;;  %v2147_v0 = vpop.f32.mrf.mxu0 }
 0x24f   :  { %v2224_v12 = vpop.f32.mrf.mxu1 }
 0x250   :  { %v2148_v62 = vpop.f32.mrf.mxu0 }
 0x251   :  { %v2225_v59 = vpop.f32.mrf.mxu1 }
 0x262   :  { %v2364_v52 = vpop.f32.mrf.mxu0 }
 0x263   :  { %v2421_v22 = vpop.f32.mrf.mxu1  ;;  %v2381_v35 = vadd.f32 %v2364_v52, %v5883_v14 }
 0x264   :  { %v2438_v29 = vadd.f32 %v2421_v22, %v5886_v55  ;;  %v2366_v6 = vpop.f32.mrf.mxu0 }
 0x265   :  { %v2423_v50 = vpop.f32.mrf.mxu1  ;;  %v2382_v36 = vadd.f32 %v2366_v6, %v5893_v8 }
 0x266   :  { %v2439_v48 = vadd.f32 %v2423_v50, %v5896_v28  ;;  %v2368_v13 = vpop.f32.mrf.mxu0 }
 0x267   :  { %v2425_v7 = vpop.f32.mrf.mxu1  ;;  %v2383_v61 = vadd.f32 %v2368_v13, %v5901_v25 }
 0x268   :  { %v2440_v47 = vadd.f32 %v2425_v7, %v5904_v4  ;;  %v2370_v41 = vpop.f32.mrf.mxu0 }
 0x269   :  { %v2427_v44 = vpop.f32.mrf.mxu1  ;;  %v2384_v15 = vadd.f32 %v2370_v41, %v5911_v20 }
 0x26a   :  { %v2441_v14 = vadd.f32 %v2427_v44, %v5914_v33  ;;  %v2374_v45 = vpop.f32.mrf.mxu0 }
 0x26b   :  { %v2431_v55 = vpop.f32.mrf.mxu1  ;;  %v2385_v30 = vadd.f32 %v2374_v45, %v5919_v11 }
 0x26c   :  { %v2442_v8 = vadd.f32 %v2431_v55, %v5922_v46  ;;  %v2376_v32 = vpop.f32.mrf.mxu0 }
 0x26d   :  { %v2433_v28 = vpop.f32.mrf.mxu1  ;;  %v2386_v18 = vadd.f32 %v2376_v32, %v5929_v10 }
 0x26e   :  { %v2443_v25 = vadd.f32 %v2433_v28, %v5932_v34  ;;  %v2378_v3 = vpop.f32.mrf.mxu0 }
 0x26f   :  { %v2435_v4 = vpop.f32.mrf.mxu1 }
 0x270   :  { %v2379_v24 = vpop.f32.mrf.mxu0 }
 0x271   :  { %v2436_v60 = vpop.f32.mrf.mxu1 }
 0x282   :  { %v2504_v57 = vpop.f32.mrf.mxu0 }
 0x283   :  { %v2586_v20 = vpop.f32.mrf.mxu1  ;;  %v5987_v5 = vadd.f32 %v2504_v57, %v2150_v27 }
 0x284   :  { %v5989_v33 = vadd.f32 %v2586_v20, %v2227_v17  ;;  %v2506_v16 = vpop.f32.mrf.mxu0 }
 0x285   :  { %v2588_v11 = vpop.f32.mrf.mxu1  ;;  %v5991_v49 = vadd.f32 %v2506_v16, %v2151_v51 }
 0x286   :  { %v5993_v46 = vadd.f32 %v2588_v11, %v2228_v53  ;;  %v2508_v63 = vpop.f32.mrf.mxu0 }
 0x287   :  { %v2590_v10 = vpop.f32.mrf.mxu1  ;;  %v5995_v26 = vadd.f32 %v2508_v63, %v2152_v42 }
 0x288   :  { %v5997_v34 = vadd.f32 %v2590_v10, %v2229_v40  ;;  %v2510_v31 = vpop.f32.mrf.mxu0 }
 0x289   :  { %v2592_v23 = vpop.f32.mrf.mxu1  ;;  %v5999_v56 = vadd.f32 %v2510_v31, %v2153_v54 }
 0x28a   :  { %v6001_v27 = vadd.f32 %v2592_v23, %v2230_v43  ;;  %v2514_v17 = vpop.f32.mrf.mxu0 }
 0x28b   :  { %v2596_v21 = vpop.f32.mrf.mxu1  ;;  %v6003_v2 = vadd.f32 %v2514_v17, %v2154_v9 }
 0x28c   :  { %v6005_v51 = vadd.f32 %v2596_v21, %v2231_v37  ;;  %v2516_v53 = vpop.f32.mrf.mxu0 }
 0x28d   :  { %v2598_v1 = vpop.f32.mrf.mxu1  ;;  %v6007_v58 = vadd.f32 %v2516_v53, %v2155_v38 }
 0x28e   :  { %v6009_v42 = vadd.f32 %v2598_v1, %v2232_v19  ;;  %v2518_v40 = vpop.f32.mrf.mxu0 }
 0x28f   :  { %v2600_v39 = vpop.f32.mrf.mxu1 }
 0x290   :  { %v2519_v0 = vpop.f32.mrf.mxu0 }
 0x291   :  { %v2601_v12 = vpop.f32.mrf.mxu1 }
 0x2a2   :  { %v2740_v54 = vpop.f32.mrf.mxu0 }
 0x2a3   :  { %v2797_v62 = vpop.f32.mrf.mxu1  ;;  %v2757_v43 = vadd.f32 %v2740_v54, %v2381_v35 }
 0x2a4   :  { %v2814_v59 = vadd.f32 %v2797_v62, %v2438_v29  ;;  %v2742_v52 = vpop.f32.mrf.mxu0 }
 0x2a5   :  { %v2799_v22 = vpop.f32.mrf.mxu1  ;;  %v2758_v9 = vadd.f32 %v2742_v52, %v2382_v36 }
 0x2a6   :  { %v2815_v6 = vadd.f32 %v2799_v22, %v2439_v48  ;;  %v2744_v37 = vpop.f32.mrf.mxu0 }
 0x2a7   :  { %v2801_v50 = vpop.f32.mrf.mxu1  ;;  %v2759_v13 = vadd.f32 %v2744_v37, %v2383_v61 }
 0x2a8   :  { %v2816_v7 = vadd.f32 %v2801_v50, %v2440_v47  ;;  %v2746_v38 = vpop.f32.mrf.mxu0 }
 0x2a9   :  { %v2803_v41 = vpop.f32.mrf.mxu1  ;;  %v2760_v19 = vadd.f32 %v2746_v38, %v2384_v15 }
 0x2aa   :  { %v2817_v44 = vadd.f32 %v2803_v41, %v2441_v14  ;;  %v2750_v45 = vpop.f32.mrf.mxu0 }
 0x2ab   :  { %v2807_v55 = vpop.f32.mrf.mxu1  ;;  %v2761_v32 = vadd.f32 %v2750_v45, %v2385_v30 }
 0x2ac   :  { %v2818_v28 = vadd.f32 %v2807_v55, %v2442_v8  ;;  %v2752_v3 = vpop.f32.mrf.mxu0 }
 0x2ad   :  { %v2809_v4 = vpop.f32.mrf.mxu1  ;;  %v2762_v35 = vadd.f32 %v2752_v3, %v2386_v18 }
 0x2ae   :  { %v2819_v29 = vadd.f32 %v2809_v4, %v2443_v25  ;;  %v2754_v24 = vpop.f32.mrf.mxu0 }
 0x2af   :  { %v2811_v60 = vpop.f32.mrf.mxu1 }
 0x2b0   :  { %v2755_v36 = vpop.f32.mrf.mxu0 }
 0x2b1   :  { %v2812_v48 = vpop.f32.mrf.mxu1 }
 0x2c2   :  { %v2879_v57 = vpop.f32.mrf.mxu0 }
 0x2c3   :  { %v2961_v20 = vpop.f32.mrf.mxu1 }
 0x2c4   :  { %v2881_v61 = vpop.f32.mrf.mxu0 }
 0x2c5   :  { %v2963_v47 = vpop.f32.mrf.mxu1 }
 0x2c6   :  { %v2883_v16 = vpop.f32.mrf.mxu0 }
 0x2c7   :  { %v6011_v11 = vpop.f32.mrf.mxu1 }
 0x2c8   :  { %v6013_v15 = vpop.f32.mrf.mxu0 }
 0x2c9   :  { %v6015_v14 = vpop.f32.mrf.mxu1 }
 0x2ca   :  { %v6017_v30 = vpop.f32.mrf.mxu0 }
 0x2cb   :  { %v6019_v8 = vpop.f32.mrf.mxu1 }
 0x2cc   :  { %v6021_v18 = vpop.f32.mrf.mxu0 }
 0x2cd   :  { %v6023_v25 = vpop.f32.mrf.mxu1 }
 0x2ce   :  { %v2893_v63 = vpop.f32.mrf.mxu0 }
 0x2cf   :  { %v2975_v10 = vpop.f32.mrf.mxu1 }
 0x2d0   :  { %v2894_v31 = vpop.f32.mrf.mxu0 }
 0x2d1   :  { %v2976_v23 = vpop.f32.mrf.mxu1 }
 0x2d2   :  { %v2896_v23 = vadd.f32 %v2879_v57, %v5987_v5 }
 0x2e2   :  { %v3115_v17 = vpop.f32.mrf.mxu0 }
 0x2e3   :  { %v3172_v21 = vpop.f32.mrf.mxu1  ;;  %v3132_v53 = vadd.f32 %v3115_v17, %v2757_v43  ;;  %v2978_v17 = vadd.f32 %v2961_v20, %v5989_v33  ;;  %v2980_v33 = vadd.f32 %v6011_v11, %v5997_v34  ;;  %v2982_v34 = vadd.f32 %v6019_v8, %v6005_v51 }
 0x2e4   :  { %v3189_v1 = vadd.f32 %v3172_v21, %v2814_v59  ;;  %v3117_v40 = vpop.f32.mrf.mxu0 }
 0x2e5   :  { %v3174_v39 = vpop.f32.mrf.mxu1  ;;  %v6025_v12 = vadd.f32 %v3117_v40, %v2758_v9  ;;  %v2979_v40 = vadd.f32 %v2963_v47, %v5993_v46 }
 0x2e6   :  { %v3318_v0 = vmax.f32 %v3132_v53, %v3189_v1  ;;  %v6027_v54 = vadd.f32 %v3174_v39, %v2815_v6  ;;  %v3119_v62 = vpop.f32.mrf.mxu0  ;;  %v2897_v1 = vadd.f32 %v2881_v61, %v5991_v49 }
 0x2e7   :  { %v3176_v52 = vpop.f32.mrf.mxu1  ;;  %v6031_v37 = vadd.f32 %v3119_v62, %v2759_v13 }
 0x2e8   :  { %v3319_v22 = vmax.f32 %v6025_v12, %v6027_v54  ;;  %v6033_v50 = vadd.f32 %v3176_v52, %v2816_v7  ;;  %v3121_v38 = vpop.f32.mrf.mxu0  ;;  %v2898_v54 = vadd.f32 %v2883_v16, %v5995_v26  ;;  %v2981_v26 = vadd.f32 %v6015_v14, %v6001_v27 }
 0x2e9   :  { %v3178_v41 = vpop.f32.mrf.mxu1  ;;  %v6037_v59 = vadd.f32 %v3121_v38, %v2760_v19  ;;  %v2900_v16 = vadd.f32 %v6017_v30, %v6003_v2 }
 0x2ea   :  { %v3320_v43 = vmax.f32 %v6031_v37, %v6033_v50  ;;  %v6039_v9 = vadd.f32 %v3178_v41, %v2817_v44  ;;  %v3125_v6 = vpop.f32.mrf.mxu0  ;;  %v2899_v41 = vadd.f32 %v6013_v15, %v5999_v56 }
 0x2eb   :  { %v3182_v45 = vpop.f32.mrf.mxu1  ;;  %v6043_v3 = vadd.f32 %v3125_v6, %v2761_v32  ;;  %v3338_v32 = vlaneseq }
 0x2ec   :  { %v3321_v55 = vmax.f32 %v6037_v59, %v6039_v9  ;;  %v6045_v13 = vadd.f32 %v3182_v45, %v2818_v28  ;;  %v3127_v7 = vpop.f32.mrf.mxu0 }
 0x2ed   :  { %v3184_v4 = vpop.f32.mrf.mxu1  ;;  %v6049_v60 = vadd.f32 %v3127_v7, %v2762_v35  ;;  %v3339_v31 = vshrl.u32 %v3338_v32, 7  ;;  %v3336_v35 = vld [vmem:[%s6109_s2] sm:$0x3] }
 0x2ee   :  { %v3322_v24 = vmax.f32 %v6043_v3, %v6045_v13  ;;  %v6051_v19 = vadd.f32 %v3184_v4, %v2819_v29  ;;  %v3129_v44 = vpop.f32.mrf.mxu0 }
 0x2ef   :  { %v3186_v36 = vpop.f32.mrf.mxu1  ;;  %v3340_v28 = vsub.s32 0, %v3339_v31  ;;  %v3344_v53 = vsub.s32 1, %v3339_v31 }
 0x2f0   :  { %v3323_v48 = vmax.f32 %v6049_v60, %v6051_v19  ;;  %v3130_v63 = vpop.f32.mrf.mxu0 }
 0x2f1   :  { %v3187_v10 = vpop.f32.mrf.mxu1  ;;  %v3341_v62 = vrot.slane %v3336_v35, %v3340_v28  ;;  %v3345_v6 = vrot.slane %v3336_v35, %v3344_v53  ;;  %v2983_v63 = vadd.f32 %v6023_v25, %v6009_v42 }
 0x302   :  { %v3229_v29 = vpop.f32.mrf.mxu0 }
 0x303   :  { %v3295_v21 = vpop.f32.mrf.mxu1  ;;  %v3246_v39 = vadd.f32 %v3229_v29, %v2896_v23 }
 0x304   :  { %v3312_v12 = vadd.f32 %v3295_v21, %v2978_v17  ;;  %v3231_v52 = vpop.f32.mrf.mxu0 }
 0x305   :  { %v3297_v5 = vpop.f32.mrf.mxu1  ;;  %v3247_v20 = vadd.f32 %v3231_v52, %v2897_v1 }
 0x306   :  { %v3324_v57 = vmax.f32 %v3246_v39, %v3312_v12  ;;  %v3313_v38 = vadd.f32 %v3297_v5, %v2979_v40  ;;  %v3233_v49 = vpop.f32.mrf.mxu0 }
 0x307   :  { %v3299_v61 = vpop.f32.mrf.mxu1  ;;  %v3248_v45 = vadd.f32 %v3233_v49, %v2898_v54 }
 0x308   :  { %v3330_v46 = vmax.f32 %v3318_v0, %v3324_v57  ;;  %v3325_v47 = vmax.f32 %v3247_v20, %v3313_v38  ;;  %v3314_v7 = vadd.f32 %v3299_v61, %v2980_v33  ;;  %v3235_v11 = vpop.f32.mrf.mxu0  ;;  %v2901_v0 = vadd.f32 %v6021_v18, %v6007_v58 }
 0x309   :  { %v3301_v4 = vpop.f32.mrf.mxu1  ;;  %v3249_v36 = vadd.f32 %v3235_v11, %v2899_v41 }
 0x30a   :  { %v3348_v44 = vadd.f32 %v3341_v62, %v3330_v46  ;;  %v3331_v56 = vmax.f32 %v3319_v22, %v3325_v47  ;;  %v3326_v15 = vmax.f32 %v3248_v45, %v3314_v7  ;;  %v3315_v10 = vadd.f32 %v3301_v4, %v2981_v26  ;;  %v3239_v27 = vpop.f32.mrf.mxu0 }
 0x30b   :  { %v3305_v14 = vpop.f32.mrf.mxu1  ;;  %v3250_v30 = vadd.f32 %v3239_v27, %v2900_v16 }
 0x30c   :  { %3354 = vst [vmem:[%s6110_s3] sm:$0xff] %v3348_v44  ;;  %v3349_v2 = vadd.f32 %v3345_v6, %v3331_v56  ;;  %v3332_v51 = vmax.f32 %v3320_v43, %v3326_v15  ;;  %v3316_v8 = vadd.f32 %v3305_v14, %v2982_v34  ;;  %v3327_v22 = vmax.f32 %v3249_v36, %v3315_v10  ;;  %v3241_v32 = vpop.f32.mrf.mxu0 }
 0x30d   :  { %v3307_v58 = vpop.f32.mrf.mxu1  ;;  %v3251_v25 = vadd.f32 %v3241_v32, %v2901_v0 }
 0x30e   :  { %3355 = vst [vmem:[%s6110_s3 + $0x8] sm:$0xff] %v3349_v2  ;;  %v3350_v42 = vadd.f32 %v3341_v62, %v3332_v51  ;;  %v3328_v18 = vmax.f32 %v3250_v30, %v3316_v8  ;;  %v3317_v31 = vadd.f32 %v3307_v58, %v2983_v63  ;;  %v3333_v28 = vmax.f32 %v3321_v55, %v3327_v22  ;;  %v3243_v23 = vpop.f32.mrf.mxu0 }
 0x30f   :  { %v3309_v37 = vpop.f32.mrf.mxu1 }
 0x310   :  { %3356 = vst [vmem:[%s6110_s3 + $0x10] sm:$0xff] %v3350_v42  ;;  %v3334_v50 = vmax.f32 %v3322_v24, %v3328_v18  ;;  %v3329_v43 = vmax.f32 %v3251_v25, %v3317_v31  ;;  %v3351_v17 = vadd.f32 %v3345_v6, %v3333_v28  ;;  %v3244_v35 = vpop.f32.mrf.mxu0 }
 0x311   :  { %v3310_v29 = vpop.f32.mrf.mxu1 }
 0x312   :  { %v3352_v21 = vadd.f32 %v3341_v62, %v3334_v50  ;;  %v3335_v59 = vmax.f32 %v3323_v48, %v3329_v43  ;;  %3357 = vst [vmem:[%s6110_s3 + $0x18] sm:$0xff] %v3351_v17 }
 0x314   :  { %3358 = vst [vmem:[%s6110_s3 + $0x20] sm:$0x3] %v3352_v21  ;;  %v3353_v9 = vadd.f32 %v3345_v6, %v3335_v59 }
 0x316   :  { %3359 = vst [vmem:[%s6110_s3 + $0x28] sm:$0x3] %v3353_v9 }

</bundles_post_ra>
